<compile_context>
chip_gen: v7x
topology: tpu7x:2x2x1
jax: 0.10.0
libtpu: 0.0.40
codegen_flags: <defaults>
</compile_context>

<pallas_src>
import jax
import jax.numpy as jnp
from jax.experimental import pallas as pl
from jax.experimental.pallas import tpu as pltpu

INPUT_HEIGHT = 48
INPUT_WIDTH = 74
Z_DIM = 2
Y_DIM = 10
BN_EPS = 1e-5
H2, W2, C2 = INPUT_HEIGHT // 4, INPUT_WIDTH // 4, 128        # 12, 18, 128
FLAT = H2 * W2 * C2                                          # 27648
CAT = 64                                                     # 40 + 10, padded to 64


# ---------------------------------------------------------------------------
# Pallas kernels
# ---------------------------------------------------------------------------
def _conv_block_kernel(p_ref, w_ref, scale_ref, shift_ref, o_ref):
    """One M-tile of im2col conv: patches @ W, folded conv-bias + BN(eval), LReLU."""
    acc = jnp.dot(p_ref[...], w_ref[...], preferred_element_type=jnp.float32)
    z = acc * scale_ref[...] + shift_ref[...]
    o_ref[...] = jnp.where(z >= 0, z, 0.2 * z).astype(o_ref.dtype)


def _head_kernel(flat_ref, w12_ref, b12_ref, ypad_ref,
                 wfa_ref, sfa_ref, tfa_ref, wfb_ref, bfb_ref,
                 o_ref, acc_ref):
    """K-tiled FC head: acc += flat_k @ W12_k; the cat/fc/BN/LReLU/fc tail
    runs only on the last K step."""
    k = pl.program_id(0)

    @pl.when(k == 0)
    def _():
        acc_ref[...] = jnp.zeros_like(acc_ref)

    acc_ref[...] += jnp.dot(flat_ref[...], w12_ref[...],
                            preferred_element_type=jnp.float32)

    @pl.when(k == pl.num_programs(0) - 1)
    def _():
        # cols 0:40 = fc1(x), 40:50 = fc2(x); ypad = [1]*40 ++ y ++ [0]*14
        xcat = (acc_ref[...] + b12_ref[...]) * ypad_ref[...]           # (B, 64)
        h = jnp.dot(xcat.astype(jnp.bfloat16), wfa_ref[...],
                    preferred_element_type=jnp.float32)                # (B, 1024)
        h = h * sfa_ref[...] + tfa_ref[...]     # Linear bias + BN1d(eval) folded
        h = jnp.where(h >= 0, h, 0.2 * h)       # LeakyReLU(0.2)
        o_ref[...] = (jnp.dot(h, wfb_ref[...],
                              preferred_element_type=jnp.float32)
                      + bfb_ref[...])


# ---------------------------------------------------------------------------
# Wrappers around pallas_call
# ---------------------------------------------------------------------------
def conv_bn_lrelu(patches, w_mat, scale, shift, tm=512):
    M, K = patches.shape
    N = w_mat.shape[1]
    Mp = ((M + tm - 1) // tm) * tm
    if Mp != M:
        patches = jnp.pad(patches, ((0, Mp - M), (0, 0)))
    out = pl.pallas_call(
        _conv_block_kernel,
        out_shape=jax.ShapeDtypeStruct((Mp, N), jnp.bfloat16),
        grid=(Mp // tm,),
        in_specs=[pl.BlockSpec((tm, K), lambda i: (i, 0)),
                  pl.BlockSpec((K, N), lambda i: (0, 0)),
                  pl.BlockSpec((1, N), lambda i: (0, 0)),
                  pl.BlockSpec((1, N), lambda i: (0, 0))],
        out_specs=pl.BlockSpec((tm, N), lambda i: (i, 0)),
        compiler_params=pltpu.CompilerParams(
            dimension_semantics=("parallel",)),
    )(patches, w_mat, scale, shift)
    return out[:M] if Mp != M else out


def fc_head(flat, ypad, p, tk=3456):
    B = flat.shape[0]
    assert FLAT % tk == 0 and tk % 128 == 0
    kt = FLAT // tk
    return pl.pallas_call(
        _head_kernel,
        out_shape=jax.ShapeDtypeStruct((B, 2 * Z_DIM), jnp.float32),
        grid=(kt,),
        in_specs=[
            pl.BlockSpec((B, tk), lambda k: (0, k)),            # flat (K-blocked)
            pl.BlockSpec((tk, CAT), lambda k: (k, 0)),          # fused fc1|fc2 W
            pl.BlockSpec((1, CAT), lambda k: (0, 0)),           # fused fc1|fc2 b
            pl.BlockSpec((B, CAT), lambda k: (0, 0)),           # ypad
            pl.BlockSpec((CAT, 1024), lambda k: (0, 0)),        # fc (cat->1024) W
            pl.BlockSpec((1, 1024), lambda k: (0, 0)),          # BN scale
            pl.BlockSpec((1, 1024), lambda k: (0, 0)),          # BN shift (+bias)
            pl.BlockSpec((1024, 2 * Z_DIM), lambda k: (0, 0)),  # final W
            pl.BlockSpec((1, 2 * Z_DIM), lambda k: (0, 0)),     # final b
        ],
        out_specs=pl.BlockSpec((B, 2 * Z_DIM), lambda k: (0, 0)),
        scratch_shapes=[pltpu.VMEM((B, CAT), jnp.float32)],
        compiler_params=pltpu.CompilerParams(
            dimension_semantics=("arbitrary",)),
    )(flat, p["w12"], p["b12"], ypad, p["fcA_w"], p["fcA_s"], p["fcA_t"],
      p["fcB_w"], p["fcB_b"])


# ---------------------------------------------------------------------------
# JAX glue: im2col, parameter init, full forward
# ---------------------------------------------------------------------------
def im2col(x_nhwc, k, stride, pad):
    B, H, W, C = x_nhwc.shape
    xp = jnp.pad(x_nhwc, ((0, 0), (pad, pad), (pad, pad), (0, 0)))
    Ho = (H + 2 * pad - k) // stride + 1
    Wo = (W + 2 * pad - k) // stride + 1
    cols = []
    for kh in range(k):
        for kw in range(k):
            cols.append(xp[:, kh:kh + stride * Ho:stride, kw:kw + stride * Wo:stride, :])
    patches = jnp.stack(cols, axis=3)             # (B, Ho, Wo, k*k, C)
    return patches.reshape(B * Ho * Wo, k * k * C), Ho, Wo


def _nchw_row_perm():
    # perm[h*W2*C2 + w*C2 + c] = c*H2*W2 + h*W2 + w ; permuting W12's rows with
    # this lets the kernel consume the NHWC-flattened conv output directly
    # (no transpose of h2 in the forward pass).
    c = jnp.arange(C2)
    h = jnp.arange(H2)
    w = jnp.arange(W2)
    idx = c[None, None, :] * (H2 * W2) + h[:, None, None] * W2 + w[None, :, None]
    return idx.reshape(-1)


def init_params(key):
    ks = jax.random.split(key, 16)

    def lin(k, fan_in, shape):
        return jax.random.normal(k, shape, jnp.float32) / jnp.sqrt(float(fan_in))

    def bn(k, c):
        kg, kb, km, kv = jax.random.split(k, 4)
        gamma = 1.0 + 0.1 * jax.random.normal(kg, (c,), jnp.float32)
        beta = 0.1 * jax.random.normal(kb, (c,), jnp.float32)
        r_mean = 0.1 * jax.random.normal(km, (c,), jnp.float32)
        r_var = 1.0 + 0.1 * jnp.abs(jax.random.normal(kv, (c,), jnp.float32))
        return gamma, beta, r_mean, r_var

    # conv_e weights (PyTorch layout (Cout, Cin, kH, kW)) and biases
    cw1 = lin(ks[0], 1 * 4 * 4, (64, 1, 4, 4));    cb1 = lin(ks[1], 1 * 4 * 4, (64,))
    cw2 = lin(ks[2], 64 * 4 * 4, (128, 64, 4, 4)); cb2 = lin(ks[3], 64 * 4 * 4, (128,))
    g1, be1, rm1, rv1 = bn(ks[4], 64)
    g2, be2, rm2, rv2 = bn(ks[5], 128)

    # fc1 / fc2 / fc  (fc1_w/fc2_w rows indexed in PyTorch NCHW-flatten order)
    fc1_w = lin(ks[6], FLAT, (FLAT, 40));      fc1_b = lin(ks[7], FLAT, (40,))
    fc2_w = lin(ks[8], FLAT, (FLAT, Y_DIM));   fc2_b = lin(ks[9], FLAT, (Y_DIM,))
    fcA_w = lin(ks[10], 40 + Y_DIM, (40 + Y_DIM, 1024))
    fcA_b = lin(ks[11], 40 + Y_DIM, (1024,))
    gA, beA, rmA, rvA = bn(ks[12], 1024)
    fcB_w = lin(ks[13], 1024, (1024, 2 * Z_DIM)); fcB_b = lin(ks[14], 1024, (2 * Z_DIM,))

    # fold conv/linear bias + eval-mode BatchNorm into per-channel scale/shift
    s1 = g1 / jnp.sqrt(rv1 + BN_EPS); t1 = (cb1 - rm1) * s1 + be1
    s2 = g2 / jnp.sqrt(rv2 + BN_EPS); t2 = (cb2 - rm2) * s2 + be2
    sA = gA / jnp.sqrt(rvA + BN_EPS); tA = (fcA_b - rmA) * sA + beA

    # conv weights -> im2col layout ((kh*kw*Cin), Cout) matching patch column order
    w1m = jnp.transpose(cw1, (2, 3, 1, 0)).reshape(16, 64).astype(jnp.bfloat16)
    w2m = jnp.transpose(cw2, (2, 3, 1, 0)).reshape(1024, 128).astype(jnp.bfloat16)

    # fuse fc1|fc2 into one (FLAT, 64) matrix (cols 0:40 fc1, 40:50 fc2, rest 0),
    # permute rows so the NHWC-flattened conv output matches PyTorch's NCHW .view,
    # and store in bf16 (halves HBM traffic of the dominant weight read).
    w12 = jnp.zeros((FLAT, CAT), jnp.float32)
    w12 = w12.at[:, :40].set(fc1_w).at[:, 40:40 + Y_DIM].set(fc2_w)
    w12 = w12[_nchw_row_perm()].astype(jnp.bfloat16)
    b12 = jnp.zeros((1, CAT), jnp.float32)
    b12 = b12.at[0, :40].set(fc1_b).at[0, 40:40 + Y_DIM].set(fc2_b)

    # fc (cat -> 1024) weight zero-padded from 50 to 64 rows
    fcA_w64 = jnp.zeros((CAT, 1024), jnp.float32).at[:40 + Y_DIM].set(fcA_w)
    fcA_w64 = fcA_w64.astype(jnp.bfloat16)

    return dict(
        w1m=w1m, s1=s1.reshape(1, 64), t1=t1.reshape(1, 64),
        w2m=w2m, s2=s2.reshape(1, 128), t2=t2.reshape(1, 128),
        w12=w12, b12=b12,
        fcA_w=fcA_w64, fcA_s=sA.reshape(1, 1024), fcA_t=tA.reshape(1, 1024),
        fcB_w=fcB_w, fcB_b=fcB_b.reshape(1, 2 * Z_DIM),
    )


def qz_xy_forward(params, x_nchw, y):
    B = x_nchw.shape[0]
    x = jnp.transpose(x_nchw, (0, 2, 3, 1)).astype(jnp.bfloat16)       # NHWC (B,48,74,1)

    # conv1 + BN + LeakyReLU -> (B, 24, 37, 64)
    p1, Ho1, Wo1 = im2col(x, 4, 2, 1)                                  # (B*888, 16)
    h1 = conv_bn_lrelu(p1, params["w1m"], params["s1"], params["t1"])
    h1 = h1.reshape(B, Ho1, Wo1, 64)

    # conv2 + BN + LeakyReLU -> (B*216, 128)
    # TODO(synk): form these 4x4 patches inside the Pallas kernel (in-VMEM strided
    # slices) to avoid materializing the 16x-expanded patch matrix in HBM.
    p2, Ho2, Wo2 = im2col(h1, 4, 2, 1)                                 # (B*216, 1024)
    h2 = conv_bn_lrelu(p2, params["w2m"], params["s2"], params["t2"])

    # NHWC flatten; w12 rows were pre-permuted to PyTorch's NCHW .view order,
    # so no transpose of h2 is needed here.
    flat = h2.reshape(B, FLAT)

    # ypad multiplies cols 40:50 (fc2 output) by y; cols 0:40 pass through.
    ypad = jnp.concatenate(
        [jnp.ones((B, 40), jnp.float32), y.astype(jnp.float32),
         jnp.zeros((B, CAT - 40 - Y_DIM), jnp.float32)], axis=1)

    out = fc_head(flat, ypad, params)                                  # (B, 4)
    mu = out[:, :Z_DIM]
    logvar = out[:, Z_DIM:]
    # TODO(synk): training-mode reparameterize draws fresh Gaussian noise; eval mode returns mu.
    z = mu
    return z, mu, logvar


if __name__ == "__main__":
    key = jax.random.PRNGKey(0)
    k_x, k_y, k_p = jax.random.split(key, 3)

    B = 2
    x = jax.random.normal(k_x, (B, 1, INPUT_HEIGHT, INPUT_WIDTH), jnp.float32)
    y = jax.nn.one_hot(jax.random.randint(k_y, (B,), 0, Y_DIM), Y_DIM, dtype=jnp.float32)
    params = init_params(k_p)

    z, mu, logvar = jax.jit(qz_xy_forward)(params, x, y)
    jax.block_until_ready(z)

    assert z.shape == (B, Z_DIM) and mu.shape == (B, Z_DIM) and logvar.shape == (B, Z_DIM)
    assert bool(jnp.all(jnp.isfinite(z)))
    print("KERNEL_OK")
</pallas_src>

<mosaic_0001>
module attributes {stable_mosaic.version = 11 : i64} {
  func.func @_conv_block_kernel(%arg0: i32, %arg1: memref<512x16xbf16, #tpu.memory_space<vmem>>, %arg2: memref<16x64xbf16, #tpu.memory_space<vmem>>, %arg3: memref<1x64xf32, #tpu.memory_space<vmem>>, %arg4: memref<1x64xf32, #tpu.memory_space<vmem>>, %arg5: memref<512x64xbf16, #tpu.memory_space<vmem>>) attributes {dimension_semantics = [#tpu.dimension_semantics<parallel>], iteration_bounds = array<i64: 4>, scalar_prefetch = 0 : i64, scratch_operands = 0 : i64, tpu.core_type = #tpu.core_type<tc>, window_params = [{transform_indices = @transform_0, window_bounds = array<i64: 512, 16>}, {pipeline_mode = #tpu.pipeline_mode<synchronous>, transform_indices = @transform_1, window_bounds = array<i64: 16, 64>}, {pipeline_mode = #tpu.pipeline_mode<synchronous>, transform_indices = @transform_2, window_bounds = array<i64: 1, 64>}, {pipeline_mode = #tpu.pipeline_mode<synchronous>, transform_indices = @transform_3, window_bounds = array<i64: 1, 64>}, {transform_indices = @transform_4, window_bounds = array<i64: 512, 64>}]} {
    %c0 = arith.constant 0 : index
    %c0_0 = arith.constant 0 : index
    %0 = vector.load %arg1[%c0, %c0_0] : memref<512x16xbf16, #tpu.memory_space<vmem>>, vector<512x16xbf16>
    %c0_1 = arith.constant 0 : index
    %c0_2 = arith.constant 0 : index
    %1 = vector.load %arg2[%c0_1, %c0_2] : memref<16x64xbf16, #tpu.memory_space<vmem>>, vector<16x64xbf16>
    %cst = arith.constant dense<0.000000e+00> : vector<512x64xf32>
    %2 = tpu.matmul %0, %1, %cst {dimension_numbers = #tpu.dot_dimension_numbers<[1], [0], [0], [1], [0, 0, 1, 1], [], []>} : vector<512x16xbf16>, vector<16x64xbf16>, vector<512x64xf32> -> vector<512x64xf32>
    %c0_3 = arith.constant 0 : index
    %c0_4 = arith.constant 0 : index
    %3 = vector.load %arg3[%c0_3, %c0_4] : memref<1x64xf32, #tpu.memory_space<vmem>>, vector<1x64xf32>
    %4 = vector.broadcast %3 : vector<1x64xf32> to vector<512x64xf32>
    %5 = arith.mulf %2, %4 : vector<512x64xf32>
    %c0_5 = arith.constant 0 : index
    %c0_6 = arith.constant 0 : index
    %6 = vector.load %arg4[%c0_5, %c0_6] : memref<1x64xf32, #tpu.memory_space<vmem>>, vector<1x64xf32>
    %7 = vector.broadcast %6 : vector<1x64xf32> to vector<512x64xf32>
    %8 = arith.addf %5, %7 : vector<512x64xf32>
    %cst_7 = arith.constant 0.000000e+00 : f32
    %9 = vector.broadcast %cst_7 : f32 to vector<512x64xf32>
    %10 = arith.cmpf oge, %8, %9 : vector<512x64xf32>
    %cst_8 = arith.constant 2.000000e-01 : f32
    %11 = vector.broadcast %cst_8 : f32 to vector<512x64xf32>
    %12 = arith.mulf %11, %8 : vector<512x64xf32>
    %13 = arith.select %10, %8, %12 : vector<512x64xi1>, vector<512x64xf32>
    %14 = arith.truncf %13 : vector<512x64xf32> to vector<512x64xbf16>
    %c0_9 = arith.constant 0 : index
    %c0_10 = arith.constant 0 : index
    %15 = vector.load %arg5[%c0_9, %c0_10] : memref<512x64xbf16, #tpu.memory_space<vmem>>, vector<512x64xbf16>
    tpu.vector_store %arg5[%c0_9, %c0_10], %14 {strides = array<i32>} : memref<512x64xbf16, #tpu.memory_space<vmem>>, vector<512x64xbf16>,
    return
  }
  func.func @transform_0(%arg0: i32) -> (i32, i32) {
    %c0_i32 = arith.constant 0 : i32
    %c0_i32_0 = arith.constant 0 : i32
    return %arg0, %c0_i32 : i32, i32
  }
  func.func @transform_1(%arg0: i32) -> (i32, i32) {
    %c0_i32 = arith.constant 0 : i32
    %c0_i32_0 = arith.constant 0 : i32
    %c0_i32_1 = arith.constant 0 : i32
    return %c0_i32, %c0_i32_0 : i32, i32
  }
  func.func @transform_2(%arg0: i32) -> (i32, i32) {
    %c0_i32 = arith.constant 0 : i32
    %c0_i32_0 = arith.constant 0 : i32
    %c0_i32_1 = arith.constant 0 : i32
    return %c0_i32, %c0_i32_0 : i32, i32
  }
  func.func @transform_3(%arg0: i32) -> (i32, i32) {
    %c0_i32 = arith.constant 0 : i32
    %c0_i32_0 = arith.constant 0 : i32
    %c0_i32_1 = arith.constant 0 : i32
    return %c0_i32, %c0_i32_0 : i32, i32
  }
  func.func @transform_4(%arg0: i32) -> (i32, i32) {
    %c0_i32 = arith.constant 0 : i32
    %c0_i32_0 = arith.constant 0 : i32
    return %arg0, %c0_i32 : i32, i32
  }
}

module attributes {stable_mosaic.version = 11 : i64} {
  func.func @_conv_block_kernel(%arg0: i32, %arg1: memref<512x1024xbf16, #tpu.memory_space<vmem>>, %arg2: memref<1024x128xbf16, #tpu.memory_space<vmem>>, %arg3: memref<1x128xf32, #tpu.memory_space<vmem>>, %arg4: memref<1x128xf32, #tpu.memory_space<vmem>>, %arg5: memref<512x128xbf16, #tpu.memory_space<vmem>>) attributes {dimension_semantics = [#tpu.dimension_semantics<parallel>], iteration_bounds = array<i64: 1>, scalar_prefetch = 0 : i64, scratch_operands = 0 : i64, tpu.core_type = #tpu.core_type<tc>, window_params = [{transform_indices = @transform_0, window_bounds = array<i64: 512, 1024>}, {pipeline_mode = #tpu.pipeline_mode<synchronous>, transform_indices = @transform_1, window_bounds = array<i64: 1024, 128>}, {pipeline_mode = #tpu.pipeline_mode<synchronous>, transform_indices = @transform_2, window_bounds = array<i64: 1, 128>}, {pipeline_mode = #tpu.pipeline_mode<synchronous>, transform_indices = @transform_3, window_bounds = array<i64: 1, 128>}, {transform_indices = @transform_4, window_bounds = array<i64: 512, 128>}]} {
    %c0 = arith.constant 0 : index
    %c0_0 = arith.constant 0 : index
    %0 = vector.load %arg1[%c0, %c0_0] : memref<512x1024xbf16, #tpu.memory_space<vmem>>, vector<512x1024xbf16>
    %c0_1 = arith.constant 0 : index
    %c0_2 = arith.constant 0 : index
    %1 = vector.load %arg2[%c0_1, %c0_2] : memref<1024x128xbf16, #tpu.memory_space<vmem>>, vector<1024x128xbf16>
    %cst = arith.constant dense<0.000000e+00> : vector<512x128xf32>
    %2 = tpu.matmul %0, %1, %cst {dimension_numbers = #tpu.dot_dimension_numbers<[1], [0], [0], [1], [0, 0, 1, 1], [], []>} : vector<512x1024xbf16>, vector<1024x128xbf16>, vector<512x128xf32> -> vector<512x128xf32>
    %c0_3 = arith.constant 0 : index
    %c0_4 = arith.constant 0 : index
    %3 = vector.load %arg3[%c0_3, %c0_4] : memref<1x128xf32, #tpu.memory_space<vmem>>, vector<1x128xf32>
    %4 = vector.broadcast %3 : vector<1x128xf32> to vector<512x128xf32>
    %5 = arith.mulf %2, %4 : vector<512x128xf32>
    %c0_5 = arith.constant 0 : index
    %c0_6 = arith.constant 0 : index
    %6 = vector.load %arg4[%c0_5, %c0_6] : memref<1x128xf32, #tpu.memory_space<vmem>>, vector<1x128xf32>
    %7 = vector.broadcast %6 : vector<1x128xf32> to vector<512x128xf32>
    %8 = arith.addf %5, %7 : vector<512x128xf32>
    %cst_7 = arith.constant 0.000000e+00 : f32
    %9 = vector.broadcast %cst_7 : f32 to vector<512x128xf32>
    %10 = arith.cmpf oge, %8, %9 : vector<512x128xf32>
    %cst_8 = arith.constant 2.000000e-01 : f32
    %11 = vector.broadcast %cst_8 : f32 to vector<512x128xf32>
    %12 = arith.mulf %11, %8 : vector<512x128xf32>
    %13 = arith.select %10, %8, %12 : vector<512x128xi1>, vector<512x128xf32>
    %14 = arith.truncf %13 : vector<512x128xf32> to vector<512x128xbf16>
    %c0_9 = arith.constant 0 : index
    %c0_10 = arith.constant 0 : index
    %15 = vector.load %arg5[%c0_9, %c0_10] : memref<512x128xbf16, #tpu.memory_space<vmem>>, vector<512x128xbf16>
    tpu.vector_store %arg5[%c0_9, %c0_10], %14 {strides = array<i32>} : memref<512x128xbf16, #tpu.memory_space<vmem>>, vector<512x128xbf16>,
    return
  }
  func.func @transform_0(%arg0: i32) -> (i32, i32) {
    %c0_i32 = arith.constant 0 : i32
    %c0_i32_0 = arith.constant 0 : i32
    return %arg0, %c0_i32 : i32, i32
  }
  func.func @transform_1(%arg0: i32) -> (i32, i32) {
    %c0_i32 = arith.constant 0 : i32
    %c0_i32_0 = arith.constant 0 : i32
    %c0_i32_1 = arith.constant 0 : i32
    return %c0_i32, %c0_i32_0 : i32, i32
  }
  func.func @transform_2(%arg0: i32) -> (i32, i32) {
    %c0_i32 = arith.constant 0 : i32
    %c0_i32_0 = arith.constant 0 : i32
    %c0_i32_1 = arith.constant 0 : i32
    return %c0_i32, %c0_i32_0 : i32, i32
  }
  func.func @transform_3(%arg0: i32) -> (i32, i32) {
    %c0_i32 = arith.constant 0 : i32
    %c0_i32_0 = arith.constant 0 : i32
    %c0_i32_1 = arith.constant 0 : i32
    return %c0_i32, %c0_i32_0 : i32, i32
  }
  func.func @transform_4(%arg0: i32) -> (i32, i32) {
    %c0_i32 = arith.constant 0 : i32
    %c0_i32_0 = arith.constant 0 : i32
    return %arg0, %c0_i32 : i32, i32
  }
}

module attributes {stable_mosaic.version = 11 : i64} {
  func.func @_head_kernel(%arg0: i32, %arg1: memref<2x3456xbf16, #tpu.memory_space<vmem>>, %arg2: memref<3456x64xbf16, #tpu.memory_space<vmem>>, %arg3: memref<1x64xf32, #tpu.memory_space<vmem>>, %arg4: memref<2x64xf32, #tpu.memory_space<vmem>>, %arg5: memref<64x1024xbf16, #tpu.memory_space<vmem>>, %arg6: memref<1x1024xf32, #tpu.memory_space<vmem>>, %arg7: memref<1x1024xf32, #tpu.memory_space<vmem>>, %arg8: memref<1024x4xf32, #tpu.memory_space<vmem>>, %arg9: memref<1x4xf32, #tpu.memory_space<vmem>>, %arg10: memref<2x4xf32, #tpu.memory_space<vmem>>, %arg11: memref<2x64xf32, #tpu.memory_space<vmem>>) attributes {dimension_semantics = [#tpu.dimension_semantics<arbitrary>], iteration_bounds = array<i64: 8>, scalar_prefetch = 0 : i64, scratch_operands = 1 : i64, tpu.core_type = #tpu.core_type<tc>, window_params = [{transform_indices = @transform_0, window_bounds = array<i64: 2, 3456>}, {transform_indices = @transform_1, window_bounds = array<i64: 3456, 64>}, {pipeline_mode = #tpu.pipeline_mode<synchronous>, transform_indices = @transform_2, window_bounds = array<i64: 1, 64>}, {pipeline_mode = #tpu.pipeline_mode<synchronous>, transform_indices = @transform_3, window_bounds = array<i64: 2, 64>}, {pipeline_mode = #tpu.pipeline_mode<synchronous>, transform_indices = @transform_4, window_bounds = array<i64: 64, 1024>}, {pipeline_mode = #tpu.pipeline_mode<synchronous>, transform_indices = @transform_5, window_bounds = array<i64: 1, 1024>}, {pipeline_mode = #tpu.pipeline_mode<synchronous>, transform_indices = @transform_6, window_bounds = array<i64: 1, 1024>}, {pipeline_mode = #tpu.pipeline_mode<synchronous>, transform_indices = @transform_7, window_bounds = array<i64: 1024, 4>}, {pipeline_mode = #tpu.pipeline_mode<synchronous>, transform_indices = @transform_8, window_bounds = array<i64: 1, 4>}, {pipeline_mode = #tpu.pipeline_mode<synchronous>, transform_indices = @transform_9, window_bounds = array<i64: 2, 4>}]} {
    %c0_i32 = arith.constant 0 : i32
    %0 = arith.cmpi eq, %arg0, %c0_i32 : i32
    %1 = arith.extui %0 : i1 to i32
    %c0_i32_0 = arith.constant 0 : i32
    %2 = arith.cmpi ne, %1, %c0_i32_0 : i32
    scf.if %2 {
      %cst_9 = arith.constant 0.000000e+00 : f32
      %12 = vector.broadcast %cst_9 : f32 to vector<2x64xf32>
      %c0_10 = arith.constant 0 : index
      %c0_11 = arith.constant 0 : index
      %13 = vector.load %arg11[%c0_10, %c0_11] : memref<2x64xf32, #tpu.memory_space<vmem>>, vector<2x64xf32>
      tpu.vector_store %arg11[%c0_10, %c0_11], %12 {strides = array<i32>} : memref<2x64xf32, #tpu.memory_space<vmem>>, vector<2x64xf32>,
    } else {
    }
    %c0 = arith.constant 0 : index
    %c0_1 = arith.constant 0 : index
    %3 = vector.load %arg11[%c0, %c0_1] : memref<2x64xf32, #tpu.memory_space<vmem>>, vector<2x64xf32>
    %c0_2 = arith.constant 0 : index
    %c0_3 = arith.constant 0 : index
    %4 = vector.load %arg1[%c0_2, %c0_3] : memref<2x3456xbf16, #tpu.memory_space<vmem>>, vector<2x3456xbf16>
    %c0_4 = arith.constant 0 : index
    %c0_5 = arith.constant 0 : index
    %5 = vector.load %arg2[%c0_4, %c0_5] : memref<3456x64xbf16, #tpu.memory_space<vmem>>, vector<3456x64xbf16>
    %cst = arith.constant dense<0.000000e+00> : vector<2x64xf32>
    %6 = tpu.matmul %4, %5, %cst {dimension_numbers = #tpu.dot_dimension_numbers<[1], [0], [0], [1], [0, 0, 1, 1], [], []>} : vector<2x3456xbf16>, vector<3456x64xbf16>, vector<2x64xf32> -> vector<2x64xf32>
    %7 = arith.addf %3, %6 : vector<2x64xf32>
    %c0_6 = arith.constant 0 : index
    %c0_7 = arith.constant 0 : index
    %8 = vector.load %arg11[%c0_6, %c0_7] : memref<2x64xf32, #tpu.memory_space<vmem>>, vector<2x64xf32>
    tpu.vector_store %arg11[%c0_6, %c0_7], %7 {strides = array<i32>} : memref<2x64xf32, #tpu.memory_space<vmem>>, vector<2x64xf32>,
    %c7_i32 = arith.constant 7 : i32
    %9 = arith.cmpi eq, %arg0, %c7_i32 : i32
    %10 = arith.extui %9 : i1 to i32
    %c0_i32_8 = arith.constant 0 : i32
    %11 = arith.cmpi ne, %10, %c0_i32_8 : i32
    scf.if %11 {
      %c0_9 = arith.constant 0 : index
      %c0_10 = arith.constant 0 : index
      %12 = vector.load %arg11[%c0_9, %c0_10] : memref<2x64xf32, #tpu.memory_space<vmem>>, vector<2x64xf32>
      %c0_11 = arith.constant 0 : index
      %c0_12 = arith.constant 0 : index
      %13 = vector.load %arg3[%c0_11, %c0_12] : memref<1x64xf32, #tpu.memory_space<vmem>>, vector<1x64xf32>
      %14 = vector.broadcast %13 : vector<1x64xf32> to vector<2x64xf32>
      %15 = arith.addf %12, %14 : vector<2x64xf32>
      %c0_13 = arith.constant 0 : index
      %c0_14 = arith.constant 0 : index
      %16 = vector.load %arg4[%c0_13, %c0_14] : memref<2x64xf32, #tpu.memory_space<vmem>>, vector<2x64xf32>
      %17 = arith.mulf %15, %16 : vector<2x64xf32>
      %18 = arith.truncf %17 : vector<2x64xf32> to vector<2x64xbf16>
      %c0_15 = arith.constant 0 : index
      %c0_16 = arith.constant 0 : index
      %19 = vector.load %arg5[%c0_15, %c0_16] : memref<64x1024xbf16, #tpu.memory_space<vmem>>, vector<64x1024xbf16>
      %cst_17 = arith.constant dense<0.000000e+00> : vector<2x1024xf32>
      %20 = tpu.matmul %18, %19, %cst_17 {dimension_numbers = #tpu.dot_dimension_numbers<[1], [0], [0], [1], [0, 0, 1, 1], [], []>} : vector<2x64xbf16>, vector<64x1024xbf16>, vector<2x1024xf32> -> vector<2x1024xf32>
      %c0_18 = arith.constant 0 : index
      %c0_19 = arith.constant 0 : index
      %21 = vector.load %arg6[%c0_18, %c0_19] : memref<1x1024xf32, #tpu.memory_space<vmem>>, vector<1x1024xf32>
      %22 = vector.broadcast %21 : vector<1x1024xf32> to vector<2x1024xf32>
      %23 = arith.mulf %20, %22 : vector<2x1024xf32>
      %c0_20 = arith.constant 0 : index
      %c0_21 = arith.constant 0 : index
      %24 = vector.load %arg7[%c0_20, %c0_21] : memref<1x1024xf32, #tpu.memory_space<vmem>>, vector<1x1024xf32>
      %25 = vector.broadcast %24 : vector<1x1024xf32> to vector<2x1024xf32>
      %26 = arith.addf %23, %25 : vector<2x1024xf32>
      %cst_22 = arith.constant 0.000000e+00 : f32
      %27 = vector.broadcast %cst_22 : f32 to vector<2x1024xf32>
      %28 = arith.cmpf oge, %26, %27 : vector<2x1024xf32>
      %cst_23 = arith.constant 2.000000e-01 : f32
      %29 = vector.broadcast %cst_23 : f32 to vector<2x1024xf32>
      %30 = arith.mulf %29, %26 : vector<2x1024xf32>
      %31 = arith.select %28, %26, %30 : vector<2x1024xi1>, vector<2x1024xf32>
      %c0_24 = arith.constant 0 : index
      %c0_25 = arith.constant 0 : index
      %32 = vector.load %arg8[%c0_24, %c0_25] : memref<1024x4xf32, #tpu.memory_space<vmem>>, vector<1024x4xf32>
      %cst_26 = arith.constant dense<0.000000e+00> : vector<2x4xf32>
      %33 = tpu.matmul %31, %32, %cst_26 {dimension_numbers = #tpu.dot_dimension_numbers<[1], [0], [0], [1], [0, 0, 1, 1], [], []>} : vector<2x1024xf32>, vector<1024x4xf32>, vector<2x4xf32> -> vector<2x4xf32>
      %c0_27 = arith.constant 0 : index
      %c0_28 = arith.constant 0 : index
      %34 = vector.load %arg9[%c0_27, %c0_28] : memref<1x4xf32, #tpu.memory_space<vmem>>, vector<1x4xf32>
      %35 = vector.broadcast %34 : vector<1x4xf32> to vector<2x4xf32>
      %36 = arith.addf %33, %35 : vector<2x4xf32>
      %c0_29 = arith.constant 0 : index
      %c0_30 = arith.constant 0 : index
      %37 = vector.load %arg10[%c0_29, %c0_30] : memref<2x4xf32, #tpu.memory_space<vmem>>, vector<2x4xf32>
      tpu.vector_store %arg10[%c0_29, %c0_30], %36 {strides = array<i32>} : memref<2x4xf32, #tpu.memory_space<vmem>>, vector<2x4xf32>,
    } else {
    }
    return
  }
  func.func @transform_0(%arg0: i32) -> (i32, i32) {
    %c0_i32 = arith.constant 0 : i32
    %c0_i32_0 = arith.constant 0 : i32
    return %c0_i32, %arg0 : i32, i32
  }
  func.func @transform_1(%arg0: i32) -> (i32, i32) {
    %c0_i32 = arith.constant 0 : i32
    %c0_i32_0 = arith.constant 0 : i32
    return %arg0, %c0_i32 : i32, i32
  }
  func.func @transform_2(%arg0: i32) -> (i32, i32) {
    %c0_i32 = arith.constant 0 : i32
    %c0_i32_0 = arith.constant 0 : i32
    %c0_i32_1 = arith.constant 0 : i32
    return %c0_i32, %c0_i32_0 : i32, i32
  }
  func.func @transform_3(%arg0: i32) -> (i32, i32) {
    %c0_i32 = arith.constant 0 : i32
    %c0_i32_0 = arith.constant 0 : i32
    %c0_i32_1 = arith.constant 0 : i32
    return %c0_i32, %c0_i32_0 : i32, i32
  }
  func.func @transform_4(%arg0: i32) -> (i32, i32) {
    %c0_i32 = arith.constant 0 : i32
    %c0_i32_0 = arith.constant 0 : i32
    %c0_i32_1 = arith.constant 0 : i32
    return %c0_i32, %c0_i32_0 : i32, i32
  }
  func.func @transform_5(%arg0: i32) -> (i32, i32) {
    %c0_i32 = arith.constant 0 : i32
    %c0_i32_0 = arith.constant 0 : i32
    %c0_i32_1 = arith.constant 0 : i32
    return %c0_i32, %c0_i32_0 : i32, i32
  }
  func.func @transform_6(%arg0: i32) -> (i32, i32) {
    %c0_i32 = arith.constant 0 : i32
    %c0_i32_0 = arith.constant 0 : i32
    %c0_i32_1 = arith.constant 0 : i32
    return %c0_i32, %c0_i32_0 : i32, i32
  }
  func.func @transform_7(%arg0: i32) -> (i32, i32) {
    %c0_i32 = arith.constant 0 : i32
    %c0_i32_0 = arith.constant 0 : i32
    %c0_i32_1 = arith.constant 0 : i32
    return %c0_i32, %c0_i32_0 : i32, i32
  }
  func.func @transform_8(%arg0: i32) -> (i32, i32) {
    %c0_i32 = arith.constant 0 : i32
    %c0_i32_0 = arith.constant 0 : i32
    %c0_i32_1 = arith.constant 0 : i32
    return %c0_i32, %c0_i32_0 : i32, i32
  }
  func.func @transform_9(%arg0: i32) -> (i32, i32) {
    %c0_i32 = arith.constant 0 : i32
    %c0_i32_0 = arith.constant 0 : i32
    %c0_i32_1 = arith.constant 0 : i32
    return %c0_i32, %c0_i32_0 : i32, i32
  }
}

</mosaic_0001>

<bundles_post_ra>
// kernel: qz_xy_forward.3
= control target key start
LH: loop header
LB: loop body
LE: loop exit
PB: predicated region body
PF: predicated region fallthrough
CT: control target
= control target key end

     0   :  { %s1912_s15 = smov 0   ;;  %s2398_s0 = inlined_call_operand.vmem [shape: bf16[2048,16], index: 0, kind: input, shape index: {}]   ;;  %s2399_s1 = inlined_call_operand.vmem [shape: bf16[16,64], index: 1, kind: input, shape index: {}]   ;;  %s2400_s2 = inlined_call_operand.vmem [shape: f32[1,64], index: 2, kind: input, shape index: {}]   ;;  %s2401_s3 = inlined_call_operand.vmem [shape: f32[1,64], index: 3, kind: input, shape index: {}]   ;;  %s2402_s4 = inlined_call_operand.vmem [shape: bf16[2048,64], index: 4, kind: output, shape index: {}]  }
   0x1 LB: > { %s1531_s16 = sadd.s32 4294967295, %s1885_s15   ;;  %p1535_p0 = scmp.ge.s32.totalorder %s1885_s15, 1  ;;  %s1885_s15 = sphi %s1912_s15, %s14_s15  }
   0x2   : > { %p163_p1 = scmp.lt.s32.totalorder %s1885_s15, 5 }
   0x4   : > { %p164_p2 = pnand %p1535_p0, %p163_p1 }
   0x5   : > { %v1846_v0 = vld [vmem:[%s2399_s1] sm:$0xff] (!%p164_p2)   ;;  %s1536_s19 = sshll.u32 (!%p164_p2), %s1531_s16, 6  ;;  %vm434_vm0 = vcmask (!%p164_p2), 130048   ;;  %vm1410_vm1 = vcmask (!%p164_p2), 519168  }
   0x6   : > { %167 = sbr.rel (%p164_p2) target bundleno = 334 (0x14e), region = 36  ;;  %p190_p3 = scmp.lt.s32.totalorder (!%p164_p2), %s1536_s19, 255  ;;  %1770 = vmatprep.subr.bf16.mxu0 (!%p164_p2), %v1846_v0  ;;  %1836 = vmatprep.subr.bf16.mxu1 (!%p164_p2), %v1846_v0  ;;  %v2000_v33 = vld [vmem:[%s2400_s2] ss:$0 sm:$0xff] (!%p164_p2) }
   0x7   : > { %1771 = vmatpush3.bf16.msra.mxu0 (!%p164_p2), %v1846_v0  ;;  %1837 = vmatpush3.bf16.msra.mxu1 (!%p164_p2), %v1846_v0  ;;  %v2005_v35 = vld [vmem:[%s2401_s3] ss:$0 sm:$0xff] (!%p164_p2) }
   0xd   : > { %s2404_s19 = smov (!%p190_p3, %s1536_s19), 255 }
   0xe   : > { %s1537_s20 = sshll.u32 %s2404_s19, 2 }
   0xf   : > { %s1931_s23 = scalar_lea.vmem %s2398_s0, %s1537_s20  ;;  %s2024_s30 = scalar_lea.vmem %s2402_s4, %s1537_s20 }
  0x10   : > { %v1847_v1 = vld [vmem:[%s1931_s23] sm:$0xff]   ;;  %v1849_v3 = vld [vmem:[%s1931_s23 + $0x8] sm:$0xff]   ;;  %v1851_v5 = vld [vmem:[%s1931_s23 + $0x10] sm:$0xff]  }
  0x11   : > { %v1848_v2 = vld [vmem:[%s1931_s23 + $0x80] sm:$0xff]   ;;  %1772 = vmatprep.mubr.msk.bf16.mxu0 %vm434_vm0, %v1847_v1  ;;  %v1850_v4 = vld [vmem:[%s1931_s23 + $0x88] sm:$0xff]   ;;  %v1852_v6 = vld [vmem:[%s1931_s23 + $0x90] sm:$0xff]  }
  0x12   : > { %1804 = vmatprep.mubr.msk.bf16.mxu1 %vm434_vm0, %v1848_v2  ;;  %1773 = vmatmul.mubr.msk.bf16.vlgmr.msra.gmra.mrb[0].mxu0 %vm434_vm0, %v1849_v3  ;;  %v1853_v7 = vld [vmem:[%s1931_s23 + $0x18] sm:$0xff]   ;;  %v1855_v9 = vld [vmem:[%s1931_s23 + $0x20] sm:$0xff]   ;;  %v1857_v11 = vld [vmem:[%s1931_s23 + $0x28] sm:$0xff]  }
  0x13   : > { %1805 = vmatmul.mubr.msk.bf16.vlgmr.msra.gmra.mrb[0].mxu1 %vm434_vm0, %v1850_v4  ;;  %1776 = vmatprep.mubr.msk.bf16.mxu0 %vm434_vm0, %v1851_v5  ;;  %v1854_v8 = vld [vmem:[%s1931_s23 + $0x98] sm:$0xff]   ;;  %v1856_v10 = vld [vmem:[%s1931_s23 + $0xa0] sm:$0xff]   ;;  %v1858_v12 = vld [vmem:[%s1931_s23 + $0xa8] sm:$0xff]  }
  0x14   : > { %1808 = vmatprep.mubr.msk.bf16.mxu1 %vm434_vm0, %v1852_v6  ;;  %v1859_v13 = vld [vmem:[%s1931_s23 + $0x30] sm:$0xff]   ;;  %v1861_v15 = vld [vmem:[%s1931_s23 + $0x38] sm:$0xff]   ;;  %v1863_v17 = vld [vmem:[%s1931_s23 + $0x40] sm:$0xff]  }
  0x15   : > { %v1860_v14 = vld [vmem:[%s1931_s23 + $0xb0] sm:$0xff]   ;;  %v1862_v16 = vld [vmem:[%s1931_s23 + $0xb8] sm:$0xff]   ;;  %v1864_v18 = vld [vmem:[%s1931_s23 + $0xc0] sm:$0xff]  }
  0x16   : > { %v1865_v19 = vld [vmem:[%s1931_s23 + $0x48] sm:$0xff]   ;;  %v1867_v21 = vld [vmem:[%s1931_s23 + $0x50] sm:$0xff]   ;;  %v1869_v23 = vld [vmem:[%s1931_s23 + $0x58] sm:$0xff]  }
  0x17   : > { %v1866_v20 = vld [vmem:[%s1931_s23 + $0xc8] sm:$0xff]   ;;  %v1868_v22 = vld [vmem:[%s1931_s23 + $0xd0] sm:$0xff]   ;;  %v1870_v24 = vld [vmem:[%s1931_s23 + $0xd8] sm:$0xff]  }
  0x18   : > { %v1871_v25 = vld [vmem:[%s1931_s23 + $0x60] sm:$0xff]   ;;  %v1873_v27 = vld [vmem:[%s1931_s23 + $0x68] sm:$0xff]   ;;  %v1875_v29 = vld [vmem:[%s1931_s23 + $0x70] sm:$0xff]  }
  0x19   : > { %v1872_v26 = vld [vmem:[%s1931_s23 + $0xe0] sm:$0xff]   ;;  %v1874_v28 = vld [vmem:[%s1931_s23 + $0xe8] sm:$0xff]   ;;  %v1876_v30 = vld [vmem:[%s1931_s23 + $0xf0] sm:$0xff]  }
  0x1a   : > { %1777 = vmatmul.mubr.msk.bf16.gmra.mrb[4].mxu0 %vm434_vm0, %v1853_v7  ;;  %v1877_v31 = vld [vmem:[%s1931_s23 + $0x78] sm:$0xff]  }
  0x1b   : > { %1809 = vmatmul.mubr.msk.bf16.gmra.mrb[4].mxu1 %vm434_vm0, %v1854_v8  ;;  %1780 = vmatprep.mubr.msk.bf16.mxu0 %vm434_vm0, %v1855_v9  ;;  %v1878_v32 = vld [vmem:[%s1931_s23 + $0xf8] sm:$0xff]  }
  0x1c   : > { %1812 = vmatprep.mubr.msk.bf16.mxu1 %vm434_vm0, %v1856_v10 }
  0x22   : > { %1781 = vmatmul.mubr.msk.bf16.gmra.mrb[8].mxu0 %vm434_vm0, %v1857_v11 }
  0x23   : > { %1813 = vmatmul.mubr.msk.bf16.gmra.mrb[8].mxu1 %vm434_vm0, %v1858_v12  ;;  %1784 = vmatprep.mubr.msk.bf16.mxu0 %vm434_vm0, %v1859_v13 }
  0x24   : > { %1816 = vmatprep.mubr.msk.bf16.mxu1 %vm434_vm0, %v1860_v14 }
  0x2a   : > { %1785 = vmatmul.mubr.msk.bf16.gmra.mrb[12].mxu0 %vm434_vm0, %v1861_v15 }
  0x2b   : > { %1817 = vmatmul.mubr.msk.bf16.gmra.mrb[12].mxu1 %vm434_vm0, %v1862_v16  ;;  %1788 = vmatprep.mubr.msk.bf16.mxu0 %vm434_vm0, %v1863_v17 }
  0x2c   : > { %1820 = vmatprep.mubr.msk.bf16.mxu1 %vm434_vm0, %v1864_v18 }
  0x32   : > { %1789 = vmatmul.mubr.msk.bf16.gmra.mrb[16].mxu0 %vm434_vm0, %v1865_v19 }
  0x33   : > { %1821 = vmatmul.mubr.msk.bf16.gmra.mrb[16].mxu1 %vm434_vm0, %v1866_v20  ;;  %1792 = vmatprep.mubr.msk.bf16.mxu0 %vm434_vm0, %v1867_v21 }
  0x34   : > { %1824 = vmatprep.mubr.msk.bf16.mxu1 %vm434_vm0, %v1868_v22 }
  0x3a   : > { %1793 = vmatmul.mubr.msk.bf16.gmra.mrb[20].mxu0 %vm434_vm0, %v1869_v23 }
  0x3b   : > { %1825 = vmatmul.mubr.msk.bf16.gmra.mrb[20].mxu1 %vm434_vm0, %v1870_v24  ;;  %1796 = vmatprep.mubr.msk.bf16.mxu0 %vm434_vm0, %v1871_v25 }
  0x3c   : > { %1828 = vmatprep.mubr.msk.bf16.mxu1 %vm434_vm0, %v1872_v26 }
  0x42   : > { %1797 = vmatmul.mubr.msk.bf16.gmra.mrb[24].mxu0 %vm434_vm0, %v1873_v27 }
  0x43   : > { %1829 = vmatmul.mubr.msk.bf16.gmra.mrb[24].mxu1 %vm434_vm0, %v1874_v28  ;;  %1800 = vmatprep.mubr.msk.bf16.mxu0 %vm434_vm0, %v1875_v29 }
  0x44   : > { %1832 = vmatprep.mubr.msk.bf16.mxu1 %vm434_vm0, %v1876_v30 }
  0x4a   : > { %1801 = vmatmul.mubr.msk.bf16.gmra.mrb[28].mxu0 %vm434_vm0, %v1877_v31 }
  0x4b   : > { %1833 = vmatmul.mubr.msk.bf16.gmra.mrb[28].mxu1 %vm434_vm0, %v1878_v32 }
  0xe5   : > { %v1774_v34 = vpop.f32.mrb[0].mxu0 }
  0xe6   : > { %v829_v36 = vmul.f32 %v1774_v34, %v2000_v33  ;;  %v1806_v37 = vpop.f32.mrb[0].mxu1  ;;  %v565_v38 = vpop.f32.mrb[1].mxu0 }
  0xe7   : > { %v861_v39 = vmul.f32 %v1806_v37, %v2000_v33  ;;  %v827_v40 = vmul.f32 %v2000_v33, %v565_v38  ;;  %v693_v41 = vpop.f32.mrb[1].mxu1  ;;  %v1775_v42 = vpop.f32.mrb[2].mxu0 }
  0xe8   : > { %v900_v43 = vadd.f32 %v2005_v35, %v829_v36  ;;  %v859_v44 = vmul.f32 %v2000_v33, %v693_v41  ;;  %v830_v45 = vmul.f32 %v1775_v42, %v2000_v33  ;;  %v1807_v46 = vpop.f32.mrb[2].mxu1  ;;  %v568_v47 = vpop.f32.mrb[3].mxu0 }
  0xe9   : > { %v932_v48 = vadd.f32 %v2005_v35, %v861_v39  ;;  %v898_v49 = vadd.f32 %v2005_v35, %v827_v40  ;;  %v862_v50 = vmul.f32 %v1807_v46, %v2000_v33  ;;  %v828_v51 = vmul.f32 %v2000_v33, %v568_v47  ;;  %v696_v52 = vpop.f32.mrb[3].mxu1 }
  0xea   : > { %vm964_vm2 = vcmp.ge.f32.partialorder %v900_v43, 0.0  ;;  %v1028_v53 = vmul.f32 0.2, %v900_v43  ;;  %v930_v54 = vadd.f32 %v2005_v35, %v859_v44  ;;  %v901_v55 = vadd.f32 %v2005_v35, %v830_v45 }
  0xeb   : > { %vm996_vm3 = vcmp.ge.f32.partialorder %v932_v48, 0.0  ;;  %v1060_v56 = vmul.f32 0.2, %v932_v48  ;;  %vm962_vm4 = vcmp.ge.f32.partialorder %v898_v49, 0.0  ;;  %v1026_v57 = vmul.f32 0.2, %v898_v49 }
  0xec   : > { %v1092_v58 = vsel %vm964_vm2, %v900_v43, %v1028_v53  ;;  %vm994_vm5 = vcmp.ge.f32.partialorder %v930_v54, 0.0  ;;  %v1058_v59 = vmul.f32 0.2, %v930_v54  ;;  %vm965_vm6 = vcmp.ge.f32.partialorder %v901_v55, 0.0 }
  0xed   : > { %v1675_v60 = vpack.c.bf16 %v1092_v58, %v1092_v58  ;;  %v1124_v61 = vsel %vm996_vm3, %v932_v48, %v1060_v56  ;;  %v1090_v62 = vsel %vm962_vm4, %v898_v49, %v1026_v57  ;;  %v1029_v63 = vmul.f32 0.2, %v901_v55  ;;  %v1778_v0 = vpop.f32.mrb[4].mxu0 }
  0xee   : > { %v1707_v1 = vpack.c.bf16 %v1124_v61, %v1124_v61  ;;  %v1673_v2 = vpack.c.bf16 %v1090_v62, %v1090_v62  ;;  %v1122_v3 = vsel %vm994_vm5, %v930_v54, %v1058_v59  ;;  %v933_v4 = vadd.f32 %v2005_v35, %v862_v50  ;;  %v1810_v5 = vpop.f32.mrb[4].mxu1  ;;  %v581_v6 = vpop.f32.mrb[5].mxu0 }
  0xef   : > { %1413 = vst.msk [vmem:[%s2024_s30 + $0x8] sm:$0xf] %vm1410_vm1, %v1675_v60  ;;  %v1705_v7 = vpack.c.bf16 %v1122_v3, %v1122_v3  ;;  %v1093_v8 = vsel %vm965_vm6, %v901_v55, %v1029_v63  ;;  %v899_v9 = vadd.f32 %v2005_v35, %v828_v51  ;;  %v860_v10 = vmul.f32 %v2000_v33, %v696_v52  ;;  %v709_v11 = vpop.f32.mrb[5].mxu1  ;;  %v1779_v12 = vpop.f32.mrb[6].mxu0 }
  0xf0   : > { %1445 = vst.msk [vmem:[%s2024_s30 + $0x88] sm:$0xf] %vm1410_vm1, %v1707_v1  ;;  %1411 = vst.msk [vmem:[%s2024_s30] sm:$0xf] %vm1410_vm1, %v1673_v2  ;;  %v1676_v13 = vpack.c.bf16 %v1093_v8, %v1093_v8  ;;  %vm997_vm7 = vcmp.ge.f32.partialorder %v933_v4, 0.0  ;;  %v833_v15 = vmul.f32 %v1778_v0, %v2000_v33  ;;  %v1811_v16 = vpop.f32.mrb[6].mxu1  ;;  %v865_v20 = vmul.f32 %v1810_v5, %v2000_v33 }
  0xf1   : > { %v1061_v14 = vmul.f32 0.2, %v933_v4  ;;  %v584_v17 = vpop.f32.mrb[7].mxu0  ;;  %1443 = vst.msk [vmem:[%s2024_s30 + $0x80] sm:$0xf] %vm1410_vm1, %v1705_v7  ;;  %vm963_vm8 = vcmp.ge.f32.partialorder %v899_v9, 0.0  ;;  %v931_v19 = vadd.f32 %v2005_v35, %v860_v10  ;;  %v831_v24 = vmul.f32 %v2000_v33, %v581_v6 }
  0xf2   : > { %v1027_v18 = vmul.f32 0.2, %v899_v9  ;;  %v712_v21 = vpop.f32.mrb[7].mxu1  ;;  %1414 = vst.msk [vmem:[%s2024_s30 + $0xc] sm:$0xf] %vm1410_vm1, %v1676_v13  ;;  %v904_v23 = vadd.f32 %v2005_v35, %v833_v15  ;;  %v863_v25 = vmul.f32 %v2000_v33, %v709_v11  ;;  %v936_v31 = vadd.f32 %v2005_v35, %v865_v20 }
  0xf3   : > { %v1125_v22 = vsel %vm997_vm7, %v933_v4, %v1061_v14  ;;  %vm995_vm9 = vcmp.ge.f32.partialorder %v931_v19, 0.0  ;;  %v1059_v28 = vmul.f32 0.2, %v931_v19  ;;  %v902_v34 = vadd.f32 %v2005_v35, %v831_v24 }
  0xf4   : > { %v1708_v26 = vpack.c.bf16 %v1125_v22, %v1125_v22  ;;  %v1091_v27 = vsel %vm963_vm8, %v899_v9, %v1027_v18  ;;  %vm968_vm10 = vcmp.ge.f32.partialorder %v904_v23, 0.0  ;;  %v1032_v30 = vmul.f32 0.2, %v904_v23 }
  0xf5   : > { %v1674_v29 = vpack.c.bf16 %v1091_v27, %v1091_v27  ;;  %v1123_v32 = vsel %vm995_vm9, %v931_v19, %v1059_v28  ;;  %v934_v36 = vadd.f32 %v2005_v35, %v863_v25  ;;  %v834_v37 = vmul.f32 %v1779_v12, %v2000_v33  ;;  %v1782_v38 = vpop.f32.mrb[8].mxu0 }
  0xf6   : > { %1446 = vst.msk [vmem:[%s2024_s30 + $0x8c] sm:$0xf] %vm1410_vm1, %v1708_v26  ;;  %v1706_v39 = vpack.c.bf16 %v1123_v32, %v1123_v32  ;;  %v1096_v40 = vsel %vm968_vm10, %v904_v23, %v1032_v30  ;;  %vm1000_vm11 = vcmp.ge.f32.partialorder %v936_v31, 0.0  ;;  %v1064_v41 = vmul.f32 0.2, %v936_v31  ;;  %v1814_v42 = vpop.f32.mrb[8].mxu1 }
  0xf7   : > { %1412 = vst.msk [vmem:[%s2024_s30 + $0x4] sm:$0xf] %vm1410_vm1, %v1674_v29  ;;  %v597_v43 = vpop.f32.mrb[9].mxu0  ;;  %v1679_v44 = vpack.c.bf16 %v1096_v40, %v1096_v40  ;;  %vm966_vm12 = vcmp.ge.f32.partialorder %v902_v34, 0.0  ;;  %v1030_v45 = vmul.f32 0.2, %v902_v34  ;;  %v905_v50 = vadd.f32 %v2005_v35, %v834_v37 }
  0xf8   : > { %vm998_vm13 = vcmp.ge.f32.partialorder %v934_v36, 0.0  ;;  %v725_v46 = vpop.f32.mrb[9].mxu1  ;;  %v2053_v47 = vpop.f32.mrb[10].mxu0  ;;  %1444 = vst.msk [vmem:[%s2024_s30 + $0x84] sm:$0xf] %vm1410_vm1, %v1706_v39  ;;  %v1128_v48 = vsel %vm1000_vm11, %v936_v31, %v1064_v41  ;;  %v866_v51 = vmul.f32 %v1811_v16, %v2000_v33  ;;  %v832_v56 = vmul.f32 %v2000_v33, %v584_v17 }
  0xf9   : > { %v1062_v49 = vmul.f32 0.2, %v934_v36  ;;  %v1815_v52 = vpop.f32.mrb[10].mxu1  ;;  %v600_v53 = vpop.f32.mrb[11].mxu0  ;;  %1417 = vst.msk [vmem:[%s2024_s30 + $0x18] sm:$0xf] %vm1410_vm1, %v1679_v44  ;;  %v1711_v54 = vpack.c.bf16 %v1128_v48, %v1128_v48  ;;  %v1094_v55 = vsel %vm966_vm12, %v902_v34, %v1030_v45  ;;  %v864_v57 = vmul.f32 %v2000_v33, %v712_v21 }
  0xfa   : > { %v2063_v58 = vpop.f32.mrb[11].mxu1  ;;  %v1677_v59 = vpack.c.bf16 %v1094_v55, %v1094_v55  ;;  %vm969_vm14 = vcmp.ge.f32.partialorder %v905_v50, 0.0  ;;  %v1033_v61 = vmul.f32 0.2, %v905_v50  ;;  %v937_v63 = vadd.f32 %v2005_v35, %v866_v51 }
  0xfb   : > { %v1126_v60 = vsel %vm998_vm13, %v934_v36, %v1062_v49  ;;  %1449 = vst.msk [vmem:[%s2024_s30 + $0x98] sm:$0xf] %vm1410_vm1, %v1711_v54  ;;  %v903_v0 = vadd.f32 %v2005_v35, %v832_v56  ;;  %v935_v1 = vadd.f32 %v2005_v35, %v864_v57  ;;  %v837_v3 = vmul.f32 %v1782_v38, %v2000_v33 }
  0xfc   : > { %v1709_v62 = vpack.c.bf16 %v1126_v60, %v1126_v60  ;;  %1415 = vst.msk [vmem:[%s2024_s30 + $0x10] sm:$0xf] %vm1410_vm1, %v1677_v59  ;;  %v1097_v2 = vsel %vm969_vm14, %v905_v50, %v1033_v61  ;;  %v869_v4 = vmul.f32 %v1814_v42, %v2000_v33  ;;  %v835_v5 = vmul.f32 %v2000_v33, %v597_v43 }
  0xfd   : > { %v1680_v6 = vpack.c.bf16 %v1097_v2, %v1097_v2  ;;  %vm1001_vm15 = vcmp.ge.f32.partialorder %v937_v63, 0.0  ;;  %v1065_v7 = vmul.f32 0.2, %v937_v63  ;;  %vm967_vm0 = vcmp.ge.f32.partialorder %v903_v0, 0.0  ;;  %v1786_v8 = vpop.f32.mrb[12].mxu0 }
  0xfe   : > { %1447 = vst.msk [vmem:[%s2024_s30 + $0x90] sm:$0xf] %vm1410_vm1, %v1709_v62  ;;  %v1031_v9 = vmul.f32 0.2, %v903_v0  ;;  %vm999_vm2 = vcmp.ge.f32.partialorder %v935_v1, 0.0  ;;  %v908_v11 = vadd.f32 %v2005_v35, %v837_v3  ;;  %v1818_v12 = vpop.f32.mrb[12].mxu1  ;;  %v940_v14 = vadd.f32 %v2005_v35, %v869_v4 }
  0xff   : > { %v1063_v10 = vmul.f32 0.2, %v935_v1  ;;  %1418 = vst.msk [vmem:[%s2024_s30 + $0x1c] sm:$0xf] %vm1410_vm1, %v1680_v6  ;;  %v1129_v13 = vsel %vm1001_vm15, %v937_v63, %v1065_v7  ;;  %v906_v15 = vadd.f32 %v2005_v35, %v835_v5  ;;  %v867_v16 = vmul.f32 %v2000_v33, %v725_v46  ;;  %v2084_v17 = vpop.f32.mrb[13].mxu0  ;;  %v2086_v18 = vpop.f32.mrb[13].mxu1 }
 0x100   : > { %v1712_v19 = vpack.c.bf16 %v1129_v13, %v1129_v13  ;;  %v1095_v20 = vsel %vm967_vm0, %v903_v0, %v1031_v9  ;;  %vm972_vm3 = vcmp.ge.f32.partialorder %v908_v11, 0.0  ;;  %v2088_v22 = vpop.f32.mrb[14].mxu0  ;;  %v2090_v23 = vpop.f32.mrb[14].mxu1  ;;  %v1036_v26 = vmul.f32 0.2, %v908_v11 }
 0x101   : > { %v1127_v21 = vsel %vm999_vm2, %v935_v1, %v1063_v10  ;;  %v1678_v24 = vpack.c.bf16 %v1095_v20, %v1095_v20  ;;  %vm1004_vm4 = vcmp.ge.f32.partialorder %v940_v14, 0.0  ;;  %v2092_v27 = vpop.f32.mrb[15].mxu0  ;;  %v2094_v28 = vpop.f32.mrb[15].mxu1  ;;  %v1068_v29 = vmul.f32 0.2, %v940_v14 }
 0x102   : > { %v1710_v25 = vpack.c.bf16 %v1127_v21, %v1127_v21  ;;  %1450 = vst.msk [vmem:[%s2024_s30 + $0x9c] sm:$0xf] %vm1410_vm1, %v1712_v19  ;;  %vm970_vm5 = vcmp.ge.f32.partialorder %v906_v15, 0.0  ;;  %v1034_v30 = vmul.f32 0.2, %v906_v15  ;;  %v938_v31 = vadd.f32 %v2005_v35, %v867_v16 }
 0x103   : > { %1416 = vst.msk [vmem:[%s2024_s30 + $0x14] sm:$0xf] %vm1410_vm1, %v1678_v24  ;;  %v1100_v32 = vsel %vm972_vm3, %v908_v11, %v1036_v26  ;;  %v838_v34 = vmul.f32 %v2053_v47, %v2000_v33  ;;  %v870_v36 = vmul.f32 %v1815_v52, %v2000_v33  ;;  %v836_v37 = vmul.f32 %v2000_v33, %v600_v53 }
 0x104   : > { %1448 = vst.msk [vmem:[%s2024_s30 + $0x94] sm:$0xf] %vm1410_vm1, %v1710_v25  ;;  %v1683_v38 = vpack.c.bf16 %v1100_v32, %v1100_v32  ;;  %v1132_v39 = vsel %vm1004_vm4, %v940_v14, %v1068_v29  ;;  %v1098_v40 = vsel %vm970_vm5, %v906_v15, %v1034_v30  ;;  %vm1002_vm6 = vcmp.ge.f32.partialorder %v938_v31, 0.0 }
 0x105   : > { %v1715_v41 = vpack.c.bf16 %v1132_v39, %v1132_v39  ;;  %v1681_v42 = vpack.c.bf16 %v1098_v40, %v1098_v40  ;;  %v1066_v43 = vmul.f32 0.2, %v938_v31  ;;  %v909_v44 = vadd.f32 %v2005_v35, %v838_v34  ;;  %v2109_v45 = vpop.f32.mrb[16].mxu0 }
 0x106   : > { %1421 = vst.msk [vmem:[%s2024_s30 + $0x28] sm:$0xf] %vm1410_vm1, %v1683_v38  ;;  %v941_v46 = vadd.f32 %v2005_v35, %v870_v36  ;;  %v907_v47 = vadd.f32 %v2005_v35, %v836_v37  ;;  %v868_v48 = vmul.f32 %v2000_v33, %v2063_v58  ;;  %v841_v49 = vmul.f32 %v1786_v8, %v2000_v33  ;;  %v2118_v50 = vpop.f32.mrb[16].mxu1  ;;  %v2120_v51 = vpop.f32.mrb[17].mxu0 }
 0x107   : > { %1453 = vst.msk [vmem:[%s2024_s30 + $0xa8] sm:$0xf] %vm1410_vm1, %v1715_v41  ;;  %1419 = vst.msk [vmem:[%s2024_s30 + $0x20] sm:$0xf] %vm1410_vm1, %v1681_v42  ;;  %v1130_v52 = vsel %vm1002_vm6, %v938_v31, %v1066_v43  ;;  %vm973_vm7 = vcmp.ge.f32.partialorder %v909_v44, 0.0  ;;  %v873_v54 = vmul.f32 %v1818_v12, %v2000_v33  ;;  %v2127_v55 = vpop.f32.mrb[17].mxu1  ;;  %v839_v5 = vmul.f32 %v2000_v33, %v2084_v17 }
 0x108   : > { %v1037_v53 = vmul.f32 0.2, %v909_v44  ;;  %v2129_v56 = vpop.f32.mrb[18].mxu0  ;;  %v1713_v57 = vpack.c.bf16 %v1130_v52, %v1130_v52  ;;  %vm1005_vm8 = vcmp.ge.f32.partialorder %v941_v46, 0.0  ;;  %v1069_v58 = vmul.f32 0.2, %v941_v46 }
 0x109   : > { %vm971_vm9 = vcmp.ge.f32.partialorder %v907_v47, 0.0  ;;  %v2131_v59 = vpop.f32.mrb[18].mxu1  ;;  %v2133_v60 = vpop.f32.mrb[19].mxu0  ;;  %v1035_v62 = vmul.f32 0.2, %v907_v47  ;;  %v939_v63 = vadd.f32 %v2005_v35, %v868_v48  ;;  %v912_v0 = vadd.f32 %v2005_v35, %v841_v49 }
 0x10a   : > { %v1101_v61 = vsel %vm973_vm7, %v909_v44, %v1037_v53  ;;  %v2137_v1 = vpop.f32.mrb[19].mxu1  ;;  %1451 = vst.msk [vmem:[%s2024_s30 + $0xa0] sm:$0xf] %vm1410_vm1, %v1713_v57  ;;  %v1133_v3 = vsel %vm1005_vm8, %v941_v46, %v1069_v58  ;;  %v944_v4 = vadd.f32 %v2005_v35, %v873_v54  ;;  %v910_v13 = vadd.f32 %v2005_v35, %v839_v5 }
 0x10b   : > { %v1684_v2 = vpack.c.bf16 %v1101_v61, %v1101_v61  ;;  %v1716_v6 = vpack.c.bf16 %v1133_v3, %v1133_v3  ;;  %v1099_v7 = vsel %vm971_vm9, %v907_v47, %v1035_v62  ;;  %vm1003_vm10 = vcmp.ge.f32.partialorder %v939_v63, 0.0 }
 0x10c   : > { %v1067_v8 = vmul.f32 0.2, %v939_v63  ;;  %v1682_v9 = vpack.c.bf16 %v1099_v7, %v1099_v7  ;;  %vm976_vm11 = vcmp.ge.f32.partialorder %v912_v0, 0.0  ;;  %v1040_v10 = vmul.f32 0.2, %v912_v0 }
 0x10d   : > { %1422 = vst.msk [vmem:[%s2024_s30 + $0x2c] sm:$0xf] %vm1410_vm1, %v1684_v2  ;;  %vm1008_vm12 = vcmp.ge.f32.partialorder %v944_v4, 0.0  ;;  %1454 = vst.msk [vmem:[%s2024_s30 + $0xac] sm:$0xf] %vm1410_vm1, %v1716_v6  ;;  %v871_v14 = vmul.f32 %v2000_v33, %v2086_v18  ;;  %v2151_v15 = vpop.f32.mrb[20].mxu0  ;;  %v842_v19 = vmul.f32 %v2088_v22, %v2000_v33  ;;  %v874_v20 = vmul.f32 %v2090_v23, %v2000_v33 }
 0x10e   : > { %v1131_v11 = vsel %vm1003_vm10, %v939_v63, %v1067_v8  ;;  %v1072_v12 = vmul.f32 0.2, %v944_v4  ;;  %1420 = vst.msk [vmem:[%s2024_s30 + $0x24] sm:$0xf] %vm1410_vm1, %v1682_v9  ;;  %v1104_v17 = vsel %vm976_vm11, %v912_v0, %v1040_v10  ;;  %v2159_v21 = vpop.f32.mrb[20].mxu1  ;;  %v2161_v24 = vpop.f32.mrb[21].mxu0  ;;  %v840_v38 = vmul.f32 %v2000_v33, %v2092_v27 }
 0x10f   : > { %v1714_v16 = vpack.c.bf16 %v1131_v11, %v1131_v11  ;;  %v1687_v25 = vpack.c.bf16 %v1104_v17, %v1104_v17  ;;  %vm974_vm13 = vcmp.ge.f32.partialorder %v910_v13, 0.0  ;;  %v1038_v18 = vmul.f32 0.2, %v910_v13  ;;  %v2163_v29 = vpop.f32.mrb[21].mxu1  ;;  %v2165_v30 = vpop.f32.mrb[22].mxu0 }
 0x110   : > { %v1136_v26 = vsel %vm1008_vm12, %v944_v4, %v1072_v12  ;;  %v942_v31 = vadd.f32 %v2005_v35, %v871_v14  ;;  %v913_v23 = vadd.f32 %v2005_v35, %v842_v19  ;;  %v945_v32 = vadd.f32 %v2005_v35, %v874_v20  ;;  %v2172_v34 = vpop.f32.mrb[22].mxu1  ;;  %v2174_v36 = vpop.f32.mrb[23].mxu0 }
 0x111   : > { %1452 = vst.msk [vmem:[%s2024_s30 + $0xa4] sm:$0xf] %vm1410_vm1, %v1714_v16  ;;  %v1719_v22 = vpack.c.bf16 %v1136_v26, %v1136_v26  ;;  %1425 = vst.msk [vmem:[%s2024_s30 + $0x38] sm:$0xf] %vm1410_vm1, %v1687_v25  ;;  %v1102_v37 = vsel %vm974_vm13, %v910_v13, %v1038_v18  ;;  %v872_v39 = vmul.f32 %v2000_v33, %v2094_v28  ;;  %v2184_v41 = vpop.f32.mrb[23].mxu1 }
 0x112   : > { %v845_v40 = vmul.f32 %v2109_v45, %v2000_v33  ;;  %v1685_v42 = vpack.c.bf16 %v1102_v37, %v1102_v37  ;;  %vm1006_vm14 = vcmp.ge.f32.partialorder %v942_v31, 0.0  ;;  %v1070_v43 = vmul.f32 0.2, %v942_v31 }
 0x113   : > { %1457 = vst.msk [vmem:[%s2024_s30 + $0xb8] sm:$0xf] %vm1410_vm1, %v1719_v22  ;;  %vm977_vm15 = vcmp.ge.f32.partialorder %v913_v23, 0.0  ;;  %v1041_v44 = vmul.f32 0.2, %v913_v23  ;;  %vm1009_vm0 = vcmp.ge.f32.partialorder %v945_v32, 0.0  ;;  %v911_v47 = vadd.f32 %v2005_v35, %v840_v38 }
 0x114   : > { %v1073_v46 = vmul.f32 0.2, %v945_v32  ;;  %1423 = vst.msk [vmem:[%s2024_s30 + $0x30] sm:$0xf] %vm1410_vm1, %v1685_v42  ;;  %v1134_v27 = vsel %vm1006_vm14, %v942_v31, %v1070_v43  ;;  %v943_v28 = vadd.f32 %v2005_v35, %v872_v39  ;;  %v916_v45 = vadd.f32 %v2005_v35, %v845_v40 }
 0x115   : > { %v877_v48 = vmul.f32 %v2118_v50, %v2000_v33  ;;  %v1717_v49 = vpack.c.bf16 %v1134_v27, %v1134_v27  ;;  %v1105_v52 = vsel %vm977_vm15, %v913_v23, %v1041_v44  ;;  %vm975_vm2 = vcmp.ge.f32.partialorder %v911_v47, 0.0  ;;  %v2195_v54 = vpop.f32.mrb[24].mxu0 }
 0x116   : > { %v1137_v53 = vsel %vm1009_vm0, %v945_v32, %v1073_v46  ;;  %v1688_v57 = vpack.c.bf16 %v1105_v52, %v1105_v52  ;;  %v1039_v61 = vmul.f32 0.2, %v911_v47  ;;  %vm1007_vm3 = vcmp.ge.f32.partialorder %v943_v28, 0.0  ;;  %v2197_v62 = vpop.f32.mrb[24].mxu1  ;;  %v2199_v63 = vpop.f32.mrb[25].mxu0 }
 0x117   : > { %v1720_v58 = vpack.c.bf16 %v1137_v53, %v1137_v53  ;;  %1455 = vst.msk [vmem:[%s2024_s30 + $0xb0] sm:$0xf] %vm1410_vm1, %v1717_v49  ;;  %v1071_v0 = vmul.f32 0.2, %v943_v28  ;;  %vm980_vm4 = vcmp.ge.f32.partialorder %v916_v45, 0.0  ;;  %v948_v2 = vadd.f32 %v2005_v35, %v877_v48  ;;  %v2204_v3 = vpop.f32.mrb[25].mxu1 }
 0x118   : > { %v1044_v50 = vmul.f32 0.2, %v916_v45  ;;  %1426 = vst.msk [vmem:[%s2024_s30 + $0x3c] sm:$0xf] %vm1410_vm1, %v1688_v57  ;;  %v1103_v4 = vsel %vm975_vm2, %v911_v47, %v1039_v61  ;;  %v843_v5 = vmul.f32 %v2000_v33, %v2120_v51  ;;  %v875_v6 = vmul.f32 %v2000_v33, %v2127_v55  ;;  %v2217_v8 = vpop.f32.mrb[26].mxu0  ;;  %v2219_v9 = vpop.f32.mrb[26].mxu1 }
 0x119   : > { %1458 = vst.msk [vmem:[%s2024_s30 + $0xbc] sm:$0xf] %vm1410_vm1, %v1720_v58  ;;  %v846_v7 = vmul.f32 %v2129_v56, %v2000_v33  ;;  %v1686_v10 = vpack.c.bf16 %v1103_v4, %v1103_v4  ;;  %v1135_v11 = vsel %vm1007_vm3, %v943_v28, %v1071_v0  ;;  %vm1012_vm5 = vcmp.ge.f32.partialorder %v948_v2, 0.0  ;;  %v2222_v13 = vpop.f32.mrb[27].mxu0  ;;  %v2224_v51 = vpop.f32.mrb[27].mxu1 }
 0x11a   : > { %v1108_v12 = vsel %vm980_vm4, %v916_v45, %v1044_v50  ;;  %v1718_v14 = vpack.c.bf16 %v1135_v11, %v1135_v11  ;;  %v1076_v16 = vmul.f32 0.2, %v948_v2  ;;  %v914_v56 = vadd.f32 %v2005_v35, %v843_v5 }
 0x11b   : > { %v1691_v55 = vpack.c.bf16 %v1108_v12, %v1108_v12  ;;  %1424 = vst.msk [vmem:[%s2024_s30 + $0x34] sm:$0xf] %vm1410_vm1, %v1686_v10  ;;  %v946_v17 = vadd.f32 %v2005_v35, %v875_v6  ;;  %v917_v19 = vadd.f32 %v2005_v35, %v846_v7  ;;  %v878_v20 = vmul.f32 %v2131_v59, %v2000_v33 }
 0x11c   : > { %v844_v25 = vmul.f32 %v2000_v33, %v2133_v60  ;;  %1456 = vst.msk [vmem:[%s2024_s30 + $0xb4] sm:$0xf] %vm1410_vm1, %v1718_v14  ;;  %v1140_v26 = vsel %vm1012_vm5, %v948_v2, %v1076_v16  ;;  %vm978_vm6 = vcmp.ge.f32.partialorder %v914_v56, 0.0  ;;  %v1042_v18 = vmul.f32 0.2, %v914_v56 }
 0x11d   : > { %1429 = vst.msk [vmem:[%s2024_s30 + $0x48] sm:$0xf] %vm1410_vm1, %v1691_v55  ;;  %v876_v22 = vmul.f32 %v2000_v33, %v2137_v1  ;;  %v1723_v31 = vpack.c.bf16 %v1140_v26, %v1140_v26  ;;  %vm1010_vm7 = vcmp.ge.f32.partialorder %v946_v17, 0.0  ;;  %v1074_v23 = vmul.f32 0.2, %v946_v17  ;;  %v2241_v32 = vpop.f32.mrb[28].mxu0 }
 0x11e   : > { %vm981_vm8 = vcmp.ge.f32.partialorder %v917_v19, 0.0  ;;  %v1106_v59 = vsel %vm978_vm6, %v914_v56, %v1042_v18  ;;  %v1045_v37 = vmul.f32 0.2, %v917_v19  ;;  %v949_v60 = vadd.f32 %v2005_v35, %v878_v20  ;;  %v2245_v39 = vpop.f32.mrb[28].mxu1  ;;  %v2247_v40 = vpop.f32.mrb[29].mxu0 }
 0x11f   : > { %v915_v38 = vadd.f32 %v2005_v35, %v844_v25  ;;  %1461 = vst.msk [vmem:[%s2024_s30 + $0xc8] sm:$0xf] %vm1410_vm1, %v1723_v31  ;;  %v1689_v1 = vpack.c.bf16 %v1106_v59, %v1106_v59  ;;  %v1138_v42 = vsel %vm1010_vm7, %v946_v17, %v1074_v23  ;;  %v947_v43 = vadd.f32 %v2005_v35, %v876_v22  ;;  %v2254_v46 = vpop.f32.mrb[29].mxu1  ;;  %v2256_v47 = vpop.f32.mrb[30].mxu0 }
 0x120   : > { %v849_v44 = vmul.f32 %v2151_v15, %v2000_v33  ;;  %v1721_v27 = vpack.c.bf16 %v1138_v42, %v1138_v42  ;;  %v1109_v28 = vsel %vm981_vm8, %v917_v19, %v1045_v37  ;;  %vm1013_vm9 = vcmp.ge.f32.partialorder %v949_v60, 0.0  ;;  %v2259_v48 = vpop.f32.mrb[30].mxu1  ;;  %v2261_v49 = vpop.f32.mrb[31].mxu0 }
 0x121   : > { %v1077_v45 = vmul.f32 0.2, %v949_v60  ;;  %1427 = vst.msk [vmem:[%s2024_s30 + $0x40] sm:$0xf] %vm1410_vm1, %v1689_v1  ;;  %v1692_v52 = vpack.c.bf16 %v1109_v28, %v1109_v28  ;;  %vm979_vm10 = vcmp.ge.f32.partialorder %v915_v38, 0.0  ;;  %vm1011_vm11 = vcmp.ge.f32.partialorder %v947_v43, 0.0 }
 0x122   : > { %v1043_v53 = vmul.f32 0.2, %v915_v38  ;;  %v2265_v15 = vpop.f32.mrb[31].mxu1  ;;  %1459 = vst.msk [vmem:[%s2024_s30 + $0xc0] sm:$0xf] %vm1410_vm1, %v1721_v27  ;;  %v920_v61 = vadd.f32 %v2005_v35, %v849_v44  ;;  %v881_v0 = vmul.f32 %v2159_v21, %v2000_v33  ;;  %v847_v4 = vmul.f32 %v2000_v33, %v2161_v24 }
 0x123   : > { %v1141_v57 = vsel %vm1013_vm9, %v949_v60, %v1077_v45  ;;  %v1075_v58 = vmul.f32 0.2, %v947_v43  ;;  %1430 = vst.msk [vmem:[%s2024_s30 + $0x4c] sm:$0xf] %vm1410_vm1, %v1692_v52  ;;  %v879_v5 = vmul.f32 %v2000_v33, %v2163_v29  ;;  %v850_v29 = vmul.f32 %v2165_v30, %v2000_v33 }
 0x124   : > { %v1724_v50 = vpack.c.bf16 %v1141_v57, %v1141_v57  ;;  %v1107_v2 = vsel %vm979_vm10, %v915_v38, %v1043_v53  ;;  %vm984_vm12 = vcmp.ge.f32.partialorder %v920_v61, 0.0  ;;  %v1048_v10 = vmul.f32 0.2, %v920_v61 }
 0x125   : > { %v1690_v6 = vpack.c.bf16 %v1107_v2, %v1107_v2  ;;  %v1139_v7 = vsel %vm1011_vm11, %v947_v43, %v1075_v58  ;;  %v952_v21 = vadd.f32 %v2005_v35, %v881_v0  ;;  %v918_v12 = vadd.f32 %v2005_v35, %v847_v4 }
 0x126   : > { %1462 = vst.msk [vmem:[%s2024_s30 + $0xcc] sm:$0xf] %vm1410_vm1, %v1724_v50  ;;  %v1722_v11 = vpack.c.bf16 %v1139_v7, %v1139_v7  ;;  %v950_v14 = vadd.f32 %v2005_v35, %v879_v5  ;;  %v1112_v24 = vsel %vm984_vm12, %v920_v61, %v1048_v10  ;;  %v882_v55 = vmul.f32 %v2172_v34, %v2000_v33 }
 0x127   : > { %1428 = vst.msk [vmem:[%s2024_s30 + $0x44] sm:$0xf] %vm1410_vm1, %v1690_v6  ;;  %v848_v16 = vmul.f32 %v2000_v33, %v2174_v36  ;;  %v1695_v56 = vpack.c.bf16 %v1112_v24, %v1112_v24  ;;  %vm1016_vm13 = vcmp.ge.f32.partialorder %v952_v21, 0.0  ;;  %v1080_v17 = vmul.f32 0.2, %v952_v21 }
 0x128   : > { %1460 = vst.msk [vmem:[%s2024_s30 + $0xc4] sm:$0xf] %vm1410_vm1, %v1722_v11  ;;  %vm982_vm14 = vcmp.ge.f32.partialorder %v918_v12, 0.0  ;;  %v1046_v19 = vmul.f32 0.2, %v918_v12  ;;  %vm1014_vm15 = vcmp.ge.f32.partialorder %v950_v14, 0.0  ;;  %v921_v25 = vadd.f32 %v2005_v35, %v850_v29 }
 0x129   : > { %v1078_v20 = vmul.f32 0.2, %v950_v14  ;;  %1433 = vst.msk [vmem:[%s2024_s30 + $0x58] sm:$0xf] %vm1410_vm1, %v1695_v56  ;;  %v1144_v30 = vsel %vm1016_vm13, %v952_v21, %v1080_v17  ;;  %v953_v34 = vadd.f32 %v2005_v35, %v882_v55  ;;  %v919_v36 = vadd.f32 %v2005_v35, %v848_v16 }
 0x12a   : > { %v880_v26 = vmul.f32 %v2000_v33, %v2184_v41  ;;  %v1727_v18 = vpack.c.bf16 %v1144_v30, %v1144_v30  ;;  %v1110_v22 = vsel %vm982_vm14, %v918_v12, %v1046_v19  ;;  %vm985_vm0 = vcmp.ge.f32.partialorder %v921_v25, 0.0 }
 0x12b   : > { %v1142_v31 = vsel %vm1014_vm15, %v950_v14, %v1078_v20  ;;  %v1693_v23 = vpack.c.bf16 %v1110_v22, %v1110_v22  ;;  %v1049_v37 = vmul.f32 0.2, %v921_v25  ;;  %vm1017_vm2 = vcmp.ge.f32.partialorder %v953_v34, 0.0 }
 0x12c   : > { %v1725_v59 = vpack.c.bf16 %v1142_v31, %v1142_v31  ;;  %1465 = vst.msk [vmem:[%s2024_s30 + $0xd8] sm:$0xf] %vm1410_vm1, %v1727_v18  ;;  %v1081_v60 = vmul.f32 0.2, %v953_v34  ;;  %vm983_vm3 = vcmp.ge.f32.partialorder %v919_v36, 0.0  ;;  %v951_v1 = vadd.f32 %v2005_v35, %v880_v26 }
 0x12d   : > { %v1047_v38 = vmul.f32 0.2, %v919_v36  ;;  %1431 = vst.msk [vmem:[%s2024_s30 + $0x50] sm:$0xf] %vm1410_vm1, %v1693_v23  ;;  %v1113_v41 = vsel %vm985_vm0, %v921_v25, %v1049_v37  ;;  %v853_v42 = vmul.f32 %v2195_v54, %v2000_v33  ;;  %v885_v43 = vmul.f32 %v2197_v62, %v2000_v33 }
 0x12e   : > { %1463 = vst.msk [vmem:[%s2024_s30 + $0xd0] sm:$0xf] %vm1410_vm1, %v1725_v59  ;;  %v851_v44 = vmul.f32 %v2000_v33, %v2199_v63  ;;  %v1696_v27 = vpack.c.bf16 %v1113_v41, %v1113_v41  ;;  %v1145_v28 = vsel %vm1017_vm2, %v953_v34, %v1081_v60  ;;  %vm1015_vm4 = vcmp.ge.f32.partialorder %v951_v1, 0.0 }
 0x12f   : > { %v1111_v45 = vsel %vm983_vm3, %v919_v36, %v1047_v38  ;;  %v1728_v52 = vpack.c.bf16 %v1145_v28, %v1145_v28  ;;  %v1079_v57 = vmul.f32 0.2, %v951_v1  ;;  %v924_v58 = vadd.f32 %v2005_v35, %v853_v42 }
 0x130   : > { %v1694_v53 = vpack.c.bf16 %v1111_v45, %v1111_v45  ;;  %1434 = vst.msk [vmem:[%s2024_s30 + $0x5c] sm:$0xf] %vm1410_vm1, %v1696_v27  ;;  %v956_v54 = vadd.f32 %v2005_v35, %v885_v43  ;;  %v922_v61 = vadd.f32 %v2005_v35, %v851_v44  ;;  %v883_v62 = vmul.f32 %v2000_v33, %v2204_v3 }
 0x131   : > { %v854_v63 = vmul.f32 %v2217_v8, %v2000_v33  ;;  %1466 = vst.msk [vmem:[%s2024_s30 + $0xdc] sm:$0xf] %vm1410_vm1, %v1728_v52  ;;  %v1143_v0 = vsel %vm1015_vm4, %v951_v1, %v1079_v57  ;;  %vm988_vm5 = vcmp.ge.f32.partialorder %v924_v58, 0.0  ;;  %v1052_v50 = vmul.f32 0.2, %v924_v58 }
 0x132   : > { %1432 = vst.msk [vmem:[%s2024_s30 + $0x54] sm:$0xf] %vm1410_vm1, %v1694_v53  ;;  %v886_v2 = vmul.f32 %v2219_v9, %v2000_v33  ;;  %v1726_v4 = vpack.c.bf16 %v1143_v0, %v1143_v0  ;;  %vm1020_vm6 = vcmp.ge.f32.partialorder %v956_v54, 0.0  ;;  %v1084_v5 = vmul.f32 0.2, %v956_v54 }
 0x133   : > { %vm986_vm7 = vcmp.ge.f32.partialorder %v922_v61, 0.0  ;;  %v1116_v3 = vsel %vm988_vm5, %v924_v58, %v1052_v50  ;;  %v1050_v6 = vmul.f32 0.2, %v922_v61  ;;  %v954_v7 = vadd.f32 %v2005_v35, %v883_v62 }
 0x134   : > { %v925_v8 = vadd.f32 %v2005_v35, %v854_v63  ;;  %1464 = vst.msk [vmem:[%s2024_s30 + $0xd4] sm:$0xf] %vm1410_vm1, %v1726_v4  ;;  %v1699_v10 = vpack.c.bf16 %v1116_v3, %v1116_v3  ;;  %v1148_v11 = vsel %vm1020_vm6, %v956_v54, %v1084_v5  ;;  %v957_v21 = vadd.f32 %v2005_v35, %v886_v2 }
 0x135   : > { %v852_v9 = vmul.f32 %v2000_v33, %v2222_v13  ;;  %v1731_v12 = vpack.c.bf16 %v1148_v11, %v1148_v11  ;;  %v1114_v14 = vsel %vm986_vm7, %v922_v61, %v1050_v6  ;;  %vm1018_vm8 = vcmp.ge.f32.partialorder %v954_v7, 0.0 }
 0x136   : > { %v1082_v24 = vmul.f32 0.2, %v954_v7  ;;  %1437 = vst.msk [vmem:[%s2024_s30 + $0x68] sm:$0xf] %vm1410_vm1, %v1699_v10  ;;  %v1697_v29 = vpack.c.bf16 %v1114_v14, %v1114_v14  ;;  %vm989_vm9 = vcmp.ge.f32.partialorder %v925_v8, 0.0  ;;  %vm1021_vm10 = vcmp.ge.f32.partialorder %v957_v21, 0.0 }
 0x137   : > { %v1053_v55 = vmul.f32 0.2, %v925_v8  ;;  %1469 = vst.msk [vmem:[%s2024_s30 + $0xe8] sm:$0xf] %vm1410_vm1, %v1731_v12  ;;  %v1085_v56 = vmul.f32 0.2, %v957_v21  ;;  %v923_v17 = vadd.f32 %v2005_v35, %v852_v9  ;;  %v884_v13 = vmul.f32 %v2000_v33, %v2224_v51 }
 0x138   : > { %v1146_v16 = vsel %vm1018_vm8, %v954_v7, %v1082_v24  ;;  %1435 = vst.msk [vmem:[%s2024_s30 + $0x60] sm:$0xf] %vm1410_vm1, %v1697_v29  ;;  %v857_v25 = vmul.f32 %v2241_v32, %v2000_v33  ;;  %v889_v30 = vmul.f32 %v2245_v39, %v2000_v33  ;;  %v855_v39 = vmul.f32 %v2000_v33, %v2247_v40 }
 0x139   : > { %v1729_v19 = vpack.c.bf16 %v1146_v16, %v1146_v16  ;;  %v1117_v20 = vsel %vm989_vm9, %v925_v8, %v1053_v55  ;;  %v1149_v36 = vsel %vm1021_vm10, %v957_v21, %v1085_v56  ;;  %vm987_vm11 = vcmp.ge.f32.partialorder %v923_v17, 0.0 }
 0x13a   : > { %v1700_v34 = vpack.c.bf16 %v1117_v20, %v1117_v20  ;;  %v1051_v26 = vmul.f32 0.2, %v923_v17  ;;  %v1732_v18 = vpack.c.bf16 %v1149_v36, %v1149_v36  ;;  %v955_v51 = vadd.f32 %v2005_v35, %v884_v13 }
 0x13b   : > { %1467 = vst.msk [vmem:[%s2024_s30 + $0xe0] sm:$0xf] %vm1410_vm1, %v1729_v19  ;;  %v928_v22 = vadd.f32 %v2005_v35, %v857_v25  ;;  %v960_v31 = vadd.f32 %v2005_v35, %v889_v30  ;;  %v887_v23 = vmul.f32 %v2000_v33, %v2254_v46  ;;  %v858_v59 = vmul.f32 %v2256_v47, %v2000_v33 }
 0x13c   : > { %1438 = vst.msk [vmem:[%s2024_s30 + $0x6c] sm:$0xf] %vm1410_vm1, %v1700_v34  ;;  %v1115_v32 = vsel %vm987_vm11, %v923_v17, %v1051_v26  ;;  %1470 = vst.msk [vmem:[%s2024_s30 + $0xec] sm:$0xf] %vm1410_vm1, %v1732_v18  ;;  %vm1019_vm12 = vcmp.ge.f32.partialorder %v955_v51, 0.0  ;;  %v926_v41 = vadd.f32 %v2005_v35, %v855_v39  ;;  %v890_v42 = vmul.f32 %v2259_v48, %v2000_v33 }
 0x13d   : > { %v1698_v37 = vpack.c.bf16 %v1115_v32, %v1115_v32  ;;  %v1083_v60 = vmul.f32 0.2, %v955_v51  ;;  %vm992_vm13 = vcmp.ge.f32.partialorder %v928_v22, 0.0  ;;  %v1056_v38 = vmul.f32 0.2, %v928_v22 }
 0x13e   : > { %vm1024_vm14 = vcmp.ge.f32.partialorder %v960_v31, 0.0  ;;  %v1088_v1 = vmul.f32 0.2, %v960_v31  ;;  %v958_v46 = vadd.f32 %v2005_v35, %v887_v23  ;;  %v929_v47 = vadd.f32 %v2005_v35, %v858_v59 }
 0x13f   : > { %1436 = vst.msk [vmem:[%s2024_s30 + $0x64] sm:$0xf] %vm1410_vm1, %v1698_v37  ;;  %v1147_v40 = vsel %vm1019_vm12, %v955_v51, %v1083_v60  ;;  %v1120_v44 = vsel %vm992_vm13, %v928_v22, %v1056_v38  ;;  %vm990_vm15 = vcmp.ge.f32.partialorder %v926_v41, 0.0  ;;  %v1054_v52 = vmul.f32 0.2, %v926_v41 }
 0x140   : > { %v1730_v43 = vpack.c.bf16 %v1147_v40, %v1147_v40  ;;  %v1152_v27 = vsel %vm1024_vm14, %v960_v31, %v1088_v1  ;;  %v1703_v28 = vpack.c.bf16 %v1120_v44, %v1120_v44  ;;  %vm1022_vm0 = vcmp.ge.f32.partialorder %v958_v46, 0.0 }
 0x141   : > { %v1735_v45 = vpack.c.bf16 %v1152_v27, %v1152_v27  ;;  %v1086_v53 = vmul.f32 0.2, %v958_v46  ;;  %vm993_vm2 = vcmp.ge.f32.partialorder %v929_v47, 0.0  ;;  %v1057_v57 = vmul.f32 0.2, %v929_v47 }
 0x142   : > { %1468 = vst.msk [vmem:[%s2024_s30 + $0xe4] sm:$0xf] %vm1410_vm1, %v1730_v43  ;;  %v961_v58 = vadd.f32 %v2005_v35, %v890_v42  ;;  %1441 = vst.msk [vmem:[%s2024_s30 + $0x78] sm:$0xf] %vm1410_vm1, %v1703_v28  ;;  %v1118_v48 = vsel %vm990_vm15, %v926_v41, %v1054_v52  ;;  %v856_v54 = vmul.f32 %v2000_v33, %v2261_v49 }
 0x143   : > { %1473 = vst.msk [vmem:[%s2024_s30 + $0xf8] sm:$0xf] %vm1410_vm1, %v1735_v45  ;;  %v888_v61 = vmul.f32 %v2000_v33, %v2265_v15  ;;  %v1701_v62 = vpack.c.bf16 %v1118_v48, %v1118_v48  ;;  %v1150_v63 = vsel %vm1022_vm0, %v958_v46, %v1086_v53  ;;  %v1121_v0 = vsel %vm993_vm2, %v929_v47, %v1057_v57 }
 0x144   : > { %vm1025_vm3 = vcmp.ge.f32.partialorder %v961_v58, 0.0  ;;  %v1733_v50 = vpack.c.bf16 %v1150_v63, %v1150_v63  ;;  %v1704_v2 = vpack.c.bf16 %v1121_v0, %v1121_v0  ;;  %v1089_v4 = vmul.f32 0.2, %v961_v58 }
 0x145   : > { %v927_v5 = vadd.f32 %v2005_v35, %v856_v54  ;;  %1439 = vst.msk [vmem:[%s2024_s30 + $0x70] sm:$0xf] %vm1410_vm1, %v1701_v62  ;;  %v959_v3 = vadd.f32 %v2005_v35, %v888_v61 }
 0x146   : > { %1471 = vst.msk [vmem:[%s2024_s30 + $0xf0] sm:$0xf] %vm1410_vm1, %v1733_v50  ;;  %1442 = vst.msk [vmem:[%s2024_s30 + $0x7c] sm:$0xf] %vm1410_vm1, %v1704_v2  ;;  %v1153_v33 = vsel %vm1025_vm3, %v961_v58, %v1089_v4 }
 0x147   : > { %vm991_vm4 = vcmp.ge.f32.partialorder %v927_v5, 0.0  ;;  %v1055_v49 = vmul.f32 0.2, %v927_v5  ;;  %v1736_v15 = vpack.c.bf16 %v1153_v33, %v1153_v33  ;;  %vm1023_vm5 = vcmp.ge.f32.partialorder %v959_v3, 0.0 }
 0x148   : > { %v1087_v6 = vmul.f32 0.2, %v959_v3 }
 0x149   : > { %v1119_v7 = vsel %vm991_vm4, %v927_v5, %v1055_v49  ;;  %1474 = vst.msk [vmem:[%s2024_s30 + $0xfc] sm:$0xf] %vm1410_vm1, %v1736_v15 }
 0x14a   : > { %v1702_v8 = vpack.c.bf16 %v1119_v7, %v1119_v7  ;;  %v1151_v10 = vsel %vm1023_vm5, %v959_v3, %v1087_v6 }
 0x14b   : > { %v1734_v11 = vpack.c.bf16 %v1151_v10, %v1151_v10 }
 0x14c   : > { %1440 = vst.msk [vmem:[%s2024_s30 + $0x74] sm:$0xf] %vm1410_vm1, %v1702_v8 }
 0x14d   : > { %1472 = vst.msk [vmem:[%s2024_s30 + $0xf4] sm:$0xf] %vm1410_vm1, %v1734_v11 }
 0x14e PF: > { %s14_s15 = sadd.s32 1, %s1885_s15  }
 0x14f   : > { %p11_p4 = scmp.ge.s32.totalorder %s14_s15, 6  }
 0x151   :  { %13 = sbr.rel (!%p11_p4) target bundleno = 1 (0x1), region = 66 }

// kernel: qz_xy_forward.4
= control target key start
LH: loop header
LB: loop body
LE: loop exit
PB: predicated region body
PF: predicated region fallthrough
CT: control target
= control target key end

     0   :  { %v4908_v0 = vmov 0   ;;  %s6218_s1 = inlined_call_operand.vmem [shape: bf16[1024,128], index: 1, kind: input, shape index: {}]   ;;  %s6219_s0 = inlined_call_operand.vmem [shape: bf16[512,1024], index: 0, kind: input, shape index: {}]   ;;  %s6220_s2 = inlined_call_operand.vmem [shape: f32[1,128], index: 2, kind: input, shape index: {}]   ;;  %s6221_s3 = inlined_call_operand.vmem [shape: f32[1,128], index: 3, kind: input, shape index: {}]   ;;  %s6222_s4 = inlined_call_operand.vmem [shape: bf16[512,128], index: 4, kind: output, shape index: {}]  }
   0x1   :  { %2066 = vmatprep.subr.bf16.mxu1 %v4908_v0  ;;  %2644 = vmatprep.subr.bf16.mxu0 %v4908_v0  ;;  %v4842_v1 = vld [vmem:[%s6218_s1] sm:$0xff]   ;;  %v4844_v3 = vld [vmem:[%s6218_s1 + $0x8] sm:$0xff]   ;;  %v4846_v5 = vld [vmem:[%s6218_s1 + $0x10] sm:$0xff]  }
   0x2   :  { %v4843_v2 = vld [vmem:[%s6218_s1 + $0x100] sm:$0xff]   ;;  %2067 = vmatpush1.bf16.msra.mxu1 %v4842_v1  ;;  %v4845_v4 = vld [vmem:[%s6218_s1 + $0x108] sm:$0xff]   ;;  %v4847_v6 = vld [vmem:[%s6218_s1 + $0x110] sm:$0xff]  }
   0x3   :  { %2645 = vmatpush1.bf16.msra.mxu0 %v4843_v2  ;;  %2068 = vmatprep.subr.bf16.mxu1 %v4908_v0  ;;  %v4848_v7 = vld [vmem:[%s6218_s1 + $0x18] sm:$0xff]   ;;  %v4850_v9 = vld [vmem:[%s6218_s1 + $0x20] sm:$0xff]   ;;  %v4852_v11 = vld [vmem:[%s6218_s1 + $0x28] sm:$0xff]  }
   0x4   :  { %2646 = vmatprep.subr.bf16.mxu0 %v4908_v0  ;;  %v4849_v8 = vld [vmem:[%s6218_s1 + $0x118] sm:$0xff]   ;;  %v4851_v10 = vld [vmem:[%s6218_s1 + $0x120] sm:$0xff]   ;;  %v4853_v12 = vld [vmem:[%s6218_s1 + $0x128] sm:$0xff]  }
   0x5   :  { %v4854_v13 = vld [vmem:[%s6218_s1 + $0x30] sm:$0xff]   ;;  %v4856_v15 = vld [vmem:[%s6218_s1 + $0x38] sm:$0xff]   ;;  %v4858_v17 = vld [vmem:[%s6218_s1 + $0x40] sm:$0xff]  }
   0x6   :  { %2069 = vmatpush1.bf16.msra.mxu1 %v4844_v3  ;;  %v4855_v14 = vld [vmem:[%s6218_s1 + $0x130] sm:$0xff]   ;;  %v4857_v16 = vld [vmem:[%s6218_s1 + $0x138] sm:$0xff]   ;;  %v4859_v18 = vld [vmem:[%s6218_s1 + $0x140] sm:$0xff]  }
   0x7   :  { %2647 = vmatpush1.bf16.msra.mxu0 %v4845_v4  ;;  %2070 = vmatprep.subr.bf16.mxu1 %v4908_v0  ;;  %v5009_v19 = vld [vmem:[%s6219_s0] sm:$0xff]  ;;  %v5019_v21 = vld [vmem:[%s6219_s0 + $0x10] sm:$0xff]  ;;  %v4860_v24 = vld [vmem:[%s6218_s1 + $0x48] sm:$0xff]  }
   0x8   :  { %2648 = vmatprep.subr.bf16.mxu0 %v4908_v0  ;;  %v5014_v20 = vld [vmem:[%s6219_s0 + $0x20] sm:$0xff]  ;;  %v5026_v23 = vld [vmem:[%s6219_s0 + $0x30] sm:$0xff]  ;;  %v4861_v26 = vld [vmem:[%s6218_s1 + $0x148] sm:$0xff]  }
   0x9   :  { %v3881_v22 = vcombine.high %v5009_v19, %v5014_v20  ;;  %v3885_v25 = vcombine.high %v5019_v21, %v5026_v23  ;;  %v4862_v27 = vld [vmem:[%s6218_s1 + $0x50] sm:$0xff]   ;;  %v4864_v29 = vld [vmem:[%s6218_s1 + $0x58] sm:$0xff]   ;;  %v4866_v31 = vld [vmem:[%s6218_s1 + $0x60] sm:$0xff]   ;;  %v3880_v42 = vcombine.low %v5009_v19, %v5014_v20  ;;  %v3884_v44 = vcombine.low %v5019_v21, %v5026_v23 }
   0xa   :  { %2071 = vmatpush1.bf16.msra.mxu1 %v4846_v5  ;;  %v4863_v28 = vld [vmem:[%s6218_s1 + $0x150] sm:$0xff]   ;;  %v4865_v30 = vld [vmem:[%s6218_s1 + $0x158] sm:$0xff]   ;;  %v4867_v32 = vld [vmem:[%s6218_s1 + $0x160] sm:$0xff]  }
   0xb   :  { %2649 = vmatpush1.bf16.msra.mxu0 %v4847_v6  ;;  %2072 = vmatprep.subr.bf16.mxu1 %v4908_v0  ;;  %v4868_v33 = vld [vmem:[%s6218_s1 + $0x68] sm:$0xff]   ;;  %v4870_v35 = vld [vmem:[%s6218_s1 + $0x70] sm:$0xff]   ;;  %v4872_v37 = vld [vmem:[%s6218_s1 + $0x78] sm:$0xff]  }
   0xc   :  { %2650 = vmatprep.subr.bf16.mxu0 %v4908_v0  ;;  %2098 = vmatprep.mubr.bf16.mxu1 %v3881_v22  ;;  %v4869_v34 = vld [vmem:[%s6218_s1 + $0x168] sm:$0xff]   ;;  %v4871_v36 = vld [vmem:[%s6218_s1 + $0x170] sm:$0xff]   ;;  %v4873_v38 = vld [vmem:[%s6218_s1 + $0x178] sm:$0xff]  }
   0xd   :  { %2676 = vmatprep.mubr.bf16.mxu0 %v3885_v25  ;;  %v26_v39 = vld [vmem:[%s6219_s0 + $0x40] sm:$0xff]  ;;  %v28_v41 = vld [vmem:[%s6219_s0 + $0x50] sm:$0xff]  ;;  %v4876_v51 = vld [vmem:[%s6218_s1 + $0x88] sm:$0xff]  }
   0xe   :  { %2073 = vmatpush1.bf16.msra.mxu1 %v4848_v7  ;;  %v30_v40 = vld [vmem:[%s6219_s0 + $0x60] sm:$0xff]  ;;  %v32_v43 = vld [vmem:[%s6219_s0 + $0x70] sm:$0xff]  ;;  %v4877_v52 = vld [vmem:[%s6218_s1 + $0x188] sm:$0xff]  }
   0xf   :  { %2651 = vmatpush1.bf16.msra.mxu0 %v4849_v8  ;;  %2074 = vmatprep.subr.bf16.mxu1 %v4908_v0  ;;  %v4874_v45 = vld [vmem:[%s6218_s1 + $0x80] sm:$0xff]   ;;  %v3889_v47 = vcombine.high %v26_v39, %v30_v40  ;;  %v3893_v48 = vcombine.high %v28_v41, %v32_v43  ;;  %v36_v53 = vld [vmem:[%s6219_s0 + $0x90] sm:$0xff]  ;;  %v3888_v55 = vcombine.low %v26_v39, %v30_v40  ;;  %v4880_v2 = vld [vmem:[%s6218_s1 + $0x98] sm:$0xff]  }
  0x10   :  { %2652 = vmatprep.subr.bf16.mxu0 %v4908_v0  ;;  %v4875_v46 = vld [vmem:[%s6218_s1 + $0x180] sm:$0xff]   ;;  %v40_v54 = vld [vmem:[%s6219_s0 + $0xb0] sm:$0xff]  ;;  %v3892_v56 = vcombine.low %v28_v41, %v32_v43  ;;  %v4881_v3 = vld [vmem:[%s6218_s1 + $0x198] sm:$0xff]  }
  0x11   :  { %v34_v49 = vld [vmem:[%s6219_s0 + $0x80] sm:$0xff]  ;;  %v3901_v58 = vcombine.high %v36_v53, %v40_v54  ;;  %v4878_v59 = vld [vmem:[%s6218_s1 + $0x90] sm:$0xff]   ;;  %v3900_v6 = vcombine.low %v36_v53, %v40_v54  ;;  %v4893_v39 = vld [vmem:[%s6218_s1 + $0x1c8] sm:$0xff]  }
  0x12   :  { %2075 = vmatpush1.bf16.msra.mxu1 %v4850_v9  ;;  %v38_v50 = vld [vmem:[%s6219_s0 + $0xa0] sm:$0xff]  ;;  %v4879_v60 = vld [vmem:[%s6218_s1 + $0x190] sm:$0xff]   ;;  %v4896_v54 = vld [vmem:[%s6218_s1 + $0xd8] sm:$0xff]  }
  0x13   :  { %2653 = vmatpush1.bf16.msra.mxu0 %v4851_v10  ;;  %2076 = vmatprep.subr.bf16.mxu1 %v4908_v0  ;;  %v3897_v57 = vcombine.high %v34_v49, %v38_v50  ;;  %v42_v61 = vld [vmem:[%s6219_s0 + $0xc0] sm:$0xff]  ;;  %v44_v63 = vld [vmem:[%s6219_s0 + $0xd0] sm:$0xff]  ;;  %v3896_v4 = vcombine.low %v34_v49, %v38_v50 }
  0x14   :  { %2654 = vmatprep.subr.bf16.mxu0 %v4908_v0  ;;  %v46_v62 = vld [vmem:[%s6219_s0 + $0xe0] sm:$0xff]  ;;  %v48_v1 = vld [vmem:[%s6219_s0 + $0xf0] sm:$0xff] }
  0x15   :  { %v4882_v5 = vld [vmem:[%s6218_s1 + $0xa0] sm:$0xff]   ;;  %v3905_v7 = vcombine.high %v42_v61, %v46_v62  ;;  %v3909_v9 = vcombine.high %v44_v63, %v48_v1  ;;  %v4886_v20 = vld [vmem:[%s6218_s1 + $0xb0] sm:$0xff]  }
  0x16   :  { %2077 = vmatpush1.bf16.msra.mxu1 %v4852_v11  ;;  %v4883_v8 = vld [vmem:[%s6218_s1 + $0x1a0] sm:$0xff]   ;;  %v4887_v21 = vld [vmem:[%s6218_s1 + $0x1b0] sm:$0xff]  }
  0x17   :  { %2655 = vmatpush1.bf16.msra.mxu0 %v4853_v12  ;;  %2078 = vmatprep.subr.bf16.mxu1 %v4908_v0  ;;  %v50_v10 = vld [vmem:[%s6219_s0 + $0x100] sm:$0xff]  ;;  %v52_v12 = vld [vmem:[%s6219_s0 + $0x110] sm:$0xff] }
  0x18   :  { %2656 = vmatprep.subr.bf16.mxu0 %v4908_v0  ;;  %v54_v11 = vld [vmem:[%s6219_s0 + $0x120] sm:$0xff]  ;;  %v60_v25 = vld [vmem:[%s6219_s0 + $0x150] sm:$0xff] }
  0x19   :  { %v58_v22 = vld [vmem:[%s6219_s0 + $0x140] sm:$0xff]  ;;  %v80_v49 = vld [vmem:[%s6219_s0 + $0x1f0] sm:$0xff] }
  0x1a   :  { %2079 = vmatpush1.bf16.msra.mxu1 %v4854_v13  ;;  %v56_v13 = vld [vmem:[%s6219_s0 + $0x130] sm:$0xff]  ;;  %v62_v23 = vld [vmem:[%s6219_s0 + $0x160] sm:$0xff] }
  0x1b   :  { %2657 = vmatpush1.bf16.msra.mxu0 %v4855_v14  ;;  %2080 = vmatprep.subr.bf16.mxu1 %v4908_v0  ;;  %v4884_v14 = vld [vmem:[%s6218_s1 + $0xa8] sm:$0xff]   ;;  %v3917_v19 = vcombine.high %v52_v12, %v56_v13  ;;  %v3920_v40 = vcombine.low %v58_v22, %v62_v23 }
  0x1c   :  { %2658 = vmatprep.subr.bf16.mxu0 %v4908_v0 }
  0x1e   :  { %2081 = vmatpush1.bf16.msra.mxu1 %v4856_v15  ;;  %v4885_v15 = vld [vmem:[%s6218_s1 + $0x1a8] sm:$0xff]  }
  0x1f   :  { %2659 = vmatpush1.bf16.msra.mxu0 %v4857_v16  ;;  %2082 = vmatprep.subr.bf16.mxu1 %v4908_v0  ;;  %v3904_v16 = vcombine.low %v42_v61, %v46_v62 }
  0x20   :  { %2660 = vmatprep.subr.bf16.mxu0 %v4908_v0 }
  0x22   :  { %2083 = vmatpush1.bf16.msra.mxu1 %v4858_v17  ;;  %v3908_v17 = vcombine.low %v44_v63, %v48_v1  ;;  %v90_v1 = vld [vmem:[%s6219_s0 + $0x240] sm:$0xff] }
  0x23   :  { %2661 = vmatpush1.bf16.msra.mxu0 %v4859_v18  ;;  %2084 = vmatprep.subr.bf16.mxu1 %v4908_v0  ;;  %v3913_v18 = vcombine.high %v50_v10, %v54_v11 }
  0x24   :  { %2662 = vmatprep.subr.bf16.mxu0 %v4908_v0 }
  0x26   :  { %2085 = vmatpush1.bf16.msra.mxu1 %v4860_v24  ;;  %v4888_v24 = vld [vmem:[%s6218_s1 + $0xb8] sm:$0xff]  }
  0x27   :  { %2663 = vmatpush1.bf16.msra.mxu0 %v4861_v26  ;;  %2086 = vmatprep.subr.bf16.mxu1 %v4908_v0  ;;  %v64_v26 = vld [vmem:[%s6219_s0 + $0x170] sm:$0xff] }
  0x28   :  { %2664 = vmatprep.subr.bf16.mxu0 %v4908_v0  ;;  %v3924_v41 = vcombine.low %v60_v25, %v64_v26 }
  0x2a   :  { %2087 = vmatpush1.bf16.msra.mxu1 %v4862_v27  ;;  %v4889_v27 = vld [vmem:[%s6218_s1 + $0x1b8] sm:$0xff]  }
  0x2b   :  { %2665 = vmatpush1.bf16.msra.mxu0 %v4863_v28  ;;  %2088 = vmatprep.subr.bf16.mxu1 %v4908_v0  ;;  %v3912_v28 = vcombine.low %v50_v10, %v54_v11  ;;  %v4899_v10 = vld [vmem:[%s6218_s1 + $0x1e0] sm:$0xff]  }
  0x2c   :  { %2666 = vmatprep.subr.bf16.mxu0 %v4908_v0  ;;  %v98_v11 = vld [vmem:[%s6219_s0 + $0x280] sm:$0xff] }
  0x2e   :  { %2089 = vmatpush1.bf16.msra.mxu1 %v4864_v29  ;;  %v3916_v29 = vcombine.low %v52_v12, %v56_v13  ;;  %v102_v12 = vld [vmem:[%s6219_s0 + $0x2a0] sm:$0xff]  ;;  %v100_v13 = vld [vmem:[%s6219_s0 + $0x290] sm:$0xff] }
  0x2f   :  { %2667 = vmatpush1.bf16.msra.mxu0 %v4865_v30  ;;  %2090 = vmatprep.subr.bf16.mxu1 %v4908_v0  ;;  %v3921_v30 = vcombine.high %v58_v22, %v62_v23  ;;  %v112_v22 = vld [vmem:[%s6219_s0 + $0x2f0] sm:$0xff]  ;;  %v3960_v23 = vcombine.low %v98_v11, %v102_v12 }
  0x30   :  { %2668 = vmatprep.subr.bf16.mxu0 %v4908_v0 }
  0x32   :  { %2091 = vmatpush1.bf16.msra.mxu1 %v4866_v31  ;;  %v3925_v31 = vcombine.high %v60_v25, %v64_v26 }
  0x33   :  { %2669 = vmatpush1.bf16.msra.mxu0 %v4867_v32  ;;  %2092 = vmatprep.subr.bf16.mxu1 %v4908_v0  ;;  %v4890_v32 = vld [vmem:[%s6218_s1 + $0xc0] sm:$0xff]  }
  0x34   :  { %2670 = vmatprep.subr.bf16.mxu0 %v4908_v0 }
  0x36   :  { %2093 = vmatpush1.bf16.msra.mxu1 %v4868_v33  ;;  %v4891_v33 = vld [vmem:[%s6218_s1 + $0x1c0] sm:$0xff]  }
  0x37   :  { %2671 = vmatpush1.bf16.msra.mxu0 %v4869_v34  ;;  %2094 = vmatprep.subr.bf16.mxu1 %v4908_v0  ;;  %v66_v34 = vld [vmem:[%s6219_s0 + $0x180] sm:$0xff] }
  0x38   :  { %2672 = vmatprep.subr.bf16.mxu0 %v4908_v0 }
  0x3a   :  { %2095 = vmatpush1.bf16.msra.mxu1 %v4870_v35  ;;  %v70_v35 = vld [vmem:[%s6219_s0 + $0x1a0] sm:$0xff] }
  0x3b   :  { %2673 = vmatpush1.bf16.msra.mxu0 %v4871_v36  ;;  %2096 = vmatprep.subr.bf16.mxu1 %v4908_v0  ;;  %v4892_v36 = vld [vmem:[%s6218_s1 + $0xc8] sm:$0xff]   ;;  %v3928_v50 = vcombine.low %v66_v34, %v70_v35 }
  0x3c   :  { %2674 = vmatprep.subr.bf16.mxu0 %v4908_v0 }
  0x3e   :  { %2097 = vmatpush1.bf16.msra.mxu1 %v4872_v37  ;;  %v68_v37 = vld [vmem:[%s6219_s0 + $0x190] sm:$0xff] }
  0x3f   :  { %2675 = vmatpush1.bf16.msra.mxu0 %v4873_v38  ;;  %2355 = vmatprep.subr.bf16.mxu1 %v4908_v0  ;;  %v72_v38 = vld [vmem:[%s6219_s0 + $0x1b0] sm:$0xff] }
  0x40   :  { %2933 = vmatprep.subr.bf16.mxu0 %v4908_v0  ;;  %v3933_v43 = vcombine.high %v68_v37, %v72_v38 }
  0x41   :  { %2099 = vmatmul.mubr.bf16.vlgmr.msra.gmra.mrb[0].mxu1 %v3880_v42  ;;  %v3929_v42 = vcombine.high %v66_v34, %v70_v35 }
  0x42   :  { %2677 = vmatmul.mubr.bf16.vlgmr.msra.gmra.mrb[0].mxu0 %v3884_v44  ;;  %2356 = vmatpush1.bf16.msra.mxu1 %v4874_v45  ;;  %v4894_v44 = vld [vmem:[%s6218_s1 + $0xd0] sm:$0xff]  }
  0x43   :  { %2934 = vmatpush1.bf16.msra.mxu0 %v4875_v46  ;;  %2106 = vmatprep.mubr.bf16.mxu1 %v3889_v47  ;;  %v4895_v45 = vld [vmem:[%s6218_s1 + $0x1d0] sm:$0xff]   ;;  %v74_v46 = vld [vmem:[%s6219_s0 + $0x1c0] sm:$0xff] }
  0x44   :  { %2684 = vmatprep.mubr.bf16.mxu0 %v3893_v48  ;;  %2357 = vmatprep.subr.bf16.mxu1 %v4908_v0  ;;  %v78_v47 = vld [vmem:[%s6219_s0 + $0x1e0] sm:$0xff]  ;;  %v76_v48 = vld [vmem:[%s6219_s0 + $0x1d0] sm:$0xff] }
  0x45   :  { %2935 = vmatprep.subr.bf16.mxu0 %v4908_v0  ;;  %v3941_v53 = vcombine.high %v76_v48, %v80_v49  ;;  %v3940_v61 = vcombine.low %v76_v48, %v80_v49  ;;  %v134_v48 = vld [vmem:[%s6219_s0 + $0x3a0] sm:$0xff]  ;;  %v132_v49 = vld [vmem:[%s6219_s0 + $0x390] sm:$0xff] }
  0x46   :  { %2358 = vmatpush1.bf16.msra.mxu1 %v4876_v51  ;;  %v3932_v51 = vcombine.low %v68_v37, %v72_v38  ;;  %v122_v37 = vld [vmem:[%s6219_s0 + $0x340] sm:$0xff] }
  0x47   :  { %2936 = vmatpush1.bf16.msra.mxu0 %v4877_v52  ;;  %2359 = vmatprep.subr.bf16.mxu1 %v4908_v0  ;;  %v3937_v52 = vcombine.high %v74_v46, %v78_v47  ;;  %v126_v38 = vld [vmem:[%s6219_s0 + $0x360] sm:$0xff] }
  0x48   :  { %2937 = vmatprep.subr.bf16.mxu0 %v4908_v0 }
  0x49   :  { %2107 = vmatmul.mubr.bf16.gmra.mrb[4].mxu1 %v3888_v55  ;;  %v4897_v55 = vld [vmem:[%s6218_s1 + $0x1d8] sm:$0xff]  }
  0x4a   :  { %2685 = vmatmul.mubr.bf16.gmra.mrb[4].mxu0 %v3892_v56  ;;  %2114 = vmatprep.mubr.bf16.mxu1 %v3897_v57  ;;  %v82_v56 = vld [vmem:[%s6219_s0 + $0x200] sm:$0xff] }
  0x4b   :  { %2692 = vmatprep.mubr.bf16.mxu0 %v3901_v58  ;;  %2360 = vmatpush1.bf16.msra.mxu1 %v4878_v59  ;;  %v86_v57 = vld [vmem:[%s6219_s0 + $0x220] sm:$0xff]  ;;  %v84_v58 = vld [vmem:[%s6219_s0 + $0x210] sm:$0xff] }
  0x4c   :  { %2938 = vmatpush1.bf16.msra.mxu0 %v4879_v60  ;;  %2361 = vmatprep.subr.bf16.mxu1 %v4908_v0  ;;  %v88_v59 = vld [vmem:[%s6219_s0 + $0x230] sm:$0xff]  ;;  %v3936_v60 = vcombine.low %v74_v46, %v78_v47  ;;  %v3945_v62 = vcombine.high %v82_v56, %v86_v57  ;;  %v130_v47 = vld [vmem:[%s6219_s0 + $0x380] sm:$0xff] }
  0x4d   :  { %2939 = vmatprep.subr.bf16.mxu0 %v4908_v0  ;;  %v3949_v63 = vcombine.high %v84_v58, %v88_v59  ;;  %v4903_v46 = vld [vmem:[%s6218_s1 + $0x1f0] sm:$0xff]  }
  0x4f   :  { %2362 = vmatpush1.bf16.msra.mxu1 %v4880_v2  ;;  %v94_v2 = vld [vmem:[%s6219_s0 + $0x260] sm:$0xff] }
  0x50   :  { %2940 = vmatpush1.bf16.msra.mxu0 %v4881_v3  ;;  %2363 = vmatprep.subr.bf16.mxu1 %v4908_v0  ;;  %v92_v3 = vld [vmem:[%s6219_s0 + $0x250] sm:$0xff] }
  0x51   :  { %2115 = vmatmul.mubr.bf16.gmra.mrb[8].mxu1 %v3896_v4  ;;  %2941 = vmatprep.subr.bf16.mxu0 %v4908_v0  ;;  %v96_v4 = vld [vmem:[%s6219_s0 + $0x270] sm:$0xff] }
  0x52   :  { %2693 = vmatmul.mubr.bf16.gmra.mrb[8].mxu0 %v3900_v6  ;;  %2122 = vmatprep.mubr.bf16.mxu1 %v3905_v7  ;;  %v3948_v6 = vcombine.low %v84_v58, %v88_v59  ;;  %v3953_v7 = vcombine.high %v90_v1, %v94_v2  ;;  %v3992_v58 = vcombine.low %v130_v47, %v134_v48 }
  0x53   :  { %2700 = vmatprep.mubr.bf16.mxu0 %v3909_v9  ;;  %2364 = vmatpush1.bf16.msra.mxu1 %v4882_v5  ;;  %v3944_v5 = vcombine.low %v82_v56, %v86_v57  ;;  %v4898_v9 = vld [vmem:[%s6218_s1 + $0xe0] sm:$0xff]   ;;  %v140_v57 = vld [vmem:[%s6219_s0 + $0x3d0] sm:$0xff] }
  0x54   :  { %2942 = vmatpush1.bf16.msra.mxu0 %v4883_v8  ;;  %2365 = vmatprep.subr.bf16.mxu1 %v4908_v0  ;;  %v3957_v8 = vcombine.high %v92_v3, %v96_v4  ;;  %v142_v56 = vld [vmem:[%s6219_s0 + $0x3e0] sm:$0xff] }
  0x55   :  { %2943 = vmatprep.subr.bf16.mxu0 %v4908_v0 }
  0x57   :  { %2366 = vmatpush1.bf16.msra.mxu1 %v4884_v14  ;;  %v104_v14 = vld [vmem:[%s6219_s0 + $0x2b0] sm:$0xff] }
  0x58   :  { %2944 = vmatpush1.bf16.msra.mxu0 %v4885_v15  ;;  %2367 = vmatprep.subr.bf16.mxu1 %v4908_v0  ;;  %v3952_v15 = vcombine.low %v90_v1, %v94_v2  ;;  %v146_v1 = vld [vmem:[%s6219_s0 + $0x400] sm:$0xff] }
  0x59   :  { %2123 = vmatmul.mubr.bf16.gmra.mrb[12].mxu1 %v3904_v16  ;;  %2945 = vmatprep.subr.bf16.mxu0 %v4908_v0  ;;  %v3956_v16 = vcombine.low %v92_v3, %v96_v4  ;;  %v150_v2 = vld [vmem:[%s6219_s0 + $0x420] sm:$0xff]  ;;  %v148_v3 = vld [vmem:[%s6219_s0 + $0x410] sm:$0xff] }
  0x5a   :  { %2701 = vmatmul.mubr.bf16.gmra.mrb[12].mxu0 %v3908_v17  ;;  %2130 = vmatprep.mubr.bf16.mxu1 %v3913_v18  ;;  %v3961_v17 = vcombine.high %v98_v11, %v102_v12  ;;  %v3965_v18 = vcombine.high %v100_v13, %v104_v14  ;;  %v152_v4 = vld [vmem:[%s6219_s0 + $0x430] sm:$0xff] }
  0x5b   :  { %2708 = vmatprep.mubr.bf16.mxu0 %v3917_v19  ;;  %2368 = vmatpush1.bf16.msra.mxu1 %v4886_v20  ;;  %v106_v19 = vld [vmem:[%s6219_s0 + $0x2c0] sm:$0xff]  ;;  %v156_v11 = vld [vmem:[%s6219_s0 + $0x450] sm:$0xff] }
  0x5c   :  { %2946 = vmatpush1.bf16.msra.mxu0 %v4887_v21  ;;  %2369 = vmatprep.subr.bf16.mxu1 %v4908_v0  ;;  %v110_v20 = vld [vmem:[%s6219_s0 + $0x2e0] sm:$0xff]  ;;  %v108_v21 = vld [vmem:[%s6219_s0 + $0x2d0] sm:$0xff] }
  0x5d   :  { %2947 = vmatprep.subr.bf16.mxu0 %v4908_v0  ;;  %v3969_v25 = vcombine.high %v106_v19, %v110_v20  ;;  %v3973_v26 = vcombine.high %v108_v21, %v112_v22  ;;  %v3972_v34 = vcombine.low %v108_v21, %v112_v22  ;;  %v160_v12 = vld [vmem:[%s6219_s0 + $0x470] sm:$0xff] }
  0x5e   :  { %v4020_v22 = vcombine.low %v156_v11, %v160_v12 }
  0x5f   :  { %2370 = vmatpush1.bf16.msra.mxu1 %v4888_v24  ;;  %v3964_v24 = vcombine.low %v100_v13, %v104_v14  ;;  %v4008_v13 = vcombine.low %v146_v1, %v150_v2  ;;  %v4012_v14 = vcombine.low %v148_v3, %v152_v4 }
  0x60   :  { %2948 = vmatpush1.bf16.msra.mxu0 %v4889_v27  ;;  %2371 = vmatprep.subr.bf16.mxu1 %v4908_v0  ;;  %v4900_v27 = vld [vmem:[%s6218_s1 + $0xe8] sm:$0xff]  }
  0x61   :  { %2131 = vmatmul.mubr.bf16.gmra.mrb[16].mxu1 %v3912_v28  ;;  %2949 = vmatprep.subr.bf16.mxu0 %v4908_v0  ;;  %v4901_v28 = vld [vmem:[%s6218_s1 + $0x1e8] sm:$0xff]  }
  0x62   :  { %2709 = vmatmul.mubr.bf16.gmra.mrb[16].mxu0 %v3916_v29  ;;  %2138 = vmatprep.mubr.bf16.mxu1 %v3921_v30  ;;  %v114_v29 = vld [vmem:[%s6219_s0 + $0x300] sm:$0xff] }
  0x63   :  { %2716 = vmatprep.mubr.bf16.mxu0 %v3925_v31  ;;  %2372 = vmatpush1.bf16.msra.mxu1 %v4890_v32  ;;  %v118_v30 = vld [vmem:[%s6219_s0 + $0x320] sm:$0xff]  ;;  %v116_v31 = vld [vmem:[%s6219_s0 + $0x310] sm:$0xff] }
  0x64   :  { %2950 = vmatpush1.bf16.msra.mxu0 %v4891_v33  ;;  %2373 = vmatprep.subr.bf16.mxu1 %v4908_v0  ;;  %v120_v32 = vld [vmem:[%s6219_s0 + $0x330] sm:$0xff]  ;;  %v3968_v33 = vcombine.low %v106_v19, %v110_v20  ;;  %v3977_v35 = vcombine.high %v114_v29, %v118_v30 }
  0x65   :  { %2951 = vmatprep.subr.bf16.mxu0 %v4908_v0  ;;  %v164_v19 = vld [vmem:[%s6219_s0 + $0x490] sm:$0xff] }
  0x66   :  { %v168_v20 = vld [vmem:[%s6219_s0 + $0x4b0] sm:$0xff] }
  0x67   :  { %2374 = vmatpush1.bf16.msra.mxu1 %v4892_v36  ;;  %v3981_v36 = vcombine.high %v116_v31, %v120_v32 }
  0x68   :  { %2952 = vmatpush1.bf16.msra.mxu0 %v4893_v39  ;;  %2375 = vmatprep.subr.bf16.mxu1 %v4908_v0  ;;  %v124_v39 = vld [vmem:[%s6219_s0 + $0x350] sm:$0xff] }
  0x69   :  { %2139 = vmatmul.mubr.bf16.gmra.mrb[20].mxu1 %v3920_v40  ;;  %2953 = vmatprep.subr.bf16.mxu0 %v4908_v0  ;;  %v128_v40 = vld [vmem:[%s6219_s0 + $0x370] sm:$0xff] }
  0x6a   :  { %2717 = vmatmul.mubr.bf16.gmra.mrb[20].mxu0 %v3924_v41  ;;  %2146 = vmatprep.mubr.bf16.mxu1 %v3929_v42  ;;  %v3976_v41 = vcombine.low %v114_v29, %v118_v30  ;;  %v3980_v42 = vcombine.low %v116_v31, %v120_v32  ;;  %v4028_v30 = vcombine.low %v164_v19, %v168_v20 }
  0x6b   :  { %2724 = vmatprep.mubr.bf16.mxu0 %v3933_v43  ;;  %2376 = vmatpush1.bf16.msra.mxu1 %v4894_v44  ;;  %v3985_v43 = vcombine.high %v122_v37, %v126_v38  ;;  %v3989_v44 = vcombine.high %v124_v39, %v128_v40 }
  0x6c   :  { %2954 = vmatpush1.bf16.msra.mxu0 %v4895_v45  ;;  %2377 = vmatprep.subr.bf16.mxu1 %v4908_v0  ;;  %v4902_v45 = vld [vmem:[%s6218_s1 + $0xf0] sm:$0xff]  }
  0x6d   :  { %2955 = vmatprep.subr.bf16.mxu0 %v4908_v0 }
  0x6f   :  { %2378 = vmatpush1.bf16.msra.mxu1 %v4896_v54 }
  0x70   :  { %2956 = vmatpush1.bf16.msra.mxu0 %v4897_v55  ;;  %2379 = vmatprep.subr.bf16.mxu1 %v4908_v0  ;;  %v138_v55 = vld [vmem:[%s6219_s0 + $0x3c0] sm:$0xff] }
  0x71   :  { %2147 = vmatmul.mubr.bf16.gmra.mrb[24].mxu1 %v3928_v50  ;;  %2957 = vmatprep.subr.bf16.mxu0 %v4908_v0  ;;  %v136_v50 = vld [vmem:[%s6219_s0 + $0x3b0] sm:$0xff] }
  0x72   :  { %2725 = vmatmul.mubr.bf16.gmra.mrb[24].mxu0 %v3932_v51  ;;  %2154 = vmatprep.mubr.bf16.mxu1 %v3937_v52  ;;  %v3984_v51 = vcombine.low %v122_v37, %v126_v38  ;;  %v3988_v52 = vcombine.low %v124_v39, %v128_v40  ;;  %v3997_v54 = vcombine.high %v132_v49, %v136_v50 }
  0x73   :  { %2732 = vmatprep.mubr.bf16.mxu0 %v3941_v53  ;;  %2380 = vmatpush1.bf16.msra.mxu1 %v4898_v9  ;;  %v3993_v53 = vcombine.high %v130_v47, %v134_v48  ;;  %v3996_v59 = vcombine.low %v132_v49, %v136_v50  ;;  %v154_v9 = vld [vmem:[%s6219_s0 + $0x440] sm:$0xff] }
  0x74   :  { %2958 = vmatpush1.bf16.msra.mxu0 %v4899_v10  ;;  %2381 = vmatprep.subr.bf16.mxu1 %v4908_v0  ;;  %v158_v10 = vld [vmem:[%s6219_s0 + $0x460] sm:$0xff] }
  0x75   :  { %2959 = vmatprep.subr.bf16.mxu0 %v4908_v0  ;;  %v4016_v21 = vcombine.low %v154_v9, %v158_v10  ;;  %v194_v49 = vld [vmem:[%s6219_s0 + $0x580] sm:$0xff] }
  0x76   :  { %v198_v50 = vld [vmem:[%s6219_s0 + $0x5a0] sm:$0xff] }
  0x77   :  { %2382 = vmatpush1.bf16.msra.mxu1 %v4900_v27  ;;  %v172_v27 = vld [vmem:[%s6219_s0 + $0x4d0] sm:$0xff] }
  0x78   :  { %2960 = vmatpush1.bf16.msra.mxu0 %v4901_v28  ;;  %2383 = vmatprep.subr.bf16.mxu1 %v4908_v0  ;;  %v176_v28 = vld [vmem:[%s6219_s0 + $0x4f0] sm:$0xff] }
  0x79   :  { %2155 = vmatmul.mubr.bf16.gmra.mrb[28].mxu1 %v3936_v60  ;;  %2961 = vmatprep.subr.bf16.mxu0 %v4908_v0  ;;  %v4001_v60 = vcombine.high %v138_v55, %v142_v56  ;;  %v4037_v32 = vcombine.high %v172_v27, %v176_v28  ;;  %v4036_v38 = vcombine.low %v172_v27, %v176_v28  ;;  %v236_v27 = vld [vmem:[%s6219_s0 + $0x6d0] sm:$0xff] }
  0x7a   :  { %2733 = vmatmul.mubr.bf16.gmra.mrb[28].mxu0 %v3940_v61  ;;  %2162 = vmatprep.mubr.bf16.mxu1 %v3945_v62  ;;  %v4904_v62 = vld [vmem:[%s6218_s1 + $0xf8] sm:$0xff]   ;;  %v240_v28 = vld [vmem:[%s6219_s0 + $0x6f0] sm:$0xff] }
  0x7b   :  { %2740 = vmatprep.mubr.bf16.mxu0 %v3949_v63  ;;  %2384 = vmatpush1.bf16.msra.mxu1 %v4902_v45  ;;  %v4905_v63 = vld [vmem:[%s6218_s1 + $0x1f8] sm:$0xff]  }
  0x7c   :  { %2962 = vmatpush1.bf16.msra.mxu0 %v4903_v46  ;;  %2385 = vmatprep.subr.bf16.mxu1 %v4908_v0 }
  0x7d   :  { %2963 = vmatprep.subr.bf16.mxu0 %v4908_v0  ;;  %v144_v0 = vld [vmem:[%s6219_s0 + $0x3f0] sm:$0xff] }
  0x7e   :  { %v4005_v61 = vcombine.high %v140_v57, %v144_v0 }
  0x7f   :  { %2386 = vmatpush1.bf16.msra.mxu1 %v4904_v62 }
  0x80   :  { %2964 = vmatpush1.bf16.msra.mxu0 %v4905_v63 }
  0x81   :  { %2163 = vmatmul.mubr.bf16.gmra.mrb[32].mxu1 %v3944_v5  ;;  %v4000_v5 = vcombine.low %v138_v55, %v142_v56  ;;  %v4057_v55 = vcombine.high %v194_v49, %v198_v50 }
  0x82   :  { %2741 = vmatmul.mubr.bf16.gmra.mrb[32].mxu0 %v3948_v6  ;;  %2170 = vmatprep.mubr.bf16.mxu1 %v3953_v7  ;;  %v4004_v6 = vcombine.low %v140_v57, %v144_v0  ;;  %v4009_v7 = vcombine.high %v146_v1, %v150_v2  ;;  %v202_v57 = vld [vmem:[%s6219_s0 + $0x5c0] sm:$0xff] }
  0x83   :  { %2748 = vmatprep.mubr.bf16.mxu0 %v3957_v8  ;;  %v4013_v8 = vcombine.high %v148_v3, %v152_v4  ;;  %v206_v0 = vld [vmem:[%s6219_s0 + $0x5e0] sm:$0xff]  ;;  %v212_v3 = vld [vmem:[%s6219_s0 + $0x610] sm:$0xff] }
  0x84   :  { %v4065_v62 = vcombine.high %v202_v57, %v206_v0  ;;  %v210_v1 = vld [vmem:[%s6219_s0 + $0x600] sm:$0xff]  ;;  %v216_v4 = vld [vmem:[%s6219_s0 + $0x630] sm:$0xff] }
  0x85   :  { %v214_v2 = vld [vmem:[%s6219_s0 + $0x620] sm:$0xff] }
  0x89   :  { %2171 = vmatmul.mubr.bf16.gmra.mrb[36].mxu1 %v3952_v15  ;;  %v4017_v15 = vcombine.high %v154_v9, %v158_v10  ;;  %v218_v9 = vld [vmem:[%s6219_s0 + $0x640] sm:$0xff] }
  0x8a   :  { %2749 = vmatmul.mubr.bf16.gmra.mrb[36].mxu0 %v3956_v16  ;;  %2178 = vmatprep.mubr.bf16.mxu1 %v3961_v17  ;;  %v4021_v16 = vcombine.high %v156_v11, %v160_v12  ;;  %v162_v17 = vld [vmem:[%s6219_s0 + $0x480] sm:$0xff]  ;;  %v220_v11 = vld [vmem:[%s6219_s0 + $0x650] sm:$0xff] }
  0x8b   :  { %2756 = vmatprep.mubr.bf16.mxu0 %v3965_v18  ;;  %v166_v18 = vld [vmem:[%s6219_s0 + $0x4a0] sm:$0xff]  ;;  %v224_v12 = vld [vmem:[%s6219_s0 + $0x670] sm:$0xff] }
  0x8c   :  { %v4024_v29 = vcombine.low %v162_v17, %v166_v18  ;;  %v222_v10 = vld [vmem:[%s6219_s0 + $0x660] sm:$0xff] }
  0x91   :  { %2179 = vmatmul.mubr.bf16.gmra.mrb[40].mxu1 %v3960_v23  ;;  %v4025_v23 = vcombine.high %v162_v17, %v166_v18  ;;  %v226_v17 = vld [vmem:[%s6219_s0 + $0x680] sm:$0xff] }
  0x92   :  { %2757 = vmatmul.mubr.bf16.gmra.mrb[40].mxu0 %v3964_v24  ;;  %2186 = vmatprep.mubr.bf16.mxu1 %v3969_v25  ;;  %v4029_v24 = vcombine.high %v164_v19, %v168_v20  ;;  %v170_v25 = vld [vmem:[%s6219_s0 + $0x4c0] sm:$0xff]  ;;  %v228_v19 = vld [vmem:[%s6219_s0 + $0x690] sm:$0xff] }
  0x93   :  { %2764 = vmatprep.mubr.bf16.mxu0 %v3973_v26  ;;  %v174_v26 = vld [vmem:[%s6219_s0 + $0x4e0] sm:$0xff]  ;;  %v232_v20 = vld [vmem:[%s6219_s0 + $0x6b0] sm:$0xff] }
  0x94   :  { %v4033_v31 = vcombine.high %v170_v25, %v174_v26  ;;  %v4032_v37 = vcombine.low %v170_v25, %v174_v26  ;;  %v230_v18 = vld [vmem:[%s6219_s0 + $0x6a0] sm:$0xff] }
  0x95   :  { %v234_v25 = vld [vmem:[%s6219_s0 + $0x6c0] sm:$0xff] }
  0x96   :  { %v238_v26 = vld [vmem:[%s6219_s0 + $0x6e0] sm:$0xff] }
  0x99   :  { %2187 = vmatmul.mubr.bf16.gmra.mrb[44].mxu1 %v3968_v33  ;;  %v178_v33 = vld [vmem:[%s6219_s0 + $0x500] sm:$0xff] }
  0x9a   :  { %2765 = vmatmul.mubr.bf16.gmra.mrb[44].mxu0 %v3972_v34  ;;  %2194 = vmatprep.mubr.bf16.mxu1 %v3977_v35  ;;  %v182_v34 = vld [vmem:[%s6219_s0 + $0x520] sm:$0xff]  ;;  %v180_v35 = vld [vmem:[%s6219_s0 + $0x510] sm:$0xff] }
  0x9b   :  { %2772 = vmatprep.mubr.bf16.mxu0 %v3981_v36  ;;  %v184_v36 = vld [vmem:[%s6219_s0 + $0x530] sm:$0xff]  ;;  %v4041_v39 = vcombine.high %v178_v33, %v182_v34  ;;  %v4040_v45 = vcombine.low %v178_v33, %v182_v34  ;;  %v242_v33 = vld [vmem:[%s6219_s0 + $0x700] sm:$0xff] }
  0x9c   :  { %v4045_v40 = vcombine.high %v180_v35, %v184_v36  ;;  %v4044_v46 = vcombine.low %v180_v35, %v184_v36  ;;  %v246_v34 = vld [vmem:[%s6219_s0 + $0x720] sm:$0xff]  ;;  %v244_v35 = vld [vmem:[%s6219_s0 + $0x710] sm:$0xff] }
  0x9d   :  { %v248_v36 = vld [vmem:[%s6219_s0 + $0x730] sm:$0xff] }
  0xa1   :  { %2195 = vmatmul.mubr.bf16.gmra.mrb[48].mxu1 %v3976_v41  ;;  %v186_v41 = vld [vmem:[%s6219_s0 + $0x540] sm:$0xff] }
  0xa2   :  { %2773 = vmatmul.mubr.bf16.gmra.mrb[48].mxu0 %v3980_v42  ;;  %2202 = vmatprep.mubr.bf16.mxu1 %v3985_v43  ;;  %v190_v42 = vld [vmem:[%s6219_s0 + $0x560] sm:$0xff]  ;;  %v188_v43 = vld [vmem:[%s6219_s0 + $0x550] sm:$0xff] }
  0xa3   :  { %2780 = vmatprep.mubr.bf16.mxu0 %v3989_v44  ;;  %v192_v44 = vld [vmem:[%s6219_s0 + $0x570] sm:$0xff]  ;;  %v4049_v47 = vcombine.high %v186_v41, %v190_v42 }
  0xa4   :  { %v4053_v48 = vcombine.high %v188_v43, %v192_v44 }
  0xa9   :  { %2203 = vmatmul.mubr.bf16.gmra.mrb[52].mxu1 %v3984_v51  ;;  %v196_v51 = vld [vmem:[%s6219_s0 + $0x590] sm:$0xff] }
  0xaa   :  { %2781 = vmatmul.mubr.bf16.gmra.mrb[52].mxu0 %v3988_v52  ;;  %2210 = vmatprep.mubr.bf16.mxu1 %v3993_v53  ;;  %v200_v52 = vld [vmem:[%s6219_s0 + $0x5b0] sm:$0xff]  ;;  %v4048_v53 = vcombine.low %v186_v41, %v190_v42  ;;  %v250_v41 = vld [vmem:[%s6219_s0 + $0x740] sm:$0xff] }
  0xab   :  { %2788 = vmatprep.mubr.bf16.mxu0 %v3997_v54  ;;  %v4052_v54 = vcombine.low %v188_v43, %v192_v44  ;;  %v4061_v56 = vcombine.high %v196_v51, %v200_v52  ;;  %v254_v42 = vld [vmem:[%s6219_s0 + $0x760] sm:$0xff]  ;;  %v252_v43 = vld [vmem:[%s6219_s0 + $0x750] sm:$0xff] }
  0xac   :  { %v256_v44 = vld [vmem:[%s6219_s0 + $0x770] sm:$0xff] }
  0xb1   :  { %2211 = vmatmul.mubr.bf16.gmra.mrb[56].mxu1 %v3992_v58  ;;  %v204_v58 = vld [vmem:[%s6219_s0 + $0x5d0] sm:$0xff] }
  0xb2   :  { %2789 = vmatmul.mubr.bf16.gmra.mrb[56].mxu0 %v3996_v59  ;;  %2218 = vmatprep.mubr.bf16.mxu1 %v4001_v60  ;;  %v208_v59 = vld [vmem:[%s6219_s0 + $0x5f0] sm:$0xff]  ;;  %v4056_v60 = vcombine.low %v194_v49, %v198_v50  ;;  %v258_v49 = vld [vmem:[%s6219_s0 + $0x780] sm:$0xff] }
  0xb3   :  { %2796 = vmatprep.mubr.bf16.mxu0 %v4005_v61  ;;  %v4060_v61 = vcombine.low %v196_v51, %v200_v52  ;;  %v4069_v63 = vcombine.high %v204_v58, %v208_v59  ;;  %v262_v50 = vld [vmem:[%s6219_s0 + $0x7a0] sm:$0xff]  ;;  %v260_v51 = vld [vmem:[%s6219_s0 + $0x790] sm:$0xff] }
  0xb4   :  { %v264_v52 = vld [vmem:[%s6219_s0 + $0x7b0] sm:$0xff] }
  0xb9   :  { %2219 = vmatmul.mubr.bf16.gmra.mrb[60].mxu1 %v4000_v5  ;;  %v4064_v5 = vcombine.low %v202_v57, %v206_v0  ;;  %v266_v57 = vld [vmem:[%s6219_s0 + $0x7c0] sm:$0xff] }
  0xba   :  { %2797 = vmatmul.mubr.bf16.gmra.mrb[60].mxu0 %v4004_v6  ;;  %2226 = vmatprep.mubr.bf16.mxu1 %v4009_v7  ;;  %v4068_v6 = vcombine.low %v204_v58, %v208_v59  ;;  %v4073_v7 = vcombine.high %v210_v1, %v214_v2  ;;  %v270_v0 = vld [vmem:[%s6219_s0 + $0x7e0] sm:$0xff]  ;;  %v268_v58 = vld [vmem:[%s6219_s0 + $0x7d0] sm:$0xff] }
  0xbb   :  { %2804 = vmatprep.mubr.bf16.mxu0 %v4013_v8  ;;  %v4077_v8 = vcombine.high %v212_v3, %v216_v4  ;;  %v272_v59 = vld [vmem:[%s6219_s0 + $0x7f0] sm:$0xff] }
  0xc1   :  { %2227 = vmatmul.mubr.bf16.gmra.mrb[64].mxu1 %v4008_v13  ;;  %v4072_v13 = vcombine.low %v210_v1, %v214_v2  ;;  %v19_v1 = vld [vmem:[%s6219_s0 + $0x8] sm:$0xff] }
  0xc2   :  { %2805 = vmatmul.mubr.bf16.gmra.mrb[64].mxu0 %v4012_v14  ;;  %2234 = vmatprep.mubr.bf16.mxu1 %v4017_v15  ;;  %v4076_v14 = vcombine.low %v212_v3, %v216_v4  ;;  %v4081_v15 = vcombine.high %v218_v9, %v222_v10  ;;  %v23_v2 = vld [vmem:[%s6219_s0 + $0x28] sm:$0xff]  ;;  %v21_v3 = vld [vmem:[%s6219_s0 + $0x18] sm:$0xff] }
  0xc3   :  { %2812 = vmatprep.mubr.bf16.mxu0 %v4021_v16  ;;  %v4085_v16 = vcombine.high %v220_v11, %v224_v12  ;;  %v25_v4 = vld [vmem:[%s6219_s0 + $0x38] sm:$0xff] }
  0xc9   :  { %2235 = vmatmul.mubr.bf16.gmra.mrb[68].mxu1 %v4016_v21  ;;  %v4080_v21 = vcombine.low %v218_v9, %v222_v10  ;;  %v27_v9 = vld [vmem:[%s6219_s0 + $0x48] sm:$0xff] }
  0xca   :  { %2813 = vmatmul.mubr.bf16.gmra.mrb[68].mxu0 %v4020_v22  ;;  %2242 = vmatprep.mubr.bf16.mxu1 %v4025_v23  ;;  %v4084_v22 = vcombine.low %v220_v11, %v224_v12  ;;  %v4089_v23 = vcombine.high %v226_v17, %v230_v18  ;;  %v31_v10 = vld [vmem:[%s6219_s0 + $0x68] sm:$0xff]  ;;  %v29_v11 = vld [vmem:[%s6219_s0 + $0x58] sm:$0xff] }
  0xcb   :  { %2820 = vmatprep.mubr.bf16.mxu0 %v4029_v24  ;;  %v4093_v24 = vcombine.high %v228_v19, %v232_v20  ;;  %v33_v12 = vld [vmem:[%s6219_s0 + $0x78] sm:$0xff] }
  0xd1   :  { %2243 = vmatmul.mubr.bf16.gmra.mrb[72].mxu1 %v4024_v29  ;;  %v4088_v29 = vcombine.low %v226_v17, %v230_v18  ;;  %v35_v17 = vld [vmem:[%s6219_s0 + $0x88] sm:$0xff] }
  0xd2   :  { %2821 = vmatmul.mubr.bf16.gmra.mrb[72].mxu0 %v4028_v30  ;;  %2250 = vmatprep.mubr.bf16.mxu1 %v4033_v31  ;;  %v4092_v30 = vcombine.low %v228_v19, %v232_v20  ;;  %v4097_v31 = vcombine.high %v234_v25, %v238_v26  ;;  %v39_v18 = vld [vmem:[%s6219_s0 + $0xa8] sm:$0xff]  ;;  %v37_v19 = vld [vmem:[%s6219_s0 + $0x98] sm:$0xff] }
  0xd3   :  { %2828 = vmatprep.mubr.bf16.mxu0 %v4037_v32  ;;  %v4101_v32 = vcombine.high %v236_v27, %v240_v28  ;;  %v41_v20 = vld [vmem:[%s6219_s0 + $0xb8] sm:$0xff] }
  0xd9   :  { %2251 = vmatmul.mubr.bf16.gmra.mrb[76].mxu1 %v4032_v37  ;;  %v4096_v37 = vcombine.low %v234_v25, %v238_v26  ;;  %v43_v25 = vld [vmem:[%s6219_s0 + $0xc8] sm:$0xff] }
  0xda   :  { %2829 = vmatmul.mubr.bf16.gmra.mrb[76].mxu0 %v4036_v38  ;;  %2258 = vmatprep.mubr.bf16.mxu1 %v4041_v39  ;;  %v4100_v38 = vcombine.low %v236_v27, %v240_v28  ;;  %v4105_v39 = vcombine.high %v242_v33, %v246_v34  ;;  %v47_v26 = vld [vmem:[%s6219_s0 + $0xe8] sm:$0xff]  ;;  %v45_v27 = vld [vmem:[%s6219_s0 + $0xd8] sm:$0xff] }
  0xdb   :  { %2836 = vmatprep.mubr.bf16.mxu0 %v4045_v40  ;;  %v4109_v40 = vcombine.high %v244_v35, %v248_v36  ;;  %v49_v28 = vld [vmem:[%s6219_s0 + $0xf8] sm:$0xff] }
  0xe1   :  { %2259 = vmatmul.mubr.bf16.gmra.mrb[80].mxu1 %v4040_v45  ;;  %v4104_v45 = vcombine.low %v242_v33, %v246_v34  ;;  %v51_v33 = vld [vmem:[%s6219_s0 + $0x108] sm:$0xff] }
  0xe2   :  { %2837 = vmatmul.mubr.bf16.gmra.mrb[80].mxu0 %v4044_v46  ;;  %2266 = vmatprep.mubr.bf16.mxu1 %v4049_v47  ;;  %v4108_v46 = vcombine.low %v244_v35, %v248_v36  ;;  %v4113_v47 = vcombine.high %v250_v41, %v254_v42  ;;  %v55_v34 = vld [vmem:[%s6219_s0 + $0x128] sm:$0xff]  ;;  %v53_v35 = vld [vmem:[%s6219_s0 + $0x118] sm:$0xff] }
  0xe3   :  { %2844 = vmatprep.mubr.bf16.mxu0 %v4053_v48  ;;  %v4117_v48 = vcombine.high %v252_v43, %v256_v44  ;;  %v57_v36 = vld [vmem:[%s6219_s0 + $0x138] sm:$0xff] }
  0xe9   :  { %2267 = vmatmul.mubr.bf16.gmra.mrb[84].mxu1 %v4048_v53  ;;  %v4112_v53 = vcombine.low %v250_v41, %v254_v42  ;;  %v59_v41 = vld [vmem:[%s6219_s0 + $0x148] sm:$0xff] }
  0xea   :  { %2845 = vmatmul.mubr.bf16.gmra.mrb[84].mxu0 %v4052_v54  ;;  %2274 = vmatprep.mubr.bf16.mxu1 %v4057_v55  ;;  %v4116_v54 = vcombine.low %v252_v43, %v256_v44  ;;  %v4121_v55 = vcombine.high %v258_v49, %v262_v50  ;;  %v63_v42 = vld [vmem:[%s6219_s0 + $0x168] sm:$0xff]  ;;  %v61_v43 = vld [vmem:[%s6219_s0 + $0x158] sm:$0xff] }
  0xeb   :  { %2852 = vmatprep.mubr.bf16.mxu0 %v4061_v56  ;;  %v4125_v56 = vcombine.high %v260_v51, %v264_v52  ;;  %v65_v44 = vld [vmem:[%s6219_s0 + $0x178] sm:$0xff] }
  0xf1   :  { %2275 = vmatmul.mubr.bf16.gmra.mrb[88].mxu1 %v4056_v60  ;;  %v4120_v60 = vcombine.low %v258_v49, %v262_v50  ;;  %v67_v49 = vld [vmem:[%s6219_s0 + $0x188] sm:$0xff] }
  0xf2   :  { %2853 = vmatmul.mubr.bf16.gmra.mrb[88].mxu0 %v4060_v61  ;;  %2282 = vmatprep.mubr.bf16.mxu1 %v4065_v62  ;;  %v4124_v61 = vcombine.low %v260_v51, %v264_v52  ;;  %v4129_v62 = vcombine.high %v266_v57, %v270_v0  ;;  %v71_v50 = vld [vmem:[%s6219_s0 + $0x1a8] sm:$0xff]  ;;  %v69_v51 = vld [vmem:[%s6219_s0 + $0x198] sm:$0xff] }
  0xf3   :  { %2860 = vmatprep.mubr.bf16.mxu0 %v4069_v63  ;;  %v4133_v63 = vcombine.high %v268_v58, %v272_v59  ;;  %v73_v52 = vld [vmem:[%s6219_s0 + $0x1b8] sm:$0xff] }
  0xf9   :  { %2283 = vmatmul.mubr.bf16.gmra.mrb[92].mxu1 %v4064_v5  ;;  %v4128_v5 = vcombine.low %v266_v57, %v270_v0  ;;  %v75_v57 = vld [vmem:[%s6219_s0 + $0x1c8] sm:$0xff] }
  0xfa   :  { %2861 = vmatmul.mubr.bf16.gmra.mrb[92].mxu0 %v4068_v6  ;;  %2290 = vmatprep.mubr.bf16.mxu1 %v4073_v7  ;;  %v4132_v6 = vcombine.low %v268_v58, %v272_v59  ;;  %v3883_v7 = vcombine.high %v19_v1, %v23_v2  ;;  %v79_v0 = vld [vmem:[%s6219_s0 + $0x1e8] sm:$0xff]  ;;  %v77_v58 = vld [vmem:[%s6219_s0 + $0x1d8] sm:$0xff] }
  0xfb   :  { %2868 = vmatprep.mubr.bf16.mxu0 %v4077_v8  ;;  %v3887_v8 = vcombine.high %v21_v3, %v25_v4  ;;  %v81_v59 = vld [vmem:[%s6219_s0 + $0x1f8] sm:$0xff] }
 0x101   :  { %2291 = vmatmul.mubr.bf16.gmra.mrb[96].mxu1 %v4072_v13  ;;  %v3882_v13 = vcombine.low %v19_v1, %v23_v2  ;;  %v83_v1 = vld [vmem:[%s6219_s0 + $0x208] sm:$0xff] }
 0x102   :  { %2869 = vmatmul.mubr.bf16.gmra.mrb[96].mxu0 %v4076_v14  ;;  %2298 = vmatprep.mubr.bf16.mxu1 %v4081_v15  ;;  %v3886_v14 = vcombine.low %v21_v3, %v25_v4  ;;  %v3891_v15 = vcombine.high %v27_v9, %v31_v10  ;;  %v87_v2 = vld [vmem:[%s6219_s0 + $0x228] sm:$0xff]  ;;  %v85_v3 = vld [vmem:[%s6219_s0 + $0x218] sm:$0xff] }
 0x103   :  { %2876 = vmatprep.mubr.bf16.mxu0 %v4085_v16  ;;  %v3895_v16 = vcombine.high %v29_v11, %v33_v12  ;;  %v89_v4 = vld [vmem:[%s6219_s0 + $0x238] sm:$0xff] }
 0x109   :  { %2299 = vmatmul.mubr.bf16.gmra.mrb[100].mxu1 %v4080_v21  ;;  %v3890_v21 = vcombine.low %v27_v9, %v31_v10  ;;  %v91_v9 = vld [vmem:[%s6219_s0 + $0x248] sm:$0xff] }
 0x10a   :  { %2877 = vmatmul.mubr.bf16.gmra.mrb[100].mxu0 %v4084_v22  ;;  %2306 = vmatprep.mubr.bf16.mxu1 %v4089_v23  ;;  %v3894_v22 = vcombine.low %v29_v11, %v33_v12  ;;  %v3899_v23 = vcombine.high %v35_v17, %v39_v18  ;;  %v95_v10 = vld [vmem:[%s6219_s0 + $0x268] sm:$0xff]  ;;  %v93_v11 = vld [vmem:[%s6219_s0 + $0x258] sm:$0xff] }
 0x10b   :  { %2884 = vmatprep.mubr.bf16.mxu0 %v4093_v24  ;;  %v3903_v24 = vcombine.high %v37_v19, %v41_v20  ;;  %v97_v12 = vld [vmem:[%s6219_s0 + $0x278] sm:$0xff] }
 0x111   :  { %2307 = vmatmul.mubr.bf16.gmra.mrb[104].mxu1 %v4088_v29  ;;  %v3898_v29 = vcombine.low %v35_v17, %v39_v18  ;;  %v99_v17 = vld [vmem:[%s6219_s0 + $0x288] sm:$0xff] }
 0x112   :  { %2885 = vmatmul.mubr.bf16.gmra.mrb[104].mxu0 %v4092_v30  ;;  %2314 = vmatprep.mubr.bf16.mxu1 %v4097_v31  ;;  %v3902_v30 = vcombine.low %v37_v19, %v41_v20  ;;  %v3907_v31 = vcombine.high %v43_v25, %v47_v26  ;;  %v103_v18 = vld [vmem:[%s6219_s0 + $0x2a8] sm:$0xff]  ;;  %v101_v19 = vld [vmem:[%s6219_s0 + $0x298] sm:$0xff] }
 0x113   :  { %2892 = vmatprep.mubr.bf16.mxu0 %v4101_v32  ;;  %v3911_v32 = vcombine.high %v45_v27, %v49_v28  ;;  %v105_v20 = vld [vmem:[%s6219_s0 + $0x2b8] sm:$0xff] }
 0x119   :  { %2315 = vmatmul.mubr.bf16.gmra.mrb[108].mxu1 %v4096_v37  ;;  %v3906_v37 = vcombine.low %v43_v25, %v47_v26  ;;  %v107_v25 = vld [vmem:[%s6219_s0 + $0x2c8] sm:$0xff] }
 0x11a   :  { %2893 = vmatmul.mubr.bf16.gmra.mrb[108].mxu0 %v4100_v38  ;;  %2322 = vmatprep.mubr.bf16.mxu1 %v4105_v39  ;;  %v3910_v38 = vcombine.low %v45_v27, %v49_v28  ;;  %v3915_v39 = vcombine.high %v51_v33, %v55_v34  ;;  %v111_v26 = vld [vmem:[%s6219_s0 + $0x2e8] sm:$0xff]  ;;  %v109_v27 = vld [vmem:[%s6219_s0 + $0x2d8] sm:$0xff] }
 0x11b   :  { %2900 = vmatprep.mubr.bf16.mxu0 %v4109_v40  ;;  %v3919_v40 = vcombine.high %v53_v35, %v57_v36  ;;  %v113_v28 = vld [vmem:[%s6219_s0 + $0x2f8] sm:$0xff] }
 0x121   :  { %2323 = vmatmul.mubr.bf16.gmra.mrb[112].mxu1 %v4104_v45  ;;  %v3914_v45 = vcombine.low %v51_v33, %v55_v34  ;;  %v115_v33 = vld [vmem:[%s6219_s0 + $0x308] sm:$0xff] }
 0x122   :  { %2901 = vmatmul.mubr.bf16.gmra.mrb[112].mxu0 %v4108_v46  ;;  %2330 = vmatprep.mubr.bf16.mxu1 %v4113_v47  ;;  %v3918_v46 = vcombine.low %v53_v35, %v57_v36  ;;  %v3923_v47 = vcombine.high %v59_v41, %v63_v42  ;;  %v119_v34 = vld [vmem:[%s6219_s0 + $0x328] sm:$0xff]  ;;  %v117_v35 = vld [vmem:[%s6219_s0 + $0x318] sm:$0xff] }
 0x123   :  { %2908 = vmatprep.mubr.bf16.mxu0 %v4117_v48  ;;  %v3927_v48 = vcombine.high %v61_v43, %v65_v44  ;;  %v121_v36 = vld [vmem:[%s6219_s0 + $0x338] sm:$0xff] }
 0x129   :  { %2331 = vmatmul.mubr.bf16.gmra.mrb[116].mxu1 %v4112_v53  ;;  %v3922_v53 = vcombine.low %v59_v41, %v63_v42  ;;  %v123_v41 = vld [vmem:[%s6219_s0 + $0x348] sm:$0xff] }
 0x12a   :  { %2909 = vmatmul.mubr.bf16.gmra.mrb[116].mxu0 %v4116_v54  ;;  %2338 = vmatprep.mubr.bf16.mxu1 %v4121_v55  ;;  %v3926_v54 = vcombine.low %v61_v43, %v65_v44  ;;  %v3931_v55 = vcombine.high %v67_v49, %v71_v50  ;;  %v127_v42 = vld [vmem:[%s6219_s0 + $0x368] sm:$0xff]  ;;  %v125_v43 = vld [vmem:[%s6219_s0 + $0x358] sm:$0xff] }
 0x12b   :  { %2916 = vmatprep.mubr.bf16.mxu0 %v4125_v56  ;;  %v3935_v56 = vcombine.high %v69_v51, %v73_v52  ;;  %v129_v44 = vld [vmem:[%s6219_s0 + $0x378] sm:$0xff] }
 0x131   :  { %2339 = vmatmul.mubr.bf16.gmra.mrb[120].mxu1 %v4120_v60  ;;  %v3930_v60 = vcombine.low %v67_v49, %v71_v50  ;;  %v131_v49 = vld [vmem:[%s6219_s0 + $0x388] sm:$0xff] }
 0x132   :  { %2917 = vmatmul.mubr.bf16.gmra.mrb[120].mxu0 %v4124_v61  ;;  %2346 = vmatprep.mubr.bf16.mxu1 %v4129_v62  ;;  %v3934_v61 = vcombine.low %v69_v51, %v73_v52  ;;  %v3939_v62 = vcombine.high %v75_v57, %v79_v0  ;;  %v135_v50 = vld [vmem:[%s6219_s0 + $0x3a8] sm:$0xff]  ;;  %v133_v51 = vld [vmem:[%s6219_s0 + $0x398] sm:$0xff] }
 0x133   :  { %2924 = vmatprep.mubr.bf16.mxu0 %v4133_v63  ;;  %v3943_v63 = vcombine.high %v77_v58, %v81_v59  ;;  %v137_v52 = vld [vmem:[%s6219_s0 + $0x3b8] sm:$0xff] }
 0x139   :  { %2347 = vmatmul.mubr.bf16.gmra.mrb[124].mxu1 %v4128_v5  ;;  %v3938_v5 = vcombine.low %v75_v57, %v79_v0  ;;  %v139_v57 = vld [vmem:[%s6219_s0 + $0x3c8] sm:$0xff] }
 0x13a   :  { %2925 = vmatmul.mubr.bf16.gmra.mrb[124].mxu0 %v4132_v6  ;;  %2387 = vmatprep.mubr.bf16.mxu1 %v3883_v7  ;;  %v3942_v6 = vcombine.low %v77_v58, %v81_v59  ;;  %v3947_v7 = vcombine.high %v83_v1, %v87_v2  ;;  %v143_v0 = vld [vmem:[%s6219_s0 + $0x3e8] sm:$0xff]  ;;  %v141_v58 = vld [vmem:[%s6219_s0 + $0x3d8] sm:$0xff] }
 0x13b   :  { %2965 = vmatprep.mubr.bf16.mxu0 %v3887_v8  ;;  %v3951_v8 = vcombine.high %v85_v3, %v89_v4  ;;  %v145_v59 = vld [vmem:[%s6219_s0 + $0x3f8] sm:$0xff] }
 0x141   :  { %2388 = vmatmul.mubr.bf16.vlgmr.msra.gmra.mrb[0].mxu1 %v3882_v13  ;;  %v3946_v13 = vcombine.low %v83_v1, %v87_v2  ;;  %v147_v1 = vld [vmem:[%s6219_s0 + $0x408] sm:$0xff] }
 0x142   :  { %2966 = vmatmul.mubr.bf16.vlgmr.msra.gmra.mrb[0].mxu0 %v3886_v14  ;;  %2395 = vmatprep.mubr.bf16.mxu1 %v3891_v15  ;;  %v3950_v14 = vcombine.low %v85_v3, %v89_v4  ;;  %v3955_v15 = vcombine.high %v91_v9, %v95_v10  ;;  %v151_v2 = vld [vmem:[%s6219_s0 + $0x428] sm:$0xff]  ;;  %v149_v3 = vld [vmem:[%s6219_s0 + $0x418] sm:$0xff] }
 0x143   :  { %2973 = vmatprep.mubr.bf16.mxu0 %v3895_v16  ;;  %v3959_v16 = vcombine.high %v93_v11, %v97_v12  ;;  %v153_v4 = vld [vmem:[%s6219_s0 + $0x438] sm:$0xff] }
 0x149   :  { %2396 = vmatmul.mubr.bf16.gmra.mrb[4].mxu1 %v3890_v21  ;;  %v3954_v21 = vcombine.low %v91_v9, %v95_v10  ;;  %v155_v9 = vld [vmem:[%s6219_s0 + $0x448] sm:$0xff] }
 0x14a   :  { %2974 = vmatmul.mubr.bf16.gmra.mrb[4].mxu0 %v3894_v22  ;;  %2403 = vmatprep.mubr.bf16.mxu1 %v3899_v23  ;;  %v3958_v22 = vcombine.low %v93_v11, %v97_v12  ;;  %v3963_v23 = vcombine.high %v99_v17, %v103_v18  ;;  %v159_v10 = vld [vmem:[%s6219_s0 + $0x468] sm:$0xff]  ;;  %v157_v11 = vld [vmem:[%s6219_s0 + $0x458] sm:$0xff] }
 0x14b   :  { %2981 = vmatprep.mubr.bf16.mxu0 %v3903_v24  ;;  %v3967_v24 = vcombine.high %v101_v19, %v105_v20  ;;  %v161_v12 = vld [vmem:[%s6219_s0 + $0x478] sm:$0xff] }
 0x151   :  { %2404 = vmatmul.mubr.bf16.gmra.mrb[8].mxu1 %v3898_v29  ;;  %v3962_v29 = vcombine.low %v99_v17, %v103_v18  ;;  %v163_v17 = vld [vmem:[%s6219_s0 + $0x488] sm:$0xff] }
 0x152   :  { %2982 = vmatmul.mubr.bf16.gmra.mrb[8].mxu0 %v3902_v30  ;;  %2411 = vmatprep.mubr.bf16.mxu1 %v3907_v31  ;;  %v3966_v30 = vcombine.low %v101_v19, %v105_v20  ;;  %v3971_v31 = vcombine.high %v107_v25, %v111_v26  ;;  %v167_v18 = vld [vmem:[%s6219_s0 + $0x4a8] sm:$0xff]  ;;  %v165_v19 = vld [vmem:[%s6219_s0 + $0x498] sm:$0xff] }
 0x153   :  { %2989 = vmatprep.mubr.bf16.mxu0 %v3911_v32  ;;  %v3975_v32 = vcombine.high %v109_v27, %v113_v28  ;;  %v169_v20 = vld [vmem:[%s6219_s0 + $0x4b8] sm:$0xff] }
 0x159   :  { %2412 = vmatmul.mubr.bf16.gmra.mrb[12].mxu1 %v3906_v37  ;;  %v3970_v37 = vcombine.low %v107_v25, %v111_v26  ;;  %v171_v25 = vld [vmem:[%s6219_s0 + $0x4c8] sm:$0xff] }
 0x15a   :  { %2990 = vmatmul.mubr.bf16.gmra.mrb[12].mxu0 %v3910_v38  ;;  %2419 = vmatprep.mubr.bf16.mxu1 %v3915_v39  ;;  %v3974_v38 = vcombine.low %v109_v27, %v113_v28  ;;  %v3979_v39 = vcombine.high %v115_v33, %v119_v34  ;;  %v175_v26 = vld [vmem:[%s6219_s0 + $0x4e8] sm:$0xff]  ;;  %v173_v27 = vld [vmem:[%s6219_s0 + $0x4d8] sm:$0xff] }
 0x15b   :  { %2997 = vmatprep.mubr.bf16.mxu0 %v3919_v40  ;;  %v3983_v40 = vcombine.high %v117_v35, %v121_v36  ;;  %v177_v28 = vld [vmem:[%s6219_s0 + $0x4f8] sm:$0xff] }
 0x161   :  { %2420 = vmatmul.mubr.bf16.gmra.mrb[16].mxu1 %v3914_v45  ;;  %v3978_v45 = vcombine.low %v115_v33, %v119_v34  ;;  %v179_v33 = vld [vmem:[%s6219_s0 + $0x508] sm:$0xff] }
 0x162   :  { %2998 = vmatmul.mubr.bf16.gmra.mrb[16].mxu0 %v3918_v46  ;;  %2427 = vmatprep.mubr.bf16.mxu1 %v3923_v47  ;;  %v3982_v46 = vcombine.low %v117_v35, %v121_v36  ;;  %v3987_v47 = vcombine.high %v123_v41, %v127_v42  ;;  %v183_v34 = vld [vmem:[%s6219_s0 + $0x528] sm:$0xff]  ;;  %v181_v35 = vld [vmem:[%s6219_s0 + $0x518] sm:$0xff] }
 0x163   :  { %3005 = vmatprep.mubr.bf16.mxu0 %v3927_v48  ;;  %v3991_v48 = vcombine.high %v125_v43, %v129_v44  ;;  %v185_v36 = vld [vmem:[%s6219_s0 + $0x538] sm:$0xff] }
 0x169   :  { %2428 = vmatmul.mubr.bf16.gmra.mrb[20].mxu1 %v3922_v53  ;;  %v3986_v53 = vcombine.low %v123_v41, %v127_v42  ;;  %v187_v41 = vld [vmem:[%s6219_s0 + $0x548] sm:$0xff] }
 0x16a   :  { %3006 = vmatmul.mubr.bf16.gmra.mrb[20].mxu0 %v3926_v54  ;;  %2435 = vmatprep.mubr.bf16.mxu1 %v3931_v55  ;;  %v3990_v54 = vcombine.low %v125_v43, %v129_v44  ;;  %v3995_v55 = vcombine.high %v131_v49, %v135_v50  ;;  %v191_v42 = vld [vmem:[%s6219_s0 + $0x568] sm:$0xff]  ;;  %v189_v43 = vld [vmem:[%s6219_s0 + $0x558] sm:$0xff] }
 0x16b   :  { %3013 = vmatprep.mubr.bf16.mxu0 %v3935_v56  ;;  %v3999_v56 = vcombine.high %v133_v51, %v137_v52  ;;  %v193_v44 = vld [vmem:[%s6219_s0 + $0x578] sm:$0xff] }
 0x171   :  { %2436 = vmatmul.mubr.bf16.gmra.mrb[24].mxu1 %v3930_v60  ;;  %v3994_v60 = vcombine.low %v131_v49, %v135_v50  ;;  %v195_v49 = vld [vmem:[%s6219_s0 + $0x588] sm:$0xff] }
 0x172   :  { %3014 = vmatmul.mubr.bf16.gmra.mrb[24].mxu0 %v3934_v61  ;;  %2443 = vmatprep.mubr.bf16.mxu1 %v3939_v62  ;;  %v3998_v61 = vcombine.low %v133_v51, %v137_v52  ;;  %v4003_v62 = vcombine.high %v139_v57, %v143_v0  ;;  %v199_v50 = vld [vmem:[%s6219_s0 + $0x5a8] sm:$0xff]  ;;  %v197_v51 = vld [vmem:[%s6219_s0 + $0x598] sm:$0xff] }
 0x173   :  { %3021 = vmatprep.mubr.bf16.mxu0 %v3943_v63  ;;  %v4007_v63 = vcombine.high %v141_v58, %v145_v59  ;;  %v201_v52 = vld [vmem:[%s6219_s0 + $0x5b8] sm:$0xff] }
 0x179   :  { %2444 = vmatmul.mubr.bf16.gmra.mrb[28].mxu1 %v3938_v5  ;;  %v4002_v5 = vcombine.low %v139_v57, %v143_v0  ;;  %v203_v57 = vld [vmem:[%s6219_s0 + $0x5c8] sm:$0xff] }
 0x17a   :  { %3022 = vmatmul.mubr.bf16.gmra.mrb[28].mxu0 %v3942_v6  ;;  %2451 = vmatprep.mubr.bf16.mxu1 %v3947_v7  ;;  %v4006_v6 = vcombine.low %v141_v58, %v145_v59  ;;  %v4011_v7 = vcombine.high %v147_v1, %v151_v2  ;;  %v207_v0 = vld [vmem:[%s6219_s0 + $0x5e8] sm:$0xff]  ;;  %v205_v58 = vld [vmem:[%s6219_s0 + $0x5d8] sm:$0xff] }
 0x17b   :  { %3029 = vmatprep.mubr.bf16.mxu0 %v3951_v8  ;;  %v4015_v8 = vcombine.high %v149_v3, %v153_v4  ;;  %v209_v59 = vld [vmem:[%s6219_s0 + $0x5f8] sm:$0xff] }
 0x181   :  { %2452 = vmatmul.mubr.bf16.gmra.mrb[32].mxu1 %v3946_v13  ;;  %v4010_v13 = vcombine.low %v147_v1, %v151_v2  ;;  %v211_v1 = vld [vmem:[%s6219_s0 + $0x608] sm:$0xff] }
 0x182   :  { %3030 = vmatmul.mubr.bf16.gmra.mrb[32].mxu0 %v3950_v14  ;;  %2459 = vmatprep.mubr.bf16.mxu1 %v3955_v15  ;;  %v4014_v14 = vcombine.low %v149_v3, %v153_v4  ;;  %v4019_v15 = vcombine.high %v155_v9, %v159_v10  ;;  %v215_v2 = vld [vmem:[%s6219_s0 + $0x628] sm:$0xff]  ;;  %v213_v3 = vld [vmem:[%s6219_s0 + $0x618] sm:$0xff] }
 0x183   :  { %3037 = vmatprep.mubr.bf16.mxu0 %v3959_v16  ;;  %v4023_v16 = vcombine.high %v157_v11, %v161_v12  ;;  %v217_v4 = vld [vmem:[%s6219_s0 + $0x638] sm:$0xff] }
 0x189   :  { %2460 = vmatmul.mubr.bf16.gmra.mrb[36].mxu1 %v3954_v21  ;;  %v4018_v21 = vcombine.low %v155_v9, %v159_v10  ;;  %v219_v9 = vld [vmem:[%s6219_s0 + $0x648] sm:$0xff] }
 0x18a   :  { %3038 = vmatmul.mubr.bf16.gmra.mrb[36].mxu0 %v3958_v22  ;;  %2467 = vmatprep.mubr.bf16.mxu1 %v3963_v23  ;;  %v4022_v22 = vcombine.low %v157_v11, %v161_v12  ;;  %v4027_v23 = vcombine.high %v163_v17, %v167_v18  ;;  %v223_v10 = vld [vmem:[%s6219_s0 + $0x668] sm:$0xff]  ;;  %v221_v11 = vld [vmem:[%s6219_s0 + $0x658] sm:$0xff] }
 0x18b   :  { %3045 = vmatprep.mubr.bf16.mxu0 %v3967_v24  ;;  %v4031_v24 = vcombine.high %v165_v19, %v169_v20  ;;  %v225_v12 = vld [vmem:[%s6219_s0 + $0x678] sm:$0xff] }
 0x191   :  { %2468 = vmatmul.mubr.bf16.gmra.mrb[40].mxu1 %v3962_v29  ;;  %v4026_v29 = vcombine.low %v163_v17, %v167_v18  ;;  %v227_v17 = vld [vmem:[%s6219_s0 + $0x688] sm:$0xff] }
 0x192   :  { %3046 = vmatmul.mubr.bf16.gmra.mrb[40].mxu0 %v3966_v30  ;;  %2475 = vmatprep.mubr.bf16.mxu1 %v3971_v31  ;;  %v4030_v30 = vcombine.low %v165_v19, %v169_v20  ;;  %v4035_v31 = vcombine.high %v171_v25, %v175_v26  ;;  %v231_v18 = vld [vmem:[%s6219_s0 + $0x6a8] sm:$0xff]  ;;  %v229_v19 = vld [vmem:[%s6219_s0 + $0x698] sm:$0xff] }
 0x193   :  { %3053 = vmatprep.mubr.bf16.mxu0 %v3975_v32  ;;  %v4039_v32 = vcombine.high %v173_v27, %v177_v28  ;;  %v233_v20 = vld [vmem:[%s6219_s0 + $0x6b8] sm:$0xff] }
 0x199   :  { %2476 = vmatmul.mubr.bf16.gmra.mrb[44].mxu1 %v3970_v37  ;;  %v4034_v37 = vcombine.low %v171_v25, %v175_v26  ;;  %v235_v25 = vld [vmem:[%s6219_s0 + $0x6c8] sm:$0xff] }
 0x19a   :  { %3054 = vmatmul.mubr.bf16.gmra.mrb[44].mxu0 %v3974_v38  ;;  %2483 = vmatprep.mubr.bf16.mxu1 %v3979_v39  ;;  %v4038_v38 = vcombine.low %v173_v27, %v177_v28  ;;  %v4043_v39 = vcombine.high %v179_v33, %v183_v34  ;;  %v239_v26 = vld [vmem:[%s6219_s0 + $0x6e8] sm:$0xff]  ;;  %v237_v27 = vld [vmem:[%s6219_s0 + $0x6d8] sm:$0xff] }
 0x19b   :  { %3061 = vmatprep.mubr.bf16.mxu0 %v3983_v40  ;;  %v4047_v40 = vcombine.high %v181_v35, %v185_v36  ;;  %v241_v28 = vld [vmem:[%s6219_s0 + $0x6f8] sm:$0xff] }
 0x1a1   :  { %2484 = vmatmul.mubr.bf16.gmra.mrb[48].mxu1 %v3978_v45  ;;  %v4042_v45 = vcombine.low %v179_v33, %v183_v34  ;;  %v243_v33 = vld [vmem:[%s6219_s0 + $0x708] sm:$0xff] }
 0x1a2   :  { %3062 = vmatmul.mubr.bf16.gmra.mrb[48].mxu0 %v3982_v46  ;;  %2491 = vmatprep.mubr.bf16.mxu1 %v3987_v47  ;;  %v4046_v46 = vcombine.low %v181_v35, %v185_v36  ;;  %v4051_v47 = vcombine.high %v187_v41, %v191_v42  ;;  %v247_v34 = vld [vmem:[%s6219_s0 + $0x728] sm:$0xff]  ;;  %v245_v36 = vld [vmem:[%s6219_s0 + $0x718] sm:$0xff] }
 0x1a3   :  { %3069 = vmatprep.mubr.bf16.mxu0 %v3991_v48  ;;  %v4055_v48 = vcombine.high %v189_v43, %v193_v44 }
 0x1a9   :  { %2492 = vmatmul.mubr.bf16.gmra.mrb[52].mxu1 %v3986_v53  ;;  %v4050_v53 = vcombine.low %v187_v41, %v191_v42  ;;  %v4098_v41 = vcombine.low %v235_v25, %v239_v26 }
 0x1aa   :  { %3070 = vmatmul.mubr.bf16.gmra.mrb[52].mxu0 %v3990_v54  ;;  %2499 = vmatprep.mubr.bf16.mxu1 %v3995_v55  ;;  %v4054_v54 = vcombine.low %v189_v43, %v193_v44  ;;  %v4059_v55 = vcombine.high %v195_v49, %v199_v50 }
 0x1ab   :  { %3077 = vmatprep.mubr.bf16.mxu0 %v3999_v56  ;;  %v4063_v56 = vcombine.high %v197_v51, %v201_v52 }
 0x1b1   :  { %2500 = vmatmul.mubr.bf16.gmra.mrb[56].mxu1 %v3994_v60  ;;  %v4058_v60 = vcombine.low %v195_v49, %v199_v50 }
 0x1b2   :  { %3078 = vmatmul.mubr.bf16.gmra.mrb[56].mxu0 %v3998_v61  ;;  %2507 = vmatprep.mubr.bf16.mxu1 %v4003_v62  ;;  %v4062_v61 = vcombine.low %v197_v51, %v201_v52  ;;  %v4067_v62 = vcombine.high %v203_v57, %v207_v0 }
 0x1b3   :  { %3085 = vmatprep.mubr.bf16.mxu0 %v4007_v63  ;;  %v4071_v63 = vcombine.high %v205_v58, %v209_v59 }
 0x1b9   :  { %2508 = vmatmul.mubr.bf16.gmra.mrb[60].mxu1 %v4002_v5  ;;  %v4066_v5 = vcombine.low %v203_v57, %v207_v0  ;;  %v255_v57 = vld [vmem:[%s6219_s0 + $0x768] sm:$0xff] }
 0x1ba   :  { %3086 = vmatmul.mubr.bf16.gmra.mrb[60].mxu0 %v4006_v6  ;;  %2515 = vmatprep.mubr.bf16.mxu1 %v4011_v7  ;;  %v4070_v6 = vcombine.low %v205_v58, %v209_v59  ;;  %v4075_v7 = vcombine.high %v211_v1, %v215_v2 }
 0x1bb   :  { %3093 = vmatprep.mubr.bf16.mxu0 %v4015_v8  ;;  %v4079_v8 = vcombine.high %v213_v3, %v217_v4 }
 0x1c1   :  { %2516 = vmatmul.mubr.bf16.gmra.mrb[64].mxu1 %v4010_v13  ;;  %v4074_v13 = vcombine.low %v211_v1, %v215_v2  ;;  %v4106_v1 = vcombine.low %v243_v33, %v247_v34 }
 0x1c2   :  { %3094 = vmatmul.mubr.bf16.gmra.mrb[64].mxu0 %v4014_v14  ;;  %2523 = vmatprep.mubr.bf16.mxu1 %v4019_v15  ;;  %v4078_v14 = vcombine.low %v213_v3, %v217_v4  ;;  %v4083_v15 = vcombine.high %v219_v9, %v223_v10 }
 0x1c3   :  { %3101 = vmatprep.mubr.bf16.mxu0 %v4023_v16  ;;  %v4087_v16 = vcombine.high %v221_v11, %v225_v12 }
 0x1c9   :  { %2524 = vmatmul.mubr.bf16.gmra.mrb[68].mxu1 %v4018_v21  ;;  %v4082_v21 = vcombine.low %v219_v9, %v223_v10 }
 0x1ca   :  { %3102 = vmatmul.mubr.bf16.gmra.mrb[68].mxu0 %v4022_v22  ;;  %2531 = vmatprep.mubr.bf16.mxu1 %v4027_v23  ;;  %v4086_v22 = vcombine.low %v221_v11, %v225_v12  ;;  %v4091_v23 = vcombine.high %v227_v17, %v231_v18 }
 0x1cb   :  { %3109 = vmatprep.mubr.bf16.mxu0 %v4031_v24  ;;  %v4095_v24 = vcombine.high %v229_v19, %v233_v20 }
 0x1d1   :  { %2532 = vmatmul.mubr.bf16.gmra.mrb[72].mxu1 %v4026_v29  ;;  %v4090_v29 = vcombine.low %v227_v17, %v231_v18 }
 0x1d2   :  { %3110 = vmatmul.mubr.bf16.gmra.mrb[72].mxu0 %v4030_v30  ;;  %2539 = vmatprep.mubr.bf16.mxu1 %v4035_v31  ;;  %v4094_v30 = vcombine.low %v229_v19, %v233_v20  ;;  %v4099_v31 = vcombine.high %v235_v25, %v239_v26  ;;  %v259_v19 = vld [vmem:[%s6219_s0 + $0x788] sm:$0xff]  ;;  %v265_v25 = vld [vmem:[%s6219_s0 + $0x7b8] sm:$0xff] }
 0x1d3   :  { %3117 = vmatprep.mubr.bf16.mxu0 %v4039_v32  ;;  %v4103_v32 = vcombine.high %v237_v27, %v241_v28  ;;  %v263_v20 = vld [vmem:[%s6219_s0 + $0x7a8] sm:$0xff] }
 0x1d9   :  { %2540 = vmatmul.mubr.bf16.gmra.mrb[76].mxu1 %v4034_v37  ;;  %v249_v37 = vld [vmem:[%s6219_s0 + $0x738] sm:$0xff] }
 0x1da   :  { %3118 = vmatmul.mubr.bf16.gmra.mrb[76].mxu0 %v4038_v38  ;;  %2547 = vmatprep.mubr.bf16.mxu1 %v4043_v39  ;;  %v5941_v39 = vld [vmem:[%s6220_s2] ss:$0 sm:$0xff]  ;;  %v4111_v50 = vcombine.high %v245_v36, %v249_v37  ;;  %v4110_v2 = vcombine.low %v245_v36, %v249_v37 }
 0x1db   :  { %3125 = vmatprep.mubr.bf16.mxu0 %v4047_v40 }
 0x1e1   :  { %2548 = vmatmul.mubr.bf16.gmra.mrb[80].mxu1 %v4042_v45  ;;  %v4102_v45 = vcombine.low %v237_v27, %v241_v28 }
 0x1e2   :  { %3126 = vmatmul.mubr.bf16.gmra.mrb[80].mxu0 %v4046_v46  ;;  %2555 = vmatprep.mubr.bf16.mxu1 %v4051_v47  ;;  %v4107_v46 = vcombine.high %v243_v33, %v247_v34  ;;  %v5946_v47 = vld [vmem:[%s6221_s3] ss:$0 sm:$0xff]  ;;  %v4123_v34 = vcombine.high %v259_v19, %v263_v20 }
 0x1e3   :  { %3133 = vmatprep.mubr.bf16.mxu0 %v4055_v48 }
 0x1e9   :  { %2556 = vmatmul.mubr.bf16.gmra.mrb[84].mxu1 %v4050_v53 }
 0x1ea   :  { %3134 = vmatmul.mubr.bf16.gmra.mrb[84].mxu0 %v4054_v54  ;;  %2563 = vmatprep.mubr.bf16.mxu1 %v4059_v55 }
 0x1eb   :  { %3141 = vmatprep.mubr.bf16.mxu0 %v4063_v56  ;;  %v251_v56 = vld [vmem:[%s6219_s0 + $0x748] sm:$0xff] }
 0x1ec   :  { %v4114_v28 = vcombine.low %v251_v56, %v255_v57 }
 0x1f1   :  { %2564 = vmatmul.mubr.bf16.gmra.mrb[88].mxu1 %v4058_v60  ;;  %v253_v60 = vld [vmem:[%s6219_s0 + $0x758] sm:$0xff] }
 0x1f2   :  { %3142 = vmatmul.mubr.bf16.gmra.mrb[88].mxu0 %v4062_v61  ;;  %2571 = vmatprep.mubr.bf16.mxu1 %v4067_v62  ;;  %v257_v61 = vld [vmem:[%s6219_s0 + $0x778] sm:$0xff] }
 0x1f3   :  { %3149 = vmatprep.mubr.bf16.mxu0 %v4071_v63  ;;  %v4119_v10 = vcombine.high %v253_v60, %v257_v61 }
 0x1f9   :  { %2572 = vmatmul.mubr.bf16.gmra.mrb[92].mxu1 %v4066_v5 }
 0x1fa   :  { %3150 = vmatmul.mubr.bf16.gmra.mrb[92].mxu0 %v4070_v6  ;;  %2579 = vmatprep.mubr.bf16.mxu1 %v4075_v7  ;;  %v4115_v7 = vcombine.high %v251_v56, %v255_v57  ;;  %v4122_v57 = vcombine.low %v259_v19, %v263_v20 }
 0x1fb   :  { %3157 = vmatprep.mubr.bf16.mxu0 %v4079_v8 }
 0x201   :  { %2580 = vmatmul.mubr.bf16.gmra.mrb[96].mxu1 %v4074_v13 }
 0x202   :  { %3158 = vmatmul.mubr.bf16.gmra.mrb[96].mxu0 %v4078_v14  ;;  %2587 = vmatprep.mubr.bf16.mxu1 %v4083_v15 }
 0x203   :  { %3165 = vmatprep.mubr.bf16.mxu0 %v4087_v16 }
 0x209   :  { %2588 = vmatmul.mubr.bf16.gmra.mrb[100].mxu1 %v4082_v21 }
 0x20a   :  { %3166 = vmatmul.mubr.bf16.gmra.mrb[100].mxu0 %v4086_v22  ;;  %2595 = vmatprep.mubr.bf16.mxu1 %v4091_v23 }
 0x20b   :  { %3173 = vmatprep.mubr.bf16.mxu0 %v4095_v24  ;;  %v261_v24 = vld [vmem:[%s6219_s0 + $0x798] sm:$0xff] }
 0x20c   :  { %v4127_v37 = vcombine.high %v261_v24, %v265_v25 }
 0x211   :  { %2596 = vmatmul.mubr.bf16.gmra.mrb[104].mxu1 %v4090_v29  ;;  %v4118_v29 = vcombine.low %v253_v60, %v257_v61 }
 0x212   :  { %3174 = vmatmul.mubr.bf16.gmra.mrb[104].mxu0 %v4094_v30  ;;  %2603 = vmatprep.mubr.bf16.mxu1 %v4099_v31 }
 0x213   :  { %3181 = vmatprep.mubr.bf16.mxu0 %v4103_v32 }
 0x214   :  { %v2389_v35 = vpop.f32.mrb[0].mxu1 }
 0x215   :  { %v2967_v38 = vpop.f32.mrb[0].mxu0  ;;  %v2391_v40 = vpop.f32.mrb[1].mxu1 }
 0x216   :  { %v4521_v42 = vadd.f32 %v2967_v38, %v2389_v35  ;;  %v2969_v43 = vpop.f32.mrb[1].mxu0  ;;  %v2392_v44 = vpop.f32.mrb[2].mxu1 }
 0x217   :  { %v2970_v48 = vpop.f32.mrb[2].mxu0  ;;  %v2394_v49 = vpop.f32.mrb[3].mxu1 }
 0x218   :  { %v3229_v51 = vmul.f32 %v4521_v42, %v5941_v39  ;;  %v4522_v52 = vadd.f32 %v2970_v48, %v2392_v44  ;;  %v2972_v53 = vpop.f32.mrb[3].mxu0  ;;  %v267_v48 = vld [vmem:[%s6219_s0 + $0x7c8] sm:$0xff] }
 0x219   :  { %2604 = vmatmul.mubr.bf16.gmra.mrb[108].mxu1 %v4098_v41  ;;  %v271_v49 = vld [vmem:[%s6219_s0 + $0x7e8] sm:$0xff]  ;;  %v269_v53 = vld [vmem:[%s6219_s0 + $0x7d8] sm:$0xff] }
 0x21a   :  { %v3300_v54 = vadd.f32 %v5946_v47, %v3229_v51  ;;  %v3230_v55 = vmul.f32 %v4522_v52, %v5941_v39  ;;  %3182 = vmatmul.mubr.bf16.gmra.mrb[108].mxu0 %v4102_v45  ;;  %2611 = vmatprep.mubr.bf16.mxu1 %v4107_v46 }
 0x21b   :  { %3189 = vmatprep.mubr.bf16.mxu0 %v4111_v50 }
 0x21c   :  { %v3428_v0 = vmul.f32 0.2, %v3300_v54  ;;  %v3301_v58 = vadd.f32 %v5946_v47, %v3230_v55  ;;  %v2397_v59 = vpop.f32.mrb[4].mxu1  ;;  %vm3364_vm0 = vcmp.ge.f32.partialorder %v3300_v54, 0.0 }
 0x21d   :  { %v2975_v62 = vpop.f32.mrb[4].mxu0  ;;  %v2399_v63 = vpop.f32.mrb[5].mxu1 }
 0x21e   :  { %vm3365_vm1 = vcmp.ge.f32.partialorder %v3301_v58, 0.0  ;;  %v3429_v3 = vmul.f32 0.2, %v3301_v58  ;;  %v4523_v4 = vadd.f32 %v2975_v62, %v2397_v59  ;;  %v2977_v5 = vpop.f32.mrb[5].mxu0  ;;  %v2400_v6 = vpop.f32.mrb[6].mxu1  ;;  %v3492_v11 = vsel %vm3364_vm0, %v3300_v54, %v3428_v0  ;;  %v273_v54 = vld [vmem:[%s6219_s0 + $0x7f8] sm:$0xff] }
 0x21f   :  { %v2978_v8 = vpop.f32.mrb[6].mxu0  ;;  %v2402_v9 = vpop.f32.mrb[7].mxu1  ;;  %v4126_v0 = vcombine.low %v261_v24, %v265_v25  ;;  %v4131_v62 = vcombine.high %v267_v48, %v271_v49 }
 0x220   :  { %v3493_v12 = vsel %vm3365_vm1, %v3301_v58, %v3429_v3  ;;  %v3231_v13 = vmul.f32 %v4523_v4, %v5941_v39  ;;  %v4524_v14 = vadd.f32 %v2978_v8, %v2400_v6  ;;  %v2980_v15 = vpop.f32.mrb[7].mxu0 }
 0x221   :  { %v4333_v16 = vpack.c.bf16 %v3493_v12, %v3492_v11  ;;  %2612 = vmatmul.mubr.bf16.gmra.mrb[112].mxu1 %v4106_v1 }
 0x222   :  { %v3302_v17 = vadd.f32 %v5946_v47, %v3231_v13  ;;  %v3232_v18 = vmul.f32 %v4524_v14, %v5941_v39  ;;  %3190 = vmatmul.mubr.bf16.gmra.mrb[112].mxu0 %v4110_v2  ;;  %2619 = vmatprep.mubr.bf16.mxu1 %v4115_v7  ;;  %v4135_v2 = vcombine.high %v269_v53, %v273_v54 }
 0x223   :  { %4334 = vst [vmem:[%s6222_s4] sm:$0xff] %v4333_v16   ;;  %3197 = vmatprep.mubr.bf16.mxu0 %v4119_v10  ;;  %v4130_v16 = vcombine.low %v267_v48, %v271_v49 }
 0x224   :  { %v3430_v21 = vmul.f32 0.2, %v3302_v17  ;;  %v3303_v22 = vadd.f32 %v5946_v47, %v3232_v18  ;;  %v2405_v23 = vpop.f32.mrb[8].mxu1  ;;  %vm3366_vm2 = vcmp.ge.f32.partialorder %v3302_v17, 0.0 }
 0x225   :  { %v2983_v26 = vpop.f32.mrb[8].mxu0  ;;  %v2407_v27 = vpop.f32.mrb[9].mxu1 }
 0x226   :  { %vm3367_vm3 = vcmp.ge.f32.partialorder %v3303_v22, 0.0  ;;  %v3431_v30 = vmul.f32 0.2, %v3303_v22  ;;  %v4525_v31 = vadd.f32 %v2983_v26, %v2405_v23  ;;  %v2985_v32 = vpop.f32.mrb[9].mxu0  ;;  %v2408_v33 = vpop.f32.mrb[10].mxu1  ;;  %v3494_v38 = vsel %vm3366_vm2, %v3302_v17, %v3430_v21 }
 0x227   :  { %v2986_v35 = vpop.f32.mrb[10].mxu0  ;;  %v2410_v36 = vpop.f32.mrb[11].mxu1  ;;  %v4134_v21 = vcombine.low %v269_v53, %v273_v54 }
 0x228   :  { %v3495_v40 = vsel %vm3367_vm3, %v3303_v22, %v3431_v30  ;;  %v3233_v41 = vmul.f32 %v4525_v31, %v5941_v39  ;;  %v4526_v42 = vadd.f32 %v2986_v35, %v2408_v33  ;;  %v2988_v43 = vpop.f32.mrb[11].mxu0 }
 0x229   :  { %v4338_v44 = vpack.c.bf16 %v3495_v40, %v3494_v38  ;;  %2620 = vmatmul.mubr.bf16.gmra.mrb[116].mxu1 %v4114_v28 }
 0x22a   :  { %v3304_v45 = vadd.f32 %v5946_v47, %v3233_v41  ;;  %v3234_v46 = vmul.f32 %v4526_v42, %v5941_v39  ;;  %3198 = vmatmul.mubr.bf16.gmra.mrb[116].mxu0 %v4118_v29  ;;  %2627 = vmatprep.mubr.bf16.mxu1 %v4123_v34 }
 0x22b   :  { %4490 = vst [vmem:[%s6222_s4 + $0x8] sm:$0xff] %v4338_v44   ;;  %3205 = vmatprep.mubr.bf16.mxu0 %v4127_v37 }
 0x22c   :  { %v3432_v50 = vmul.f32 0.2, %v3304_v45  ;;  %v3305_v51 = vadd.f32 %v5946_v47, %v3234_v46  ;;  %v2413_v52 = vpop.f32.mrb[12].mxu1  ;;  %vm3368_vm4 = vcmp.ge.f32.partialorder %v3304_v45, 0.0 }
 0x22d   :  { %v2991_v55 = vpop.f32.mrb[12].mxu0  ;;  %v2415_v56 = vpop.f32.mrb[13].mxu1 }
 0x22e   :  { %vm3369_vm5 = vcmp.ge.f32.partialorder %v3305_v51, 0.0  ;;  %v3433_v58 = vmul.f32 0.2, %v3305_v51  ;;  %v4527_v59 = vadd.f32 %v2991_v55, %v2413_v52  ;;  %v2993_v60 = vpop.f32.mrb[13].mxu0  ;;  %v2416_v61 = vpop.f32.mrb[14].mxu1  ;;  %v3496_v3 = vsel %vm3368_vm4, %v3304_v45, %v3432_v50 }
 0x22f   :  { %v2994_v63 = vpop.f32.mrb[14].mxu0  ;;  %v2418_v1 = vpop.f32.mrb[15].mxu1 }
 0x230   :  { %v3497_v4 = vsel %vm3369_vm5, %v3305_v51, %v3433_v58  ;;  %v3235_v5 = vmul.f32 %v4527_v59, %v5941_v39  ;;  %v4528_v6 = vadd.f32 %v2994_v63, %v2416_v61  ;;  %v2996_v7 = vpop.f32.mrb[15].mxu0 }
 0x231   :  { %v4343_v8 = vpack.c.bf16 %v3497_v4, %v3496_v3  ;;  %2628 = vmatmul.mubr.bf16.gmra.mrb[120].mxu1 %v4122_v57 }
 0x232   :  { %v3306_v9 = vadd.f32 %v5946_v47, %v3235_v5  ;;  %v3236_v10 = vmul.f32 %v4528_v6, %v5941_v39  ;;  %3206 = vmatmul.mubr.bf16.gmra.mrb[120].mxu0 %v4126_v0  ;;  %2635 = vmatprep.mubr.bf16.mxu1 %v4131_v62 }
 0x233   :  { %4491 = vst [vmem:[%s6222_s4 + $0x10] sm:$0xff] %v4343_v8   ;;  %3213 = vmatprep.mubr.bf16.mxu0 %v4135_v2 }
 0x234   :  { %v3434_v11 = vmul.f32 0.2, %v3306_v9  ;;  %v3307_v12 = vadd.f32 %v5946_v47, %v3236_v10  ;;  %v2421_v13 = vpop.f32.mrb[16].mxu1  ;;  %vm3370_vm6 = vcmp.ge.f32.partialorder %v3306_v9, 0.0 }
 0x235   :  { %v2999_v14 = vpop.f32.mrb[16].mxu0  ;;  %v2423_v15 = vpop.f32.mrb[17].mxu1 }
 0x236   :  { %vm3371_vm7 = vcmp.ge.f32.partialorder %v3307_v12, 0.0  ;;  %v3435_v17 = vmul.f32 0.2, %v3307_v12  ;;  %v4529_v18 = vadd.f32 %v2999_v14, %v2421_v13  ;;  %v3001_v19 = vpop.f32.mrb[17].mxu0  ;;  %v2424_v20 = vpop.f32.mrb[18].mxu1  ;;  %v3498_v24 = vsel %vm3370_vm6, %v3306_v9, %v3434_v11 }
 0x237   :  { %v3002_v22 = vpop.f32.mrb[18].mxu0  ;;  %v2426_v23 = vpop.f32.mrb[19].mxu1 }
 0x238   :  { %v3499_v25 = vsel %vm3371_vm7, %v3307_v12, %v3435_v17  ;;  %v3237_v26 = vmul.f32 %v4529_v18, %v5941_v39  ;;  %v4530_v27 = vadd.f32 %v3002_v22, %v2424_v20  ;;  %v3004_v28 = vpop.f32.mrb[19].mxu0 }
 0x239   :  { %v4348_v29 = vpack.c.bf16 %v3499_v25, %v3498_v24  ;;  %2636 = vmatmul.mubr.bf16.gmra.mrb[124].mxu1 %v4130_v16 }
 0x23a   :  { %v3308_v30 = vadd.f32 %v5946_v47, %v3237_v26  ;;  %v3238_v31 = vmul.f32 %v4530_v27, %v5941_v39  ;;  %3214 = vmatmul.mubr.bf16.gmra.mrb[124].mxu0 %v4134_v21 }
 0x23b   :  { %4492 = vst [vmem:[%s6222_s4 + $0x18] sm:$0xff] %v4348_v29  }
 0x23c   :  { %v3436_v32 = vmul.f32 0.2, %v3308_v30  ;;  %v3309_v33 = vadd.f32 %v5946_v47, %v3238_v31  ;;  %v2429_v34 = vpop.f32.mrb[20].mxu1  ;;  %vm3372_vm8 = vcmp.ge.f32.partialorder %v3308_v30, 0.0 }
 0x23d   :  { %v3007_v35 = vpop.f32.mrb[20].mxu0  ;;  %v2431_v36 = vpop.f32.mrb[21].mxu1 }
 0x23e   :  { %vm3373_vm9 = vcmp.ge.f32.partialorder %v3309_v33, 0.0  ;;  %v3437_v37 = vmul.f32 0.2, %v3309_v33  ;;  %v4531_v38 = vadd.f32 %v3007_v35, %v2429_v34  ;;  %v3009_v40 = vpop.f32.mrb[21].mxu0  ;;  %v2432_v41 = vpop.f32.mrb[22].mxu1  ;;  %v3500_v44 = vsel %vm3372_vm8, %v3308_v30, %v3436_v32 }
 0x23f   :  { %v3010_v42 = vpop.f32.mrb[22].mxu0  ;;  %v2434_v43 = vpop.f32.mrb[23].mxu1 }
 0x240   :  { %v3501_v45 = vsel %vm3373_vm9, %v3309_v33, %v3437_v37  ;;  %v3239_v46 = vmul.f32 %v4531_v38, %v5941_v39  ;;  %v4532_v48 = vadd.f32 %v3010_v42, %v2432_v41  ;;  %v3012_v49 = vpop.f32.mrb[23].mxu0 }
 0x241   :  { %v4353_v50 = vpack.c.bf16 %v3501_v45, %v3500_v44 }
 0x242   :  { %v3310_v51 = vadd.f32 %v5946_v47, %v3239_v46  ;;  %v3240_v52 = vmul.f32 %v4532_v48, %v5941_v39 }
 0x243   :  { %4493 = vst [vmem:[%s6222_s4 + $0x20] sm:$0xff] %v4353_v50  }
 0x244   :  { %v3438_v53 = vmul.f32 0.2, %v3310_v51  ;;  %v3311_v54 = vadd.f32 %v5946_v47, %v3240_v52  ;;  %v2437_v55 = vpop.f32.mrb[24].mxu1  ;;  %vm3374_vm10 = vcmp.ge.f32.partialorder %v3310_v51, 0.0 }
 0x245   :  { %v3015_v56 = vpop.f32.mrb[24].mxu0  ;;  %v2439_v57 = vpop.f32.mrb[25].mxu1 }
 0x246   :  { %vm3375_vm11 = vcmp.ge.f32.partialorder %v3311_v54, 0.0  ;;  %v3439_v0 = vmul.f32 0.2, %v3311_v54  ;;  %v4533_v58 = vadd.f32 %v3015_v56, %v2437_v55  ;;  %v3017_v59 = vpop.f32.mrb[25].mxu0  ;;  %v2440_v60 = vpop.f32.mrb[26].mxu1  ;;  %v3502_v63 = vsel %vm3374_vm10, %v3310_v51, %v3438_v53 }
 0x247   :  { %v3018_v61 = vpop.f32.mrb[26].mxu0  ;;  %v2442_v62 = vpop.f32.mrb[27].mxu1 }
 0x248   :  { %v3503_v1 = vsel %vm3375_vm11, %v3311_v54, %v3439_v0  ;;  %v3241_v2 = vmul.f32 %v4533_v58, %v5941_v39  ;;  %v4534_v3 = vadd.f32 %v3018_v61, %v2440_v60  ;;  %v3020_v4 = vpop.f32.mrb[27].mxu0 }
 0x249   :  { %v4358_v5 = vpack.c.bf16 %v3503_v1, %v3502_v63 }
 0x24a   :  { %v3312_v6 = vadd.f32 %v5946_v47, %v3241_v2  ;;  %v3242_v7 = vmul.f32 %v4534_v3, %v5941_v39 }
 0x24b   :  { %4494 = vst [vmem:[%s6222_s4 + $0x28] sm:$0xff] %v4358_v5  }
 0x24c   :  { %v3440_v8 = vmul.f32 0.2, %v3312_v6  ;;  %v3313_v9 = vadd.f32 %v5946_v47, %v3242_v7  ;;  %v2445_v10 = vpop.f32.mrb[28].mxu1  ;;  %vm3376_vm12 = vcmp.ge.f32.partialorder %v3312_v6, 0.0 }
 0x24d   :  { %v3023_v11 = vpop.f32.mrb[28].mxu0  ;;  %v2447_v12 = vpop.f32.mrb[29].mxu1 }
 0x24e   :  { %vm3377_vm13 = vcmp.ge.f32.partialorder %v3313_v9, 0.0  ;;  %v3441_v13 = vmul.f32 0.2, %v3313_v9  ;;  %v4535_v14 = vadd.f32 %v3023_v11, %v2445_v10  ;;  %v3025_v15 = vpop.f32.mrb[29].mxu0  ;;  %v2448_v16 = vpop.f32.mrb[30].mxu1  ;;  %v3504_v19 = vsel %vm3376_vm12, %v3312_v6, %v3440_v8 }
 0x24f   :  { %v3026_v17 = vpop.f32.mrb[30].mxu0  ;;  %v2450_v18 = vpop.f32.mrb[31].mxu1 }
 0x250   :  { %v3505_v20 = vsel %vm3377_vm13, %v3313_v9, %v3441_v13  ;;  %v3243_v21 = vmul.f32 %v4535_v14, %v5941_v39  ;;  %v4536_v22 = vadd.f32 %v3026_v17, %v2448_v16  ;;  %v3028_v23 = vpop.f32.mrb[31].mxu0 }
 0x251   :  { %v4363_v24 = vpack.c.bf16 %v3505_v20, %v3504_v19 }
 0x252   :  { %v3314_v25 = vadd.f32 %v5946_v47, %v3243_v21  ;;  %v3244_v26 = vmul.f32 %v4536_v22, %v5941_v39 }
 0x253   :  { %4495 = vst [vmem:[%s6222_s4 + $0x30] sm:$0xff] %v4363_v24  }
 0x254   :  { %v3442_v27 = vmul.f32 0.2, %v3314_v25  ;;  %v3315_v28 = vadd.f32 %v5946_v47, %v3244_v26  ;;  %v2453_v29 = vpop.f32.mrb[32].mxu1  ;;  %vm3378_vm14 = vcmp.ge.f32.partialorder %v3314_v25, 0.0 }
 0x255   :  { %v3031_v30 = vpop.f32.mrb[32].mxu0  ;;  %v2455_v31 = vpop.f32.mrb[33].mxu1 }
 0x256   :  { %vm3379_vm15 = vcmp.ge.f32.partialorder %v3315_v28, 0.0  ;;  %v3443_v32 = vmul.f32 0.2, %v3315_v28  ;;  %v4537_v33 = vadd.f32 %v3031_v30, %v2453_v29  ;;  %v3033_v34 = vpop.f32.mrb[33].mxu0  ;;  %v2456_v35 = vpop.f32.mrb[34].mxu1  ;;  %v3506_v38 = vsel %vm3378_vm14, %v3314_v25, %v3442_v27 }
 0x257   :  { %v3034_v36 = vpop.f32.mrb[34].mxu0  ;;  %v2458_v37 = vpop.f32.mrb[35].mxu1 }
 0x258   :  { %v3507_v40 = vsel %vm3379_vm15, %v3315_v28, %v3443_v32  ;;  %v3245_v41 = vmul.f32 %v4537_v33, %v5941_v39  ;;  %v4538_v42 = vadd.f32 %v3034_v36, %v2456_v35  ;;  %v3036_v43 = vpop.f32.mrb[35].mxu0 }
 0x259   :  { %v4368_v44 = vpack.c.bf16 %v3507_v40, %v3506_v38 }
 0x25a   :  { %v3316_v45 = vadd.f32 %v5946_v47, %v3245_v41  ;;  %v3246_v46 = vmul.f32 %v4538_v42, %v5941_v39 }
 0x25b   :  { %4496 = vst [vmem:[%s6222_s4 + $0x38] sm:$0xff] %v4368_v44  }
 0x25c   :  { %v3444_v48 = vmul.f32 0.2, %v3316_v45  ;;  %v3317_v49 = vadd.f32 %v5946_v47, %v3246_v46  ;;  %v2461_v50 = vpop.f32.mrb[36].mxu1  ;;  %vm3380_vm0 = vcmp.ge.f32.partialorder %v3316_v45, 0.0 }
 0x25d   :  { %v3039_v51 = vpop.f32.mrb[36].mxu0  ;;  %v2463_v52 = vpop.f32.mrb[37].mxu1 }
 0x25e   :  { %vm3381_vm1 = vcmp.ge.f32.partialorder %v3317_v49, 0.0  ;;  %v3445_v53 = vmul.f32 0.2, %v3317_v49  ;;  %v4539_v54 = vadd.f32 %v3039_v51, %v2461_v50  ;;  %v3041_v55 = vpop.f32.mrb[37].mxu0  ;;  %v2464_v56 = vpop.f32.mrb[38].mxu1  ;;  %v3508_v58 = vsel %vm3380_vm0, %v3316_v45, %v3444_v48 }
 0x25f   :  { %v3042_v57 = vpop.f32.mrb[38].mxu0  ;;  %v2466_v0 = vpop.f32.mrb[39].mxu1 }
 0x260   :  { %v3509_v59 = vsel %vm3381_vm1, %v3317_v49, %v3445_v53  ;;  %v3247_v60 = vmul.f32 %v4539_v54, %v5941_v39  ;;  %v4540_v61 = vadd.f32 %v3042_v57, %v2464_v56  ;;  %v3044_v62 = vpop.f32.mrb[39].mxu0 }
 0x261   :  { %v4373_v63 = vpack.c.bf16 %v3509_v59, %v3508_v58 }
 0x262   :  { %v3318_v1 = vadd.f32 %v5946_v47, %v3247_v60  ;;  %v3248_v2 = vmul.f32 %v4540_v61, %v5941_v39 }
 0x263   :  { %4497 = vst [vmem:[%s6222_s4 + $0x40] sm:$0xff] %v4373_v63  }
 0x264   :  { %v3446_v3 = vmul.f32 0.2, %v3318_v1  ;;  %v3319_v4 = vadd.f32 %v5946_v47, %v3248_v2  ;;  %v2469_v5 = vpop.f32.mrb[40].mxu1  ;;  %vm3382_vm2 = vcmp.ge.f32.partialorder %v3318_v1, 0.0 }
 0x265   :  { %v3047_v6 = vpop.f32.mrb[40].mxu0  ;;  %v2471_v7 = vpop.f32.mrb[41].mxu1 }
 0x266   :  { %vm3383_vm3 = vcmp.ge.f32.partialorder %v3319_v4, 0.0  ;;  %v3447_v8 = vmul.f32 0.2, %v3319_v4  ;;  %v4541_v9 = vadd.f32 %v3047_v6, %v2469_v5  ;;  %v3049_v10 = vpop.f32.mrb[41].mxu0  ;;  %v2472_v11 = vpop.f32.mrb[42].mxu1  ;;  %v3510_v14 = vsel %vm3382_vm2, %v3318_v1, %v3446_v3 }
 0x267   :  { %v3050_v12 = vpop.f32.mrb[42].mxu0  ;;  %v2474_v13 = vpop.f32.mrb[43].mxu1 }
 0x268   :  { %v3511_v15 = vsel %vm3383_vm3, %v3319_v4, %v3447_v8  ;;  %v3249_v16 = vmul.f32 %v4541_v9, %v5941_v39  ;;  %v4542_v17 = vadd.f32 %v3050_v12, %v2472_v11  ;;  %v3052_v18 = vpop.f32.mrb[43].mxu0 }
 0x269   :  { %v4378_v19 = vpack.c.bf16 %v3511_v15, %v3510_v14 }
 0x26a   :  { %v3320_v20 = vadd.f32 %v5946_v47, %v3249_v16  ;;  %v3250_v21 = vmul.f32 %v4542_v17, %v5941_v39 }
 0x26b   :  { %4498 = vst [vmem:[%s6222_s4 + $0x48] sm:$0xff] %v4378_v19  }
 0x26c   :  { %v3448_v22 = vmul.f32 0.2, %v3320_v20  ;;  %v3321_v23 = vadd.f32 %v5946_v47, %v3250_v21  ;;  %v2477_v24 = vpop.f32.mrb[44].mxu1  ;;  %vm3384_vm4 = vcmp.ge.f32.partialorder %v3320_v20, 0.0 }
 0x26d   :  { %v3055_v25 = vpop.f32.mrb[44].mxu0  ;;  %v2479_v26 = vpop.f32.mrb[45].mxu1 }
 0x26e   :  { %vm3385_vm5 = vcmp.ge.f32.partialorder %v3321_v23, 0.0  ;;  %v3449_v27 = vmul.f32 0.2, %v3321_v23  ;;  %v4543_v28 = vadd.f32 %v3055_v25, %v2477_v24  ;;  %v3057_v29 = vpop.f32.mrb[45].mxu0  ;;  %v2480_v30 = vpop.f32.mrb[46].mxu1  ;;  %v3512_v33 = vsel %vm3384_vm4, %v3320_v20, %v3448_v22 }
 0x26f   :  { %v3058_v31 = vpop.f32.mrb[46].mxu0  ;;  %v2482_v32 = vpop.f32.mrb[47].mxu1 }
 0x270   :  { %v3513_v34 = vsel %vm3385_vm5, %v3321_v23, %v3449_v27  ;;  %v3251_v35 = vmul.f32 %v4543_v28, %v5941_v39  ;;  %v4544_v36 = vadd.f32 %v3058_v31, %v2480_v30  ;;  %v3060_v37 = vpop.f32.mrb[47].mxu0 }
 0x271   :  { %v4383_v38 = vpack.c.bf16 %v3513_v34, %v3512_v33 }
 0x272   :  { %v3322_v40 = vadd.f32 %v5946_v47, %v3251_v35  ;;  %v3252_v41 = vmul.f32 %v4544_v36, %v5941_v39 }
 0x273   :  { %4499 = vst [vmem:[%s6222_s4 + $0x50] sm:$0xff] %v4383_v38  }
 0x274   :  { %v3450_v42 = vmul.f32 0.2, %v3322_v40  ;;  %v3323_v43 = vadd.f32 %v5946_v47, %v3252_v41  ;;  %v2485_v44 = vpop.f32.mrb[48].mxu1  ;;  %vm3386_vm6 = vcmp.ge.f32.partialorder %v3322_v40, 0.0 }
 0x275   :  { %v3063_v45 = vpop.f32.mrb[48].mxu0  ;;  %v2487_v46 = vpop.f32.mrb[49].mxu1 }
 0x276   :  { %vm3387_vm7 = vcmp.ge.f32.partialorder %v3323_v43, 0.0  ;;  %v3451_v48 = vmul.f32 0.2, %v3323_v43  ;;  %v4545_v49 = vadd.f32 %v3063_v45, %v2485_v44  ;;  %v3065_v50 = vpop.f32.mrb[49].mxu0  ;;  %v2488_v51 = vpop.f32.mrb[50].mxu1  ;;  %v3514_v54 = vsel %vm3386_vm6, %v3322_v40, %v3450_v42 }
 0x277   :  { %v3066_v52 = vpop.f32.mrb[50].mxu0  ;;  %v2490_v53 = vpop.f32.mrb[51].mxu1 }
 0x278   :  { %v3515_v55 = vsel %vm3387_vm7, %v3323_v43, %v3451_v48  ;;  %v3253_v56 = vmul.f32 %v4545_v49, %v5941_v39  ;;  %v4546_v57 = vadd.f32 %v3066_v52, %v2488_v51  ;;  %v3068_v0 = vpop.f32.mrb[51].mxu0 }
 0x279   :  { %v4388_v58 = vpack.c.bf16 %v3515_v55, %v3514_v54 }
 0x27a   :  { %v3324_v59 = vadd.f32 %v5946_v47, %v3253_v56  ;;  %v3254_v60 = vmul.f32 %v4546_v57, %v5941_v39 }
 0x27b   :  { %4500 = vst [vmem:[%s6222_s4 + $0x58] sm:$0xff] %v4388_v58  }
 0x27c   :  { %v3452_v61 = vmul.f32 0.2, %v3324_v59  ;;  %v3325_v62 = vadd.f32 %v5946_v47, %v3254_v60  ;;  %v2493_v63 = vpop.f32.mrb[52].mxu1  ;;  %vm3388_vm8 = vcmp.ge.f32.partialorder %v3324_v59, 0.0 }
 0x27d   :  { %v3071_v1 = vpop.f32.mrb[52].mxu0  ;;  %v2495_v2 = vpop.f32.mrb[53].mxu1 }
 0x27e   :  { %vm3389_vm9 = vcmp.ge.f32.partialorder %v3325_v62, 0.0  ;;  %v3453_v3 = vmul.f32 0.2, %v3325_v62  ;;  %v4547_v4 = vadd.f32 %v3071_v1, %v2493_v63  ;;  %v3073_v5 = vpop.f32.mrb[53].mxu0  ;;  %v2496_v6 = vpop.f32.mrb[54].mxu1  ;;  %v3516_v9 = vsel %vm3388_vm8, %v3324_v59, %v3452_v61 }
 0x27f   :  { %v3074_v7 = vpop.f32.mrb[54].mxu0  ;;  %v2498_v8 = vpop.f32.mrb[55].mxu1 }
 0x280   :  { %v3517_v10 = vsel %vm3389_vm9, %v3325_v62, %v3453_v3  ;;  %v3255_v11 = vmul.f32 %v4547_v4, %v5941_v39  ;;  %v4548_v12 = vadd.f32 %v3074_v7, %v2496_v6  ;;  %v3076_v13 = vpop.f32.mrb[55].mxu0 }
 0x281   :  { %v4393_v14 = vpack.c.bf16 %v3517_v10, %v3516_v9 }
 0x282   :  { %v3326_v15 = vadd.f32 %v5946_v47, %v3255_v11  ;;  %v3256_v16 = vmul.f32 %v4548_v12, %v5941_v39 }
 0x283   :  { %4501 = vst [vmem:[%s6222_s4 + $0x60] sm:$0xff] %v4393_v14  }
 0x284   :  { %v3454_v17 = vmul.f32 0.2, %v3326_v15  ;;  %v3327_v18 = vadd.f32 %v5946_v47, %v3256_v16  ;;  %v2501_v19 = vpop.f32.mrb[56].mxu1  ;;  %vm3390_vm10 = vcmp.ge.f32.partialorder %v3326_v15, 0.0 }
 0x285   :  { %v3079_v20 = vpop.f32.mrb[56].mxu0  ;;  %v2503_v21 = vpop.f32.mrb[57].mxu1 }
 0x286   :  { %vm3391_vm11 = vcmp.ge.f32.partialorder %v3327_v18, 0.0  ;;  %v3455_v22 = vmul.f32 0.2, %v3327_v18  ;;  %v4549_v23 = vadd.f32 %v3079_v20, %v2501_v19  ;;  %v3081_v24 = vpop.f32.mrb[57].mxu0  ;;  %v2504_v25 = vpop.f32.mrb[58].mxu1  ;;  %v3518_v28 = vsel %vm3390_vm10, %v3326_v15, %v3454_v17 }
 0x287   :  { %v3082_v26 = vpop.f32.mrb[58].mxu0  ;;  %v2506_v27 = vpop.f32.mrb[59].mxu1 }
 0x288   :  { %v3519_v29 = vsel %vm3391_vm11, %v3327_v18, %v3455_v22  ;;  %v3257_v30 = vmul.f32 %v4549_v23, %v5941_v39  ;;  %v4550_v31 = vadd.f32 %v3082_v26, %v2504_v25  ;;  %v3084_v32 = vpop.f32.mrb[59].mxu0 }
 0x289   :  { %v4398_v33 = vpack.c.bf16 %v3519_v29, %v3518_v28 }
 0x28a   :  { %v3328_v34 = vadd.f32 %v5946_v47, %v3257_v30  ;;  %v3258_v35 = vmul.f32 %v4550_v31, %v5941_v39 }
 0x28b   :  { %4502 = vst [vmem:[%s6222_s4 + $0x68] sm:$0xff] %v4398_v33  }
 0x28c   :  { %v3456_v36 = vmul.f32 0.2, %v3328_v34  ;;  %v3329_v37 = vadd.f32 %v5946_v47, %v3258_v35  ;;  %v2509_v38 = vpop.f32.mrb[60].mxu1  ;;  %vm3392_vm12 = vcmp.ge.f32.partialorder %v3328_v34, 0.0 }
 0x28d   :  { %v3087_v40 = vpop.f32.mrb[60].mxu0  ;;  %v2511_v41 = vpop.f32.mrb[61].mxu1 }
 0x28e   :  { %vm3393_vm13 = vcmp.ge.f32.partialorder %v3329_v37, 0.0  ;;  %v3457_v42 = vmul.f32 0.2, %v3329_v37  ;;  %v4551_v43 = vadd.f32 %v3087_v40, %v2509_v38  ;;  %v3089_v44 = vpop.f32.mrb[61].mxu0  ;;  %v2512_v45 = vpop.f32.mrb[62].mxu1  ;;  %v3520_v49 = vsel %vm3392_vm12, %v3328_v34, %v3456_v36 }
 0x28f   :  { %v3090_v46 = vpop.f32.mrb[62].mxu0  ;;  %v2514_v48 = vpop.f32.mrb[63].mxu1 }
 0x290   :  { %v3521_v50 = vsel %vm3393_vm13, %v3329_v37, %v3457_v42  ;;  %v3259_v51 = vmul.f32 %v4551_v43, %v5941_v39  ;;  %v4552_v52 = vadd.f32 %v3090_v46, %v2512_v45  ;;  %v3092_v53 = vpop.f32.mrb[63].mxu0 }
 0x291   :  { %v4403_v54 = vpack.c.bf16 %v3521_v50, %v3520_v49 }
 0x292   :  { %v3330_v55 = vadd.f32 %v5946_v47, %v3259_v51  ;;  %v3260_v56 = vmul.f32 %v4552_v52, %v5941_v39 }
 0x293   :  { %4503 = vst [vmem:[%s6222_s4 + $0x70] sm:$0xff] %v4403_v54  }
 0x294   :  { %v3458_v57 = vmul.f32 0.2, %v3330_v55  ;;  %v3331_v0 = vadd.f32 %v5946_v47, %v3260_v56  ;;  %v2517_v58 = vpop.f32.mrb[64].mxu1  ;;  %vm3394_vm14 = vcmp.ge.f32.partialorder %v3330_v55, 0.0 }
 0x295   :  { %v3095_v59 = vpop.f32.mrb[64].mxu0  ;;  %v2519_v60 = vpop.f32.mrb[65].mxu1 }
 0x296   :  { %vm3395_vm15 = vcmp.ge.f32.partialorder %v3331_v0, 0.0  ;;  %v3459_v61 = vmul.f32 0.2, %v3331_v0  ;;  %v4553_v62 = vadd.f32 %v3095_v59, %v2517_v58  ;;  %v3097_v63 = vpop.f32.mrb[65].mxu0  ;;  %v2520_v1 = vpop.f32.mrb[66].mxu1  ;;  %v3522_v4 = vsel %vm3394_vm14, %v3330_v55, %v3458_v57 }
 0x297   :  { %v3098_v2 = vpop.f32.mrb[66].mxu0  ;;  %v2522_v3 = vpop.f32.mrb[67].mxu1 }
 0x298   :  { %v3523_v5 = vsel %vm3395_vm15, %v3331_v0, %v3459_v61  ;;  %v3261_v6 = vmul.f32 %v4553_v62, %v5941_v39  ;;  %v4554_v7 = vadd.f32 %v3098_v2, %v2520_v1  ;;  %v3100_v8 = vpop.f32.mrb[67].mxu0 }
 0x299   :  { %v4408_v9 = vpack.c.bf16 %v3523_v5, %v3522_v4 }
 0x29a   :  { %v3332_v10 = vadd.f32 %v5946_v47, %v3261_v6  ;;  %v3262_v11 = vmul.f32 %v4554_v7, %v5941_v39 }
 0x29b   :  { %4504 = vst [vmem:[%s6222_s4 + $0x78] sm:$0xff] %v4408_v9  }
 0x29c   :  { %v3460_v12 = vmul.f32 0.2, %v3332_v10  ;;  %v3333_v13 = vadd.f32 %v5946_v47, %v3262_v11  ;;  %v2525_v14 = vpop.f32.mrb[68].mxu1  ;;  %vm3396_vm0 = vcmp.ge.f32.partialorder %v3332_v10, 0.0 }
 0x29d   :  { %v3103_v15 = vpop.f32.mrb[68].mxu0  ;;  %v2527_v16 = vpop.f32.mrb[69].mxu1 }
 0x29e   :  { %vm3397_vm1 = vcmp.ge.f32.partialorder %v3333_v13, 0.0  ;;  %v3461_v17 = vmul.f32 0.2, %v3333_v13  ;;  %v4555_v18 = vadd.f32 %v3103_v15, %v2525_v14  ;;  %v3105_v19 = vpop.f32.mrb[69].mxu0  ;;  %v2528_v20 = vpop.f32.mrb[70].mxu1  ;;  %v3524_v23 = vsel %vm3396_vm0, %v3332_v10, %v3460_v12 }
 0x29f   :  { %v3106_v21 = vpop.f32.mrb[70].mxu0  ;;  %v2530_v22 = vpop.f32.mrb[71].mxu1 }
 0x2a0   :  { %v3525_v24 = vsel %vm3397_vm1, %v3333_v13, %v3461_v17  ;;  %v3263_v25 = vmul.f32 %v4555_v18, %v5941_v39  ;;  %v4556_v26 = vadd.f32 %v3106_v21, %v2528_v20  ;;  %v3108_v27 = vpop.f32.mrb[71].mxu0 }
 0x2a1   :  { %v4413_v28 = vpack.c.bf16 %v3525_v24, %v3524_v23 }
 0x2a2   :  { %v3334_v29 = vadd.f32 %v5946_v47, %v3263_v25  ;;  %v3264_v30 = vmul.f32 %v4556_v26, %v5941_v39 }
 0x2a3   :  { %4505 = vst [vmem:[%s6222_s4 + $0x80] sm:$0xff] %v4413_v28  }
 0x2a4   :  { %v3462_v31 = vmul.f32 0.2, %v3334_v29  ;;  %v3335_v32 = vadd.f32 %v5946_v47, %v3264_v30  ;;  %v2533_v33 = vpop.f32.mrb[72].mxu1  ;;  %vm3398_vm2 = vcmp.ge.f32.partialorder %v3334_v29, 0.0 }
 0x2a5   :  { %v3111_v34 = vpop.f32.mrb[72].mxu0  ;;  %v2535_v35 = vpop.f32.mrb[73].mxu1 }
 0x2a6   :  { %vm3399_vm3 = vcmp.ge.f32.partialorder %v3335_v32, 0.0  ;;  %v3463_v36 = vmul.f32 0.2, %v3335_v32  ;;  %v4557_v37 = vadd.f32 %v3111_v34, %v2533_v33  ;;  %v3113_v38 = vpop.f32.mrb[73].mxu0  ;;  %v2536_v40 = vpop.f32.mrb[74].mxu1  ;;  %v3526_v43 = vsel %vm3398_vm2, %v3334_v29, %v3462_v31 }
 0x2a7   :  { %v3114_v41 = vpop.f32.mrb[74].mxu0  ;;  %v2538_v42 = vpop.f32.mrb[75].mxu1  ;;  %v6131_v38 = vld [vmem:[%s6220_s2] ss:$0 sm:$0xff] }
 0x2a8   :  { %v3527_v44 = vsel %vm3399_vm3, %v3335_v32, %v3463_v36  ;;  %v3265_v45 = vmul.f32 %v4557_v37, %v5941_v39  ;;  %v4558_v46 = vadd.f32 %v3114_v41, %v2536_v40  ;;  %v3116_v48 = vpop.f32.mrb[75].mxu0 }
 0x2a9   :  { %v4418_v49 = vpack.c.bf16 %v3527_v44, %v3526_v43  ;;  %v6137_v43 = vld [vmem:[%s6221_s3] ss:$0 sm:$0xff] }
 0x2aa   :  { %v3336_v50 = vadd.f32 %v5946_v47, %v3265_v45  ;;  %v3266_v51 = vmul.f32 %v4558_v46, %v5941_v39 }
 0x2ab   :  { %4506 = vst [vmem:[%s6222_s4 + $0x88] sm:$0xff] %v4418_v49  }
 0x2ac   :  { %v3464_v52 = vmul.f32 0.2, %v3336_v50  ;;  %v3337_v53 = vadd.f32 %v5946_v47, %v3266_v51  ;;  %v2541_v54 = vpop.f32.mrb[76].mxu1  ;;  %vm3400_vm4 = vcmp.ge.f32.partialorder %v3336_v50, 0.0 }
 0x2ad   :  { %v3119_v55 = vpop.f32.mrb[76].mxu0  ;;  %v2543_v56 = vpop.f32.mrb[77].mxu1 }
 0x2ae   :  { %vm3401_vm5 = vcmp.ge.f32.partialorder %v3337_v53, 0.0  ;;  %v3465_v57 = vmul.f32 0.2, %v3337_v53  ;;  %v4559_v0 = vadd.f32 %v3119_v55, %v2541_v54  ;;  %v3121_v58 = vpop.f32.mrb[77].mxu0  ;;  %v2544_v59 = vpop.f32.mrb[78].mxu1  ;;  %v3528_v62 = vsel %vm3400_vm4, %v3336_v50, %v3464_v52 }
 0x2af   :  { %v3122_v60 = vpop.f32.mrb[78].mxu0  ;;  %v2546_v61 = vpop.f32.mrb[79].mxu1 }
 0x2b0   :  { %v3529_v63 = vsel %vm3401_vm5, %v3337_v53, %v3465_v57  ;;  %v3267_v1 = vmul.f32 %v4559_v0, %v5941_v39  ;;  %v4560_v2 = vadd.f32 %v3122_v60, %v2544_v59  ;;  %v3124_v3 = vpop.f32.mrb[79].mxu0 }
 0x2b1   :  { %v4423_v4 = vpack.c.bf16 %v3529_v63, %v3528_v62 }
 0x2b2   :  { %v3338_v5 = vadd.f32 %v5946_v47, %v3267_v1  ;;  %v3268_v6 = vmul.f32 %v4560_v2, %v5941_v39 }
 0x2b3   :  { %4507 = vst [vmem:[%s6222_s4 + $0x90] sm:$0xff] %v4423_v4  }
 0x2b4   :  { %v3466_v7 = vmul.f32 0.2, %v3338_v5  ;;  %v3339_v8 = vadd.f32 %v5946_v47, %v3268_v6  ;;  %v2549_v9 = vpop.f32.mrb[80].mxu1  ;;  %vm3402_vm6 = vcmp.ge.f32.partialorder %v3338_v5, 0.0 }
 0x2b5   :  { %v3127_v10 = vpop.f32.mrb[80].mxu0  ;;  %v2551_v11 = vpop.f32.mrb[81].mxu1 }
 0x2b6   :  { %vm3403_vm7 = vcmp.ge.f32.partialorder %v3339_v8, 0.0  ;;  %v3467_v12 = vmul.f32 0.2, %v3339_v8  ;;  %v4561_v13 = vadd.f32 %v3127_v10, %v2549_v9  ;;  %v3129_v14 = vpop.f32.mrb[81].mxu0  ;;  %v2552_v15 = vpop.f32.mrb[82].mxu1  ;;  %v3530_v18 = vsel %vm3402_vm6, %v3338_v5, %v3466_v7 }
 0x2b7   :  { %v3130_v16 = vpop.f32.mrb[82].mxu0  ;;  %v2554_v17 = vpop.f32.mrb[83].mxu1 }
 0x2b8   :  { %v3531_v19 = vsel %vm3403_vm7, %v3339_v8, %v3467_v12  ;;  %v3269_v20 = vmul.f32 %v4561_v13, %v5941_v39  ;;  %v4562_v21 = vadd.f32 %v3130_v16, %v2552_v15  ;;  %v3132_v22 = vpop.f32.mrb[83].mxu0 }
 0x2b9   :  { %v4428_v23 = vpack.c.bf16 %v3531_v19, %v3530_v18 }
 0x2ba   :  { %v3340_v24 = vadd.f32 %v5946_v47, %v3269_v20  ;;  %v3270_v25 = vmul.f32 %v4562_v21, %v5941_v39 }
 0x2bb   :  { %4508 = vst [vmem:[%s6222_s4 + $0x98] sm:$0xff] %v4428_v23  }
 0x2bc   :  { %v3468_v26 = vmul.f32 0.2, %v3340_v24  ;;  %v3341_v27 = vadd.f32 %v5946_v47, %v3270_v25  ;;  %v2557_v28 = vpop.f32.mrb[84].mxu1  ;;  %vm3404_vm8 = vcmp.ge.f32.partialorder %v3340_v24, 0.0 }
 0x2bd   :  { %v3135_v29 = vpop.f32.mrb[84].mxu0  ;;  %v2559_v30 = vpop.f32.mrb[85].mxu1 }
 0x2be   :  { %vm3405_vm9 = vcmp.ge.f32.partialorder %v3341_v27, 0.0  ;;  %v3469_v31 = vmul.f32 0.2, %v3341_v27  ;;  %v4563_v32 = vadd.f32 %v3135_v29, %v2557_v28  ;;  %v3137_v33 = vpop.f32.mrb[85].mxu0  ;;  %v2560_v34 = vpop.f32.mrb[86].mxu1  ;;  %v3532_v37 = vsel %vm3404_vm8, %v3340_v24, %v3468_v26 }
 0x2bf   :  { %v3138_v35 = vpop.f32.mrb[86].mxu0  ;;  %v2562_v36 = vpop.f32.mrb[87].mxu1 }
 0x2c0   :  { %v3533_v39 = vsel %vm3405_vm9, %v3341_v27, %v3469_v31  ;;  %v3271_v47 = vmul.f32 %v6131_v38, %v4563_v32  ;;  %v4564_v40 = vadd.f32 %v3138_v35, %v2560_v34  ;;  %v3140_v41 = vpop.f32.mrb[87].mxu0 }
 0x2c1   :  { %v4433_v42 = vpack.c.bf16 %v3533_v39, %v3532_v37 }
 0x2c2   :  { %v3342_v44 = vadd.f32 %v6137_v43, %v3271_v47  ;;  %v3272_v45 = vmul.f32 %v6131_v38, %v4564_v40 }
 0x2c3   :  { %4509 = vst [vmem:[%s6222_s4 + $0xa0] sm:$0xff] %v4433_v42  }
 0x2c4   :  { %v3470_v46 = vmul.f32 0.2, %v3342_v44  ;;  %v3343_v48 = vadd.f32 %v6137_v43, %v3272_v45  ;;  %v2565_v49 = vpop.f32.mrb[88].mxu1  ;;  %vm3406_vm10 = vcmp.ge.f32.partialorder %v3342_v44, 0.0 }
 0x2c5   :  { %v3143_v50 = vpop.f32.mrb[88].mxu0  ;;  %v2567_v51 = vpop.f32.mrb[89].mxu1 }
 0x2c6   :  { %vm3407_vm11 = vcmp.ge.f32.partialorder %v3343_v48, 0.0  ;;  %v3471_v52 = vmul.f32 0.2, %v3343_v48  ;;  %v4565_v53 = vadd.f32 %v3143_v50, %v2565_v49  ;;  %v3145_v54 = vpop.f32.mrb[89].mxu0  ;;  %v2568_v55 = vpop.f32.mrb[90].mxu1  ;;  %v3534_v0 = vsel %vm3406_vm10, %v3342_v44, %v3470_v46 }
 0x2c7   :  { %v3146_v56 = vpop.f32.mrb[90].mxu0  ;;  %v2570_v57 = vpop.f32.mrb[91].mxu1 }
 0x2c8   :  { %v3535_v58 = vsel %vm3407_vm11, %v3343_v48, %v3471_v52  ;;  %v3273_v59 = vmul.f32 %v6131_v38, %v4565_v53  ;;  %v4566_v60 = vadd.f32 %v3146_v56, %v2568_v55  ;;  %v3148_v61 = vpop.f32.mrb[91].mxu0 }
 0x2c9   :  { %v4438_v62 = vpack.c.bf16 %v3535_v58, %v3534_v0 }
 0x2ca   :  { %v3344_v63 = vadd.f32 %v6137_v43, %v3273_v59  ;;  %v3274_v1 = vmul.f32 %v6131_v38, %v4566_v60 }
 0x2cb   :  { %4510 = vst [vmem:[%s6222_s4 + $0xa8] sm:$0xff] %v4438_v62  }
 0x2cc   :  { %v3472_v2 = vmul.f32 0.2, %v3344_v63  ;;  %v3345_v3 = vadd.f32 %v6137_v43, %v3274_v1  ;;  %v2573_v4 = vpop.f32.mrb[92].mxu1  ;;  %vm3408_vm12 = vcmp.ge.f32.partialorder %v3344_v63, 0.0 }
 0x2cd   :  { %v3151_v5 = vpop.f32.mrb[92].mxu0  ;;  %v2575_v6 = vpop.f32.mrb[93].mxu1 }
 0x2ce   :  { %vm3409_vm13 = vcmp.ge.f32.partialorder %v3345_v3, 0.0  ;;  %v3473_v7 = vmul.f32 0.2, %v3345_v3  ;;  %v4567_v8 = vadd.f32 %v3151_v5, %v2573_v4  ;;  %v3153_v9 = vpop.f32.mrb[93].mxu0  ;;  %v2576_v10 = vpop.f32.mrb[94].mxu1  ;;  %v3536_v13 = vsel %vm3408_vm12, %v3344_v63, %v3472_v2 }
 0x2cf   :  { %v3154_v11 = vpop.f32.mrb[94].mxu0  ;;  %v2578_v12 = vpop.f32.mrb[95].mxu1 }
 0x2d0   :  { %v3537_v14 = vsel %vm3409_vm13, %v3345_v3, %v3473_v7  ;;  %v3275_v15 = vmul.f32 %v6131_v38, %v4567_v8  ;;  %v4568_v16 = vadd.f32 %v3154_v11, %v2576_v10  ;;  %v3156_v17 = vpop.f32.mrb[95].mxu0 }
 0x2d1   :  { %v4443_v18 = vpack.c.bf16 %v3537_v14, %v3536_v13 }
 0x2d2   :  { %v3346_v19 = vadd.f32 %v6137_v43, %v3275_v15  ;;  %v3276_v20 = vmul.f32 %v6131_v38, %v4568_v16 }
 0x2d3   :  { %4511 = vst [vmem:[%s6222_s4 + $0xb0] sm:$0xff] %v4443_v18  }
 0x2d4   :  { %v3474_v21 = vmul.f32 0.2, %v3346_v19  ;;  %v3347_v22 = vadd.f32 %v6137_v43, %v3276_v20  ;;  %v2581_v23 = vpop.f32.mrb[96].mxu1  ;;  %vm3410_vm14 = vcmp.ge.f32.partialorder %v3346_v19, 0.0 }
 0x2d5   :  { %v3159_v24 = vpop.f32.mrb[96].mxu0  ;;  %v2583_v25 = vpop.f32.mrb[97].mxu1 }
 0x2d6   :  { %vm3411_vm15 = vcmp.ge.f32.partialorder %v3347_v22, 0.0  ;;  %v3475_v26 = vmul.f32 0.2, %v3347_v22  ;;  %v4569_v27 = vadd.f32 %v3159_v24, %v2581_v23  ;;  %v3161_v28 = vpop.f32.mrb[97].mxu0  ;;  %v2584_v29 = vpop.f32.mrb[98].mxu1  ;;  %v3538_v32 = vsel %vm3410_vm14, %v3346_v19, %v3474_v21 }
 0x2d7   :  { %v3162_v30 = vpop.f32.mrb[98].mxu0  ;;  %v2586_v31 = vpop.f32.mrb[99].mxu1 }
 0x2d8   :  { %v3539_v33 = vsel %vm3411_vm15, %v3347_v22, %v3475_v26  ;;  %v3277_v34 = vmul.f32 %v6131_v38, %v4569_v27  ;;  %v4570_v35 = vadd.f32 %v3162_v30, %v2584_v29  ;;  %v3164_v36 = vpop.f32.mrb[99].mxu0 }
 0x2d9   :  { %v4448_v37 = vpack.c.bf16 %v3539_v33, %v3538_v32 }
 0x2da   :  { %v3348_v39 = vadd.f32 %v6137_v43, %v3277_v34  ;;  %v3278_v47 = vmul.f32 %v6131_v38, %v4570_v35 }
 0x2db   :  { %4512 = vst [vmem:[%s6222_s4 + $0xb8] sm:$0xff] %v4448_v37  }
 0x2dc   :  { %v3476_v40 = vmul.f32 0.2, %v3348_v39  ;;  %v3349_v41 = vadd.f32 %v6137_v43, %v3278_v47  ;;  %v2589_v42 = vpop.f32.mrb[100].mxu1  ;;  %vm3412_vm0 = vcmp.ge.f32.partialorder %v3348_v39, 0.0 }
 0x2dd   :  { %v3167_v44 = vpop.f32.mrb[100].mxu0  ;;  %v2591_v45 = vpop.f32.mrb[101].mxu1 }
 0x2de   :  { %vm3413_vm1 = vcmp.ge.f32.partialorder %v3349_v41, 0.0  ;;  %v3477_v46 = vmul.f32 0.2, %v3349_v41  ;;  %v4571_v48 = vadd.f32 %v3167_v44, %v2589_v42  ;;  %v3169_v49 = vpop.f32.mrb[101].mxu0  ;;  %v2592_v50 = vpop.f32.mrb[102].mxu1  ;;  %v3540_v53 = vsel %vm3412_vm0, %v3348_v39, %v3476_v40 }
 0x2df   :  { %v3170_v51 = vpop.f32.mrb[102].mxu0  ;;  %v2594_v52 = vpop.f32.mrb[103].mxu1 }
 0x2e0   :  { %v3541_v54 = vsel %vm3413_vm1, %v3349_v41, %v3477_v46  ;;  %v3279_v55 = vmul.f32 %v6131_v38, %v4571_v48  ;;  %v4572_v56 = vadd.f32 %v3170_v51, %v2592_v50  ;;  %v3172_v57 = vpop.f32.mrb[103].mxu0 }
 0x2e1   :  { %v4453_v0 = vpack.c.bf16 %v3541_v54, %v3540_v53 }
 0x2e2   :  { %v3350_v58 = vadd.f32 %v6137_v43, %v3279_v55  ;;  %v3280_v59 = vmul.f32 %v6131_v38, %v4572_v56 }
 0x2e3   :  { %4513 = vst [vmem:[%s6222_s4 + $0xc0] sm:$0xff] %v4453_v0  }
 0x2e4   :  { %v3478_v60 = vmul.f32 0.2, %v3350_v58  ;;  %v3351_v61 = vadd.f32 %v6137_v43, %v3280_v59  ;;  %v2597_v62 = vpop.f32.mrb[104].mxu1  ;;  %vm3414_vm2 = vcmp.ge.f32.partialorder %v3350_v58, 0.0 }
 0x2e5   :  { %v3175_v63 = vpop.f32.mrb[104].mxu0  ;;  %v2599_v1 = vpop.f32.mrb[105].mxu1 }
 0x2e6   :  { %vm3415_vm3 = vcmp.ge.f32.partialorder %v3351_v61, 0.0  ;;  %v3479_v2 = vmul.f32 0.2, %v3351_v61  ;;  %v4573_v3 = vadd.f32 %v3175_v63, %v2597_v62  ;;  %v3177_v4 = vpop.f32.mrb[105].mxu0  ;;  %v2600_v5 = vpop.f32.mrb[106].mxu1  ;;  %v3542_v8 = vsel %vm3414_vm2, %v3350_v58, %v3478_v60 }
 0x2e7   :  { %v3178_v6 = vpop.f32.mrb[106].mxu0  ;;  %v2602_v7 = vpop.f32.mrb[107].mxu1 }
 0x2e8   :  { %v3543_v9 = vsel %vm3415_vm3, %v3351_v61, %v3479_v2  ;;  %v3281_v10 = vmul.f32 %v6131_v38, %v4573_v3  ;;  %v4574_v11 = vadd.f32 %v3178_v6, %v2600_v5  ;;  %v3180_v12 = vpop.f32.mrb[107].mxu0 }
 0x2e9   :  { %v4458_v13 = vpack.c.bf16 %v3543_v9, %v3542_v8 }
 0x2ea   :  { %v3352_v14 = vadd.f32 %v6137_v43, %v3281_v10  ;;  %v3282_v15 = vmul.f32 %v6131_v38, %v4574_v11 }
 0x2eb   :  { %4514 = vst [vmem:[%s6222_s4 + $0xc8] sm:$0xff] %v4458_v13  }
 0x2ec   :  { %v3480_v16 = vmul.f32 0.2, %v3352_v14  ;;  %v3353_v17 = vadd.f32 %v6137_v43, %v3282_v15  ;;  %v2605_v18 = vpop.f32.mrb[108].mxu1  ;;  %vm3416_vm4 = vcmp.ge.f32.partialorder %v3352_v14, 0.0 }
 0x2ed   :  { %v3183_v19 = vpop.f32.mrb[108].mxu0  ;;  %v2607_v20 = vpop.f32.mrb[109].mxu1 }
 0x2ee   :  { %vm3417_vm5 = vcmp.ge.f32.partialorder %v3353_v17, 0.0  ;;  %v3481_v21 = vmul.f32 0.2, %v3353_v17  ;;  %v4575_v22 = vadd.f32 %v3183_v19, %v2605_v18  ;;  %v3185_v23 = vpop.f32.mrb[109].mxu0  ;;  %v2608_v24 = vpop.f32.mrb[110].mxu1  ;;  %v3544_v27 = vsel %vm3416_vm4, %v3352_v14, %v3480_v16 }
 0x2ef   :  { %v3186_v25 = vpop.f32.mrb[110].mxu0  ;;  %v2610_v26 = vpop.f32.mrb[111].mxu1 }
 0x2f0   :  { %v3545_v28 = vsel %vm3417_vm5, %v3353_v17, %v3481_v21  ;;  %v3283_v29 = vmul.f32 %v6131_v38, %v4575_v22  ;;  %v4576_v30 = vadd.f32 %v3186_v25, %v2608_v24  ;;  %v3188_v31 = vpop.f32.mrb[111].mxu0 }
 0x2f1   :  { %v4463_v32 = vpack.c.bf16 %v3545_v28, %v3544_v27 }
 0x2f2   :  { %v3354_v33 = vadd.f32 %v6137_v43, %v3283_v29  ;;  %v3284_v34 = vmul.f32 %v6131_v38, %v4576_v30 }
 0x2f3   :  { %4515 = vst [vmem:[%s6222_s4 + $0xd0] sm:$0xff] %v4463_v32  }
 0x2f4   :  { %v3482_v35 = vmul.f32 0.2, %v3354_v33  ;;  %v3355_v36 = vadd.f32 %v6137_v43, %v3284_v34  ;;  %v2613_v37 = vpop.f32.mrb[112].mxu1  ;;  %vm3418_vm6 = vcmp.ge.f32.partialorder %v3354_v33, 0.0 }
 0x2f5   :  { %v3191_v39 = vpop.f32.mrb[112].mxu0  ;;  %v2615_v47 = vpop.f32.mrb[113].mxu1 }
 0x2f6   :  { %vm3419_vm7 = vcmp.ge.f32.partialorder %v3355_v36, 0.0  ;;  %v3483_v40 = vmul.f32 0.2, %v3355_v36  ;;  %v4577_v41 = vadd.f32 %v3191_v39, %v2613_v37  ;;  %v3193_v42 = vpop.f32.mrb[113].mxu0  ;;  %v2616_v44 = vpop.f32.mrb[114].mxu1  ;;  %v3546_v48 = vsel %vm3418_vm6, %v3354_v33, %v3482_v35 }
 0x2f7   :  { %v3194_v45 = vpop.f32.mrb[114].mxu0  ;;  %v2618_v46 = vpop.f32.mrb[115].mxu1 }
 0x2f8   :  { %v3547_v49 = vsel %vm3419_vm7, %v3355_v36, %v3483_v40  ;;  %v3285_v50 = vmul.f32 %v6131_v38, %v4577_v41  ;;  %v4578_v51 = vadd.f32 %v3194_v45, %v2616_v44  ;;  %v3196_v52 = vpop.f32.mrb[115].mxu0 }
 0x2f9   :  { %v4468_v53 = vpack.c.bf16 %v3547_v49, %v3546_v48 }
 0x2fa   :  { %v3356_v54 = vadd.f32 %v6137_v43, %v3285_v50  ;;  %v3286_v55 = vmul.f32 %v6131_v38, %v4578_v51 }
 0x2fb   :  { %4516 = vst [vmem:[%s6222_s4 + $0xd8] sm:$0xff] %v4468_v53  }
 0x2fc   :  { %v3484_v56 = vmul.f32 0.2, %v3356_v54  ;;  %v3357_v57 = vadd.f32 %v6137_v43, %v3286_v55  ;;  %v2621_v0 = vpop.f32.mrb[116].mxu1  ;;  %vm3420_vm8 = vcmp.ge.f32.partialorder %v3356_v54, 0.0 }
 0x2fd   :  { %v3199_v58 = vpop.f32.mrb[116].mxu0  ;;  %v2623_v59 = vpop.f32.mrb[117].mxu1 }
 0x2fe   :  { %vm3421_vm9 = vcmp.ge.f32.partialorder %v3357_v57, 0.0  ;;  %v3485_v60 = vmul.f32 0.2, %v3357_v57  ;;  %v4579_v61 = vadd.f32 %v3199_v58, %v2621_v0  ;;  %v3201_v62 = vpop.f32.mrb[117].mxu0  ;;  %v2624_v63 = vpop.f32.mrb[118].mxu1  ;;  %v3548_v3 = vsel %vm3420_vm8, %v3356_v54, %v3484_v56 }
 0x2ff   :  { %v3202_v1 = vpop.f32.mrb[118].mxu0  ;;  %v2626_v2 = vpop.f32.mrb[119].mxu1 }
 0x300   :  { %v3549_v4 = vsel %vm3421_vm9, %v3357_v57, %v3485_v60  ;;  %v3287_v5 = vmul.f32 %v6131_v38, %v4579_v61  ;;  %v4580_v6 = vadd.f32 %v3202_v1, %v2624_v63  ;;  %v3204_v7 = vpop.f32.mrb[119].mxu0 }
 0x301   :  { %v4473_v8 = vpack.c.bf16 %v3549_v4, %v3548_v3 }
 0x302   :  { %v3358_v9 = vadd.f32 %v6137_v43, %v3287_v5  ;;  %v3288_v10 = vmul.f32 %v6131_v38, %v4580_v6 }
 0x303   :  { %4517 = vst [vmem:[%s6222_s4 + $0xe0] sm:$0xff] %v4473_v8  }
 0x304   :  { %v3486_v11 = vmul.f32 0.2, %v3358_v9  ;;  %v3359_v12 = vadd.f32 %v6137_v43, %v3288_v10  ;;  %v2629_v13 = vpop.f32.mrb[120].mxu1  ;;  %vm3422_vm10 = vcmp.ge.f32.partialorder %v3358_v9, 0.0 }
 0x305   :  { %v3207_v14 = vpop.f32.mrb[120].mxu0  ;;  %v2631_v15 = vpop.f32.mrb[121].mxu1 }
 0x306   :  { %vm3423_vm11 = vcmp.ge.f32.partialorder %v3359_v12, 0.0  ;;  %v3487_v16 = vmul.f32 0.2, %v3359_v12  ;;  %v4581_v17 = vadd.f32 %v3207_v14, %v2629_v13  ;;  %v3209_v18 = vpop.f32.mrb[121].mxu0  ;;  %v2632_v19 = vpop.f32.mrb[122].mxu1  ;;  %v3550_v22 = vsel %vm3422_vm10, %v3358_v9, %v3486_v11 }
 0x307   :  { %v3210_v20 = vpop.f32.mrb[122].mxu0  ;;  %v2634_v21 = vpop.f32.mrb[123].mxu1 }
 0x308   :  { %v3551_v23 = vsel %vm3423_vm11, %v3359_v12, %v3487_v16  ;;  %v3289_v24 = vmul.f32 %v6131_v38, %v4581_v17  ;;  %v4582_v25 = vadd.f32 %v3210_v20, %v2632_v19  ;;  %v3212_v26 = vpop.f32.mrb[123].mxu0 }
 0x309   :  { %v4478_v27 = vpack.c.bf16 %v3551_v23, %v3550_v22 }
 0x30a   :  { %v3360_v28 = vadd.f32 %v6137_v43, %v3289_v24  ;;  %v3290_v29 = vmul.f32 %v6131_v38, %v4582_v25 }
 0x30b   :  { %4518 = vst [vmem:[%s6222_s4 + $0xe8] sm:$0xff] %v4478_v27  }
 0x30c   :  { %v3488_v30 = vmul.f32 0.2, %v3360_v28  ;;  %v3361_v31 = vadd.f32 %v6137_v43, %v3290_v29  ;;  %v2637_v32 = vpop.f32.mrb[124].mxu1  ;;  %vm3424_vm12 = vcmp.ge.f32.partialorder %v3360_v28, 0.0 }
 0x30d   :  { %v3215_v33 = vpop.f32.mrb[124].mxu0  ;;  %v2639_v34 = vpop.f32.mrb[125].mxu1 }
 0x30e   :  { %vm3425_vm13 = vcmp.ge.f32.partialorder %v3361_v31, 0.0  ;;  %v3489_v35 = vmul.f32 0.2, %v3361_v31  ;;  %v4583_v36 = vadd.f32 %v3215_v33, %v2637_v32  ;;  %v3217_v37 = vpop.f32.mrb[125].mxu0  ;;  %v2640_v39 = vpop.f32.mrb[126].mxu1  ;;  %v3552_v41 = vsel %vm3424_vm12, %v3360_v28, %v3488_v30 }
 0x30f   :  { %v3218_v47 = vpop.f32.mrb[126].mxu0  ;;  %v2642_v40 = vpop.f32.mrb[127].mxu1 }
 0x310   :  { %v3553_v42 = vsel %vm3425_vm13, %v3361_v31, %v3489_v35  ;;  %v3291_v44 = vmul.f32 %v6131_v38, %v4583_v36  ;;  %v4584_v45 = vadd.f32 %v3218_v47, %v2640_v39  ;;  %v3220_v46 = vpop.f32.mrb[127].mxu0 }
 0x311   :  { %v4483_v48 = vpack.c.bf16 %v3553_v42, %v3552_v41 }
 0x312   :  { %v3362_v49 = vadd.f32 %v6137_v43, %v3291_v44  ;;  %v3292_v50 = vmul.f32 %v6131_v38, %v4584_v45 }
 0x313   :  { %4519 = vst [vmem:[%s6222_s4 + $0xf0] sm:$0xff] %v4483_v48  }
 0x314   :  { %v3490_v51 = vmul.f32 0.2, %v3362_v49  ;;  %v3363_v52 = vadd.f32 %v6137_v43, %v3292_v50  ;;  %vm3426_vm14 = vcmp.ge.f32.partialorder %v3362_v49, 0.0 }
 0x316   :  { %vm3427_vm15 = vcmp.ge.f32.partialorder %v3363_v52, 0.0  ;;  %v3491_v53 = vmul.f32 0.2, %v3363_v52  ;;  %v3554_v54 = vsel %vm3426_vm14, %v3362_v49, %v3490_v51 }
 0x318   :  { %v3555_v55 = vsel %vm3427_vm15, %v3363_v52, %v3491_v53 }
 0x319   :  { %v4488_v56 = vpack.c.bf16 %v3555_v55, %v3554_v54 }
 0x31b   :  { %4520 = vst [vmem:[%s6222_s4 + $0xf8] sm:$0xff] %v4488_v56  }

// kernel: qz_xy_forward.5
= control target key start
LH: loop header
LB: loop body
LE: loop exit
PB: predicated region body
PF: predicated region fallthrough
CT: control target
= control target key end

     0   :  { %s4939_s30 = smov 0   ;;  %s5774_s0 = inlined_call_operand.vmem [shape: bf16[2,27648], index: 0, kind: input, shape index: {}]   ;;  %s5775_s1 = inlined_call_operand.vmem [shape: bf16[27648,64], index: 1, kind: input, shape index: {}]   ;;  %s5776_s2 = inlined_call_operand.vmem [shape: f32[1,64], index: 2, kind: input, shape index: {}]   ;;  %s5777_s3 = inlined_call_operand.vmem [shape: f32[2,64], index: 3, kind: input, shape index: {}]   ;;  %s5778_s4 = inlined_call_operand.vmem [shape: bf16[64,1024], index: 4, kind: input, shape index: {}]   ;;  %s5779_s5 = inlined_call_operand.vmem [shape: f32[1,1024], index: 5, kind: input, shape index: {}]   ;;  %s5780_s6 = inlined_call_operand.vmem [shape: f32[1,1024], index: 6, kind: input, shape index: {}]   ;;  %s5781_s7 = inlined_call_operand.vmem [shape: f32[1024,4], index: 7, kind: input, shape index: {}]   ;;  %s5782_s8 = inlined_call_operand.vmem [shape: f32[1,4], index: 8, kind: input, shape index: {}]   ;;  %s5783_s9 = inlined_call_operand.vmem [shape: f32[2,4], index: 9, kind: output, shape index: {}]  }
   0x1 LB: > { %s4945_s10 = sadd.s32 4294967295, %s4882_s30   ;;  %p3800_p0 = scmp.ge.s32.totalorder %s4882_s30, 1  ;;  %s4882_s30 = sphi %s4939_s30, %s19_s30  }
   0x2   : > { %p293_p1 = scmp.lt.s32.totalorder %s4882_s30, 9 }
   0x4   : > { %p294_p2 = pnand %p3800_p0, %p293_p1 }
   0x5   : > { %s328_s11 = smul.u32 (!%p294_p2), 27, %s4945_s10  ;;  %p3802_p5 = scmp.ne.s32.totalorder (!%p294_p2), %s4945_s10, 0 }
   0x6   : > { %297 = sbr.rel (%p294_p2) target bundleno = 956 (0x3bc), region = 56 }
   0x7   : > { %s333_s12 = smul.u32 (!%p294_p2), 432, %s4945_s10  ;;  %p329_p3 = scmp.lt.s32.totalorder (!%p294_p2), %s328_s11, 215 }
   0x9   : > { %p334_p4 = scmp.lt.s32.totalorder (!%p294_p2), %s333_s12, 3455 }
   0xd   : > { %s5785_s11 = smov (!%p329_p3, %s328_s11), 215  ;;  %s5787_s12 = smov (!%p334_p4, %s333_s12), 3455 }
   0xe   : > { %s4954_s15 = scalar_lea.vmem %s5774_s0, %s5785_s11  ;;  %s3801_s16 = sshll.u32 %s5787_s12, 2  ;;  %vm344_vm0 = vcmask (!%p3802_p5), 517120   ;;  %v4884_v0 = vmov (!%p3802_p5), 0.0  }
   0xf   : > { %s4959_s19 = scalar_lea.vmem %s5775_s1, %s3801_s16  ;;  %343 = sbr.rel (%p3802_p5) target bundleno = 22 (0x16), region = 60  ;;  %345 = vst.msk [vmem:[#allocation2] sm:$0x3] (!%p3802_p5), %vm344_vm0, %v4884_v0 }
  0x16 PF: > { %v4657_v1 = vld [vmem:[%s4959_s19 + $0x40] sm:$0xff]   ;;  %v4661_v5 = vld [vmem:[%s4959_s19 + $0x48] sm:$0xff]   ;;  %v4665_v9 = vld [vmem:[%s4959_s19 + $0x50] sm:$0xff]   ;;  %v791_v30 = vlaneseq  ;;  %v4885_v36 = vmov 1966171168   ;;  %vm4887_vm1 = vmmov 0  }
  0x17   : > { %v4658_v2 = vld [vmem:[%s4959_s19 + $0xc0] sm:$0xff]   ;;  %4061 = vmatprep.subr.bf16.mxu0 %v4657_v1  ;;  %v4662_v6 = vld [vmem:[%s4959_s19 + $0xc8] sm:$0xff]   ;;  %v4666_v10 = vld [vmem:[%s4959_s19 + $0xd0] sm:$0xff]   ;;  %v789_v37 = vunpack.c.l.s4 %v4885_v36  ;;  %vm2841_vm2 = vcmask 517120   ;;  %p4020_p6 = scmp.ne.s32.totalorder %s4945_s10, 7 }
  0x18   : > { %v4659_v3 = vld [vmem:[%s4959_s19] sm:$0xff]   ;;  %4083 = vmatprep.subr.bf16.mxu1 %v4658_v2  ;;  %v4663_v7 = vld [vmem:[%s4959_s19 + $0x8] sm:$0xff]   ;;  %v4667_v11 = vld [vmem:[%s4959_s19 + $0x10] sm:$0xff]   ;;  %v4994_v34 = vshrl.u32 %v791_v30, 7  ;;  %vm3051_vm3 = vcmask (!%p4020_p6), 523264   ;;  %vm3758_vm12 = vcmask (!%p4020_p6), 25600  }
  0x19   : > { %v4660_v4 = vld [vmem:[%s4959_s19 + $0x80] sm:$0xff]   ;;  %4062 = vmatpush3.bf16.msra.mxu0 %v4659_v3  ;;  %v4664_v8 = vld [vmem:[%s4959_s19 + $0x88] sm:$0xff]   ;;  %v4668_v12 = vld [vmem:[%s4959_s19 + $0x90] sm:$0xff]   ;;  %v790_v40 = vunpack.c.0.s8 %v789_v37 }
  0x1a   : > { %4084 = vmatpush3.bf16.msra.mxu1 %v4660_v4  ;;  %4063 = vmatprep.subr.bf16.mxu0 %v4661_v5  ;;  %v4669_v13 = vld [vmem:[%s4959_s19 + $0x58] sm:$0xff]   ;;  %v4673_v17 = vld [vmem:[%s4959_s19 + $0x60] sm:$0xff]   ;;  %v4677_v21 = vld [vmem:[%s4959_s19 + $0x68] sm:$0xff]  }
  0x1b   : > { %4085 = vmatprep.subr.bf16.mxu1 %v4662_v6  ;;  %v4670_v14 = vld [vmem:[%s4959_s19 + $0xd8] sm:$0xff]   ;;  %v4674_v18 = vld [vmem:[%s4959_s19 + $0xe0] sm:$0xff]   ;;  %v4678_v22 = vld [vmem:[%s4959_s19 + $0xe8] sm:$0xff]   ;;  %v5000_v42 = vsub.s32 %v790_v40, %v4994_v34 }
  0x1c   : > { %v4671_v15 = vld [vmem:[%s4959_s19 + $0x18] sm:$0xff]   ;;  %v4675_v19 = vld [vmem:[%s4959_s19 + $0x20] sm:$0xff]   ;;  %v4679_v23 = vld [vmem:[%s4959_s19 + $0x28] sm:$0xff]  }
  0x1d   : > { %4064 = vmatpush3.bf16.msra.mxu0 %v4663_v7  ;;  %v4672_v16 = vld [vmem:[%s4959_s19 + $0x98] sm:$0xff]   ;;  %v4676_v20 = vld [vmem:[%s4959_s19 + $0xa0] sm:$0xff]   ;;  %v4680_v24 = vld [vmem:[%s4959_s19 + $0xa8] sm:$0xff]  }
  0x1e   : > { %4086 = vmatpush3.bf16.msra.mxu1 %v4664_v8  ;;  %4065 = vmatprep.subr.bf16.mxu0 %v4665_v9  ;;  %v4681_v25 = vld [vmem:[%s4959_s19 + $0x70] sm:$0xff]   ;;  %v4685_v29 = vld [vmem:[%s4959_s19 + $0x78] sm:$0xff]   ;;  %v4690_v35 = vld [vmem:[%s4959_s19 + $0x140] sm:$0xff]  }
  0x1f   : > { %4087 = vmatprep.subr.bf16.mxu1 %v4666_v10  ;;  %v4682_v26 = vld [vmem:[%s4959_s19 + $0xf0] sm:$0xff]   ;;  %v4686_v31 = vld [vmem:[%s4959_s19 + $0xf8] sm:$0xff]   ;;  %v347_v38 = vld [vmem:[%s4954_s15] sm:$0xff] }
  0x20   : > { %v4683_v27 = vld [vmem:[%s4959_s19 + $0x30] sm:$0xff]   ;;  %v4687_v32 = vld [vmem:[%s4959_s19 + $0x38] sm:$0xff]   ;;  %v787_v39 = vcombine.high %v347_v38, %v347_v38  ;;  %v4692_v41 = vld [vmem:[%s4959_s19 + $0x1c0] sm:$0xff]   ;;  %v794_v43 = vrot.slane %v347_v38, %v5000_v42 }
  0x21   : > { %4066 = vmatpush3.bf16.msra.mxu0 %v4667_v11  ;;  %v4684_v28 = vld [vmem:[%s4959_s19 + $0xb0] sm:$0xff]   ;;  %v4688_v33 = vld [vmem:[%s4959_s19 + $0xb8] sm:$0xff]   ;;  %v4691_v49 = vld [vmem:[%s4959_s19 + $0x100] sm:$0xff]  }
  0x22   : > { %4088 = vmatpush3.bf16.msra.mxu1 %v4668_v12  ;;  %4067 = vmatprep.subr.bf16.mxu0 %v4669_v13  ;;  %v5004_v44 = vrot.slane %v787_v39, %v5000_v42  ;;  %v802_v45 = vcombine.high %v794_v43, %v794_v43  ;;  %v810_v46 = vrot.slane %v794_v43, %v5000_v42  ;;  %v4694_v52 = vld [vmem:[%s4959_s19 + $0x148] sm:$0xff]   ;;  %v4693_v54 = vld [vmem:[%s4959_s19 + $0x180] sm:$0xff]   ;;  %v4698_v58 = vld [vmem:[%s4959_s19 + $0x150] sm:$0xff]  }
  0x23   : > { %4089 = vmatprep.subr.bf16.mxu1 %v4670_v14  ;;  %v4696_v55 = vld [vmem:[%s4959_s19 + $0x1c8] sm:$0xff]   ;;  %v4700_v60 = vld [vmem:[%s4959_s19 + $0x1d0] sm:$0xff]   ;;  %v4702_v62 = vld [vmem:[%s4959_s19 + $0x158] sm:$0xff]  }
  0x24   : > { %v803_v47 = vcombine.high %v5004_v44, %v5004_v44  ;;  %v824_v48 = vrot.slane %v802_v45, %v5000_v42  ;;  %v832_v51 = vcombine.high %v810_v46, %v810_v46  ;;  %v4695_v57 = vld [vmem:[%s4959_s19 + $0x108] sm:$0xff]   ;;  %v4699_v61 = vld [vmem:[%s4959_s19 + $0x110] sm:$0xff]   ;;  %v4704_v0 = vld [vmem:[%s4959_s19 + $0x1d8] sm:$0xff]  }
  0x25   : > { %4068 = vmatpush3.bf16.msra.mxu0 %v4671_v15  ;;  %v4697_v59 = vld [vmem:[%s4959_s19 + $0x188] sm:$0xff]   ;;  %v4701_v63 = vld [vmem:[%s4959_s19 + $0x190] sm:$0xff]   ;;  %v4703_v1 = vld [vmem:[%s4959_s19 + $0x118] sm:$0xff]  }
  0x26   : > { %4090 = vmatpush3.bf16.msra.mxu1 %v4672_v16  ;;  %4069 = vmatprep.subr.bf16.mxu0 %v4673_v17  ;;  %v831_v50 = vrot.slane %v803_v47, %v5000_v42  ;;  %v834_v53 = vcombine.high %v824_v48, %v824_v48  ;;  %v4706_v2 = vld [vmem:[%s4959_s19 + $0x160] sm:$0xff]   ;;  %v4705_v3 = vld [vmem:[%s4959_s19 + $0x198] sm:$0xff]   ;;  %v4710_v6 = vld [vmem:[%s4959_s19 + $0x168] sm:$0xff]  }
  0x27   : > { %4091 = vmatprep.subr.bf16.mxu1 %v4674_v18  ;;  %2312 = vmatprep.mubr.bf16.mxu0 %v824_v48  ;;  %v4708_v4 = vld [vmem:[%s4959_s19 + $0x1e0] sm:$0xff]   ;;  %v4712_v8 = vld [vmem:[%s4959_s19 + $0x1e8] sm:$0xff]   ;;  %v4714_v10 = vld [vmem:[%s4959_s19 + $0x170] sm:$0xff]   ;;  %v817_v18 = vrot.slane %v5004_v44, %v5000_v42 }
  0x28   : > { %v835_v56 = vcombine.high %v831_v50, %v831_v50  ;;  %2352 = vmatprep.mubr.bf16.mxu1 %v834_v53  ;;  %v4707_v5 = vld [vmem:[%s4959_s19 + $0x120] sm:$0xff]   ;;  %v4711_v9 = vld [vmem:[%s4959_s19 + $0x128] sm:$0xff]   ;;  %v4716_v12 = vld [vmem:[%s4959_s19 + $0x1f0] sm:$0xff]  }
  0x29   : > { %4070 = vmatpush3.bf16.msra.mxu0 %v4675_v19  ;;  %v4709_v7 = vld [vmem:[%s4959_s19 + $0x1a0] sm:$0xff]   ;;  %v4713_v11 = vld [vmem:[%s4959_s19 + $0x1a8] sm:$0xff]   ;;  %v4715_v13 = vld [vmem:[%s4959_s19 + $0x130] sm:$0xff]  }
  0x2a   : > { %4092 = vmatpush3.bf16.msra.mxu1 %v4676_v20  ;;  %4071 = vmatprep.subr.bf16.mxu0 %v4677_v21  ;;  %v4718_v14 = vld [vmem:[%s4959_s19 + $0x178] sm:$0xff]   ;;  %v4717_v15 = vld [vmem:[%s4959_s19 + $0x1b0] sm:$0xff]   ;;  %v4722_v19 = vld [vmem:[%s4959_s19 + $0x240] sm:$0xff]  }
  0x2b   : > { %4093 = vmatprep.subr.bf16.mxu1 %v4678_v22  ;;  %v4720_v16 = vld [vmem:[%s4959_s19 + $0x1f8] sm:$0xff]   ;;  %v4724_v21 = vld [vmem:[%s4959_s19 + $0x2c0] sm:$0xff]   ;;  %v4732_v30 = vld [vmem:[%s4959_s19 + $0x2d0] sm:$0xff]  }
  0x2c   : > { %v4719_v17 = vld [vmem:[%s4959_s19 + $0x138] sm:$0xff]   ;;  %v4723_v22 = vld [vmem:[%s4959_s19 + $0x200] sm:$0xff]   ;;  %v4744_v44 = vld [vmem:[%s4959_s19 + $0x2e8] sm:$0xff]  }
  0x2d   : > { %4072 = vmatpush3.bf16.msra.mxu0 %v4679_v23  ;;  %v4721_v20 = vld [vmem:[%s4959_s19 + $0x1b8] sm:$0xff]   ;;  %v833_v23 = vcombine.high %v817_v18, %v817_v18  ;;  %v4738_v37 = vld [vmem:[%s4959_s19 + $0x260] sm:$0xff]   ;;  %v4743_v45 = vld [vmem:[%s4959_s19 + $0x228] sm:$0xff]  }
  0x2e   : > { %4094 = vmatpush3.bf16.msra.mxu1 %v4680_v24  ;;  %4073 = vmatprep.subr.bf16.mxu0 %v4681_v25  ;;  %v4726_v24 = vld [vmem:[%s4959_s19 + $0x248] sm:$0xff]   ;;  %v4725_v25 = vld [vmem:[%s4959_s19 + $0x280] sm:$0xff]   ;;  %v4735_v36 = vld [vmem:[%s4959_s19 + $0x218] sm:$0xff]  }
  0x2f   : > { %4095 = vmatprep.subr.bf16.mxu1 %v4682_v26  ;;  %v4728_v26 = vld [vmem:[%s4959_s19 + $0x2c8] sm:$0xff]   ;;  %v4737_v38 = vld [vmem:[%s4959_s19 + $0x298] sm:$0xff]   ;;  %v4740_v39 = vld [vmem:[%s4959_s19 + $0x2e0] sm:$0xff]  }
  0x30   : > { %v4739_v40 = vld [vmem:[%s4959_s19 + $0x220] sm:$0xff]   ;;  %v4746_v47 = vld [vmem:[%s4959_s19 + $0x270] sm:$0xff]  }
  0x31   : > { %4074 = vmatpush3.bf16.msra.mxu0 %v4683_v27  ;;  %v4727_v27 = vld [vmem:[%s4959_s19 + $0x208] sm:$0xff]   ;;  %v4741_v43 = vld [vmem:[%s4959_s19 + $0x2a0] sm:$0xff]  }
  0x32   : > { %4096 = vmatpush3.bf16.msra.mxu1 %v4684_v28  ;;  %4075 = vmatprep.subr.bf16.mxu0 %v4685_v29  ;;  %v4730_v28 = vld [vmem:[%s4959_s19 + $0x250] sm:$0xff]   ;;  %v4729_v29 = vld [vmem:[%s4959_s19 + $0x288] sm:$0xff]  }
  0x33   : > { %4097 = vmatprep.subr.bf16.mxu1 %v4686_v31  ;;  %v4731_v31 = vld [vmem:[%s4959_s19 + $0x210] sm:$0xff]  }
  0x35   : > { %4076 = vmatpush3.bf16.msra.mxu0 %v4687_v32  ;;  %v4734_v32 = vld [vmem:[%s4959_s19 + $0x258] sm:$0xff]  }
  0x36   : > { %4098 = vmatpush3.bf16.msra.mxu1 %v4688_v33  ;;  %4105 = vmatprep.subr.bf16.mxu0 %v4690_v35  ;;  %v4733_v33 = vld [vmem:[%s4959_s19 + $0x290] sm:$0xff]   ;;  %v4736_v35 = vld [vmem:[%s4959_s19 + $0x2d8] sm:$0xff]  }
  0x37   : > { %4127 = vmatprep.subr.bf16.mxu1 %v4692_v41  ;;  %v4742_v41 = vld [vmem:[%s4959_s19 + $0x268] sm:$0xff]  }
  0x38   : > { %2313 = vmatmul.mubr.bf16.vlgmr.msra.gmra.mrb[0].mxu0 %v810_v46  ;;  %v348_v46 = vld [vmem:[%s4954_s15 + $0x8] sm:$0xff] }
  0x39   : > { %4106 = vmatpush3.bf16.msra.mxu0 %v4691_v49  ;;  %2353 = vmatmul.mubr.bf16.vlgmr.msra.gmra.mrb[0].mxu1 %v832_v51  ;;  %v843_v48 = vrot.slane %v348_v46, %v5000_v42  ;;  %v836_v49 = vcombine.high %v348_v46, %v348_v46  ;;  %v4748_v51 = vld [vmem:[%s4959_s19 + $0x2f0] sm:$0xff]  }
  0x3a   : > { %4107 = vmatprep.subr.bf16.mxu0 %v4694_v52  ;;  %4128 = vmatpush3.bf16.msra.mxu1 %v4693_v54  ;;  %v4747_v54 = vld [vmem:[%s4959_s19 + $0x230] sm:$0xff]  }
  0x3b   : > { %2392 = vmatprep.mubr.bf16.mxu0 %v831_v50  ;;  %4129 = vmatprep.subr.bf16.mxu1 %v4696_v55  ;;  %v4745_v50 = vld [vmem:[%s4959_s19 + $0x2a8] sm:$0xff]   ;;  %v851_v52 = vcombine.high %v843_v48, %v843_v48  ;;  %v5072_v53 = vrot.slane %v836_v49, %v5000_v42  ;;  %v4750_v55 = vld [vmem:[%s4959_s19 + $0x278] sm:$0xff]   ;;  %v4795_v46 = vld [vmem:[%s4959_s19 + $0x450] sm:$0xff]  }
  0x3c   : > { %2432 = vmatprep.mubr.bf16.mxu1 %v835_v56  ;;  %v4796_v49 = vld [vmem:[%s4959_s19 + $0x410] sm:$0xff]  }
  0x3d   : > { %4108 = vmatpush3.bf16.msra.mxu0 %v4695_v57  ;;  %v873_v56 = vrot.slane %v851_v52, %v5000_v42  ;;  %v4749_v57 = vld [vmem:[%s4959_s19 + $0x2b0] sm:$0xff]   ;;  %v4801_v52 = vld [vmem:[%s4959_s19 + $0x4d8] sm:$0xff]  }
  0x3e   : > { %4109 = vmatprep.subr.bf16.mxu0 %v4698_v58  ;;  %4130 = vmatpush3.bf16.msra.mxu1 %v4697_v59  ;;  %v852_v58 = vcombine.high %v5072_v53, %v5072_v53  ;;  %v4752_v59 = vld [vmem:[%s4959_s19 + $0x2f8] sm:$0xff]  }
  0x3f   : > { %4131 = vmatprep.subr.bf16.mxu1 %v4700_v60  ;;  %v883_v60 = vcombine.high %v873_v56, %v873_v56 }
  0x41   : > { %4110 = vmatpush3.bf16.msra.mxu0 %v4699_v61  ;;  %v4751_v61 = vld [vmem:[%s4959_s19 + $0x238] sm:$0xff]  }
  0x42   : > { %4111 = vmatprep.subr.bf16.mxu0 %v4702_v62  ;;  %4132 = vmatpush3.bf16.msra.mxu1 %v4701_v63  ;;  %v859_v62 = vrot.slane %v843_v48, %v5000_v42  ;;  %v4754_v63 = vld [vmem:[%s4959_s19 + $0x340] sm:$0xff]   ;;  %v4797_v48 = vld [vmem:[%s4959_s19 + $0x4d0] sm:$0xff]  }
  0x43   : > { %4133 = vmatprep.subr.bf16.mxu1 %v4704_v0  ;;  %v4753_v0 = vld [vmem:[%s4959_s19 + $0x2b8] sm:$0xff]  }
  0x45   : > { %4112 = vmatpush3.bf16.msra.mxu0 %v4703_v1  ;;  %v880_v1 = vrot.slane %v852_v58, %v5000_v42  ;;  %v4807_v58 = vld [vmem:[%s4959_s19 + $0x468] sm:$0xff]  }
  0x46   : > { %4113 = vmatprep.subr.bf16.mxu0 %v4706_v2  ;;  %4134 = vmatpush3.bf16.msra.mxu1 %v4705_v3  ;;  %v4756_v2 = vld [vmem:[%s4959_s19 + $0x3c0] sm:$0xff]  }
  0x47   : > { %4135 = vmatprep.subr.bf16.mxu1 %v4708_v4  ;;  %v4755_v3 = vld [vmem:[%s4959_s19 + $0x300] sm:$0xff]   ;;  %v881_v4 = vcombine.high %v859_v62, %v859_v62 }
  0x49   : > { %4114 = vmatpush3.bf16.msra.mxu0 %v4707_v5  ;;  %v4758_v5 = vld [vmem:[%s4959_s19 + $0x348] sm:$0xff]  }
  0x4a   : > { %4115 = vmatprep.subr.bf16.mxu0 %v4710_v6  ;;  %4136 = vmatpush3.bf16.msra.mxu1 %v4709_v7  ;;  %v4757_v6 = vld [vmem:[%s4959_s19 + $0x380] sm:$0xff]   ;;  %v884_v7 = vcombine.high %v880_v1, %v880_v1 }
  0x4b   : > { %4137 = vmatprep.subr.bf16.mxu1 %v4712_v8  ;;  %v4760_v8 = vld [vmem:[%s4959_s19 + $0x3c8] sm:$0xff]  }
  0x4d   : > { %4116 = vmatpush3.bf16.msra.mxu0 %v4711_v9  ;;  %v4759_v9 = vld [vmem:[%s4959_s19 + $0x308] sm:$0xff]  }
  0x4e   : > { %4117 = vmatprep.subr.bf16.mxu0 %v4714_v10  ;;  %4138 = vmatpush3.bf16.msra.mxu1 %v4713_v11  ;;  %v4762_v10 = vld [vmem:[%s4959_s19 + $0x350] sm:$0xff]   ;;  %v4761_v11 = vld [vmem:[%s4959_s19 + $0x388] sm:$0xff]  }
  0x4f   : > { %4139 = vmatprep.subr.bf16.mxu1 %v4716_v12  ;;  %v4764_v12 = vld [vmem:[%s4959_s19 + $0x3d0] sm:$0xff]  }
  0x51   : > { %4118 = vmatpush3.bf16.msra.mxu0 %v4715_v13  ;;  %v4763_v13 = vld [vmem:[%s4959_s19 + $0x310] sm:$0xff]  }
  0x52   : > { %4119 = vmatprep.subr.bf16.mxu0 %v4718_v14  ;;  %4140 = vmatpush3.bf16.msra.mxu1 %v4717_v15  ;;  %v4766_v14 = vld [vmem:[%s4959_s19 + $0x358] sm:$0xff]   ;;  %v4765_v15 = vld [vmem:[%s4959_s19 + $0x390] sm:$0xff]  }
  0x53   : > { %4141 = vmatprep.subr.bf16.mxu1 %v4720_v16  ;;  %v4768_v16 = vld [vmem:[%s4959_s19 + $0x3d8] sm:$0xff]  }
  0x55   : > { %4120 = vmatpush3.bf16.msra.mxu0 %v4719_v17  ;;  %v4767_v17 = vld [vmem:[%s4959_s19 + $0x318] sm:$0xff]  }
  0x56   : > { %4149 = vmatprep.subr.bf16.mxu0 %v4722_v19  ;;  %4142 = vmatpush3.bf16.msra.mxu1 %v4721_v20  ;;  %v4769_v19 = vld [vmem:[%s4959_s19 + $0x398] sm:$0xff]   ;;  %v4772_v20 = vld [vmem:[%s4959_s19 + $0x3e0] sm:$0xff]  }
  0x57   : > { %4171 = vmatprep.subr.bf16.mxu1 %v4724_v21  ;;  %v4771_v21 = vld [vmem:[%s4959_s19 + $0x320] sm:$0xff]  }
  0x58   : > { %2393 = vmatmul.mubr.bf16.vlgmr.msra.gmra.mrb[4].mxu0 %v817_v18  ;;  %v4770_v18 = vld [vmem:[%s4959_s19 + $0x360] sm:$0xff]  }
  0x59   : > { %4150 = vmatpush3.bf16.msra.mxu0 %v4723_v22  ;;  %2433 = vmatmul.mubr.bf16.vlgmr.msra.gmra.mrb[4].mxu1 %v833_v23  ;;  %v4774_v22 = vld [vmem:[%s4959_s19 + $0x368] sm:$0xff]   ;;  %v4773_v23 = vld [vmem:[%s4959_s19 + $0x3a0] sm:$0xff]  }
  0x5a   : > { %4151 = vmatprep.subr.bf16.mxu0 %v4726_v24  ;;  %4172 = vmatpush3.bf16.msra.mxu1 %v4725_v25  ;;  %v4776_v24 = vld [vmem:[%s4959_s19 + $0x3e8] sm:$0xff]  }
  0x5b   : > { %4173 = vmatprep.subr.bf16.mxu1 %v4728_v26  ;;  %2472 = vmatprep.mubr.bf16.mxu0 %v873_v56  ;;  %v4775_v25 = vld [vmem:[%s4959_s19 + $0x328] sm:$0xff]   ;;  %v4778_v26 = vld [vmem:[%s4959_s19 + $0x370] sm:$0xff]   ;;  %v4805_v56 = vld [vmem:[%s4959_s19 + $0x4e0] sm:$0xff]  }
  0x5c   : > { %2512 = vmatprep.mubr.bf16.mxu1 %v883_v60  ;;  %v4809_v60 = vld [vmem:[%s4959_s19 + $0x4e8] sm:$0xff]  }
  0x5d   : > { %4152 = vmatpush3.bf16.msra.mxu0 %v4727_v27  ;;  %v4777_v27 = vld [vmem:[%s4959_s19 + $0x3a8] sm:$0xff]  }
  0x5e   : > { %4153 = vmatprep.subr.bf16.mxu0 %v4730_v28  ;;  %4174 = vmatpush3.bf16.msra.mxu1 %v4729_v29  ;;  %v4780_v28 = vld [vmem:[%s4959_s19 + $0x3f0] sm:$0xff]  }
  0x5f   : > { %4175 = vmatprep.subr.bf16.mxu1 %v4732_v30  ;;  %v4779_v29 = vld [vmem:[%s4959_s19 + $0x330] sm:$0xff]   ;;  %v4782_v30 = vld [vmem:[%s4959_s19 + $0x378] sm:$0xff]  }
  0x61   : > { %4154 = vmatpush3.bf16.msra.mxu0 %v4731_v31  ;;  %v4781_v31 = vld [vmem:[%s4959_s19 + $0x3b0] sm:$0xff]  }
  0x62   : > { %4155 = vmatprep.subr.bf16.mxu0 %v4734_v32  ;;  %4176 = vmatpush3.bf16.msra.mxu1 %v4733_v33  ;;  %v4784_v32 = vld [vmem:[%s4959_s19 + $0x3f8] sm:$0xff]  }
  0x63   : > { %4177 = vmatprep.subr.bf16.mxu1 %v4736_v35  ;;  %v4783_v33 = vld [vmem:[%s4959_s19 + $0x338] sm:$0xff]   ;;  %v866_v35 = vrot.slane %v5072_v53, %v5000_v42 }
  0x64   : > { %v4800_v53 = vld [vmem:[%s4959_s19 + $0x418] sm:$0xff]  }
  0x65   : > { %4156 = vmatpush3.bf16.msra.mxu0 %v4735_v36  ;;  %v4787_v36 = vld [vmem:[%s4959_s19 + $0x440] sm:$0xff]  }
  0x66   : > { %4157 = vmatprep.subr.bf16.mxu0 %v4738_v37  ;;  %4178 = vmatpush3.bf16.msra.mxu1 %v4737_v38  ;;  %v4786_v37 = vld [vmem:[%s4959_s19 + $0x3b8] sm:$0xff]   ;;  %v4789_v38 = vld [vmem:[%s4959_s19 + $0x4c0] sm:$0xff]  }
  0x67   : > { %4179 = vmatprep.subr.bf16.mxu1 %v4740_v39  ;;  %v4788_v39 = vld [vmem:[%s4959_s19 + $0x400] sm:$0xff]  }
  0x69   : > { %4158 = vmatpush3.bf16.msra.mxu0 %v4739_v40  ;;  %v882_v40 = vcombine.high %v866_v35, %v866_v35 }
  0x6a   : > { %4159 = vmatprep.subr.bf16.mxu0 %v4742_v41  ;;  %4180 = vmatpush3.bf16.msra.mxu1 %v4741_v43  ;;  %v4791_v41 = vld [vmem:[%s4959_s19 + $0x448] sm:$0xff]   ;;  %v4790_v43 = vld [vmem:[%s4959_s19 + $0x480] sm:$0xff]  }
  0x6b   : > { %4181 = vmatprep.subr.bf16.mxu1 %v4744_v44  ;;  %v4793_v44 = vld [vmem:[%s4959_s19 + $0x4c8] sm:$0xff]  }
  0x6d   : > { %4160 = vmatpush3.bf16.msra.mxu0 %v4743_v45  ;;  %v4792_v45 = vld [vmem:[%s4959_s19 + $0x408] sm:$0xff]  }
  0x6e   : > { %4161 = vmatprep.subr.bf16.mxu0 %v4746_v47  ;;  %4182 = vmatpush3.bf16.msra.mxu1 %v4745_v50  ;;  %v4794_v47 = vld [vmem:[%s4959_s19 + $0x488] sm:$0xff]   ;;  %v4799_v50 = vld [vmem:[%s4959_s19 + $0x458] sm:$0xff]  }
  0x6f   : > { %4183 = vmatprep.subr.bf16.mxu1 %v4748_v51  ;;  %v4798_v51 = vld [vmem:[%s4959_s19 + $0x490] sm:$0xff]  }
  0x71   : > { %4162 = vmatpush3.bf16.msra.mxu0 %v4747_v54  ;;  %v4803_v54 = vld [vmem:[%s4959_s19 + $0x460] sm:$0xff]  }
  0x72   : > { %4163 = vmatprep.subr.bf16.mxu0 %v4750_v55  ;;  %4184 = vmatpush3.bf16.msra.mxu1 %v4749_v57  ;;  %v4802_v55 = vld [vmem:[%s4959_s19 + $0x498] sm:$0xff]   ;;  %v4804_v57 = vld [vmem:[%s4959_s19 + $0x420] sm:$0xff]  }
  0x73   : > { %4185 = vmatprep.subr.bf16.mxu1 %v4752_v59  ;;  %v4806_v59 = vld [vmem:[%s4959_s19 + $0x4a0] sm:$0xff]  }
  0x75   : > { %4164 = vmatpush3.bf16.msra.mxu0 %v4751_v61  ;;  %v4808_v61 = vld [vmem:[%s4959_s19 + $0x428] sm:$0xff]  }
  0x76   : > { %4193 = vmatprep.subr.bf16.mxu0 %v4754_v63  ;;  %4186 = vmatpush3.bf16.msra.mxu1 %v4753_v0  ;;  %v4811_v63 = vld [vmem:[%s4959_s19 + $0x470] sm:$0xff]  }
  0x77   : > { %4215 = vmatprep.subr.bf16.mxu1 %v4756_v2  ;;  %v4810_v2 = vld [vmem:[%s4959_s19 + $0x4a8] sm:$0xff]  }
  0x78   : > { %2473 = vmatmul.mubr.bf16.vlgmr.msra.gmra.mrb[8].mxu0 %v859_v62  ;;  %v349_v62 = vld [vmem:[%s4954_s15 + $0x10] sm:$0xff] }
  0x79   : > { %4194 = vmatpush3.bf16.msra.mxu0 %v4755_v3  ;;  %2552 = vmatprep.mubr.bf16.mxu0 %v880_v1  ;;  %v892_v0 = vrot.slane %v349_v62, %v5000_v42  ;;  %v885_v1 = vcombine.high %v349_v62, %v349_v62  ;;  %v4813_v3 = vld [vmem:[%s4959_s19 + $0x4f0] sm:$0xff]   ;;  %v4857_v62 = vld [vmem:[%s4959_s19 + $0x688] sm:$0xff]  }
  0x7a   : > { %2513 = vmatmul.mubr.bf16.vlgmr.msra.gmra.mrb[8].mxu1 %v881_v4  ;;  %4195 = vmatprep.subr.bf16.mxu0 %v4758_v5 }
  0x7b   : > { %4216 = vmatpush3.bf16.msra.mxu1 %v4757_v6  ;;  %2592 = vmatprep.mubr.bf16.mxu1 %v884_v7  ;;  %v900_v4 = vcombine.high %v892_v0, %v892_v0  ;;  %v5148_v5 = vrot.slane %v885_v1, %v5000_v42  ;;  %v4812_v6 = vld [vmem:[%s4959_s19 + $0x430] sm:$0xff]   ;;  %v4815_v7 = vld [vmem:[%s4959_s19 + $0x478] sm:$0xff]  }
  0x7c   : > { %4217 = vmatprep.subr.bf16.mxu1 %v4760_v8  ;;  %v4860_v1 = vld [vmem:[%s4959_s19 + $0x690] sm:$0xff]  }
  0x7d   : > { %4196 = vmatpush3.bf16.msra.mxu0 %v4759_v9  ;;  %v922_v8 = vrot.slane %v900_v4, %v5000_v42  ;;  %v4814_v9 = vld [vmem:[%s4959_s19 + $0x4b0] sm:$0xff]   ;;  %v3803_v4 = vld.sshfl [vmem:[%s4954_s15 + $0x18] sm:$0x13 pattern:$0x75316420] }
  0x7e   : > { %4197 = vmatprep.subr.bf16.mxu0 %v4762_v10  ;;  %v901_v10 = vcombine.high %v5148_v5, %v5148_v5 }
  0x7f   : > { %4218 = vmatpush3.bf16.msra.mxu1 %v4761_v11  ;;  %v4817_v11 = vld [vmem:[%s4959_s19 + $0x4f8] sm:$0xff]  }
  0x80   : > { %4219 = vmatprep.subr.bf16.mxu1 %v4764_v12  ;;  %v932_v12 = vcombine.high %v922_v8, %v922_v8 }
  0x81   : > { %4198 = vmatpush3.bf16.msra.mxu0 %v4763_v13  ;;  %v4816_v13 = vld [vmem:[%s4959_s19 + $0x438] sm:$0xff]  }
  0x82   : > { %4199 = vmatprep.subr.bf16.mxu0 %v4766_v14  ;;  %v908_v14 = vrot.slane %v892_v0, %v5000_v42  ;;  %v4861_v0 = vld [vmem:[%s4959_s19 + $0x658] sm:$0xff]  }
  0x83   : > { %4220 = vmatpush3.bf16.msra.mxu1 %v4765_v15  ;;  %v4819_v15 = vld [vmem:[%s4959_s19 + $0x540] sm:$0xff]  }
  0x84   : > { %4221 = vmatprep.subr.bf16.mxu1 %v4768_v16  ;;  %v4818_v16 = vld [vmem:[%s4959_s19 + $0x4b8] sm:$0xff]  }
  0x85   : > { %4200 = vmatpush3.bf16.msra.mxu0 %v4767_v17  ;;  %v929_v17 = vrot.slane %v901_v10, %v5000_v42  ;;  %v4866_v10 = vld [vmem:[%s4959_s19 + $0x6a0] sm:$0xff]  }
  0x86   : > { %4201 = vmatprep.subr.bf16.mxu0 %v4770_v18  ;;  %v4821_v18 = vld [vmem:[%s4959_s19 + $0x5c0] sm:$0xff]  }
  0x87   : > { %4222 = vmatpush3.bf16.msra.mxu1 %v4769_v19  ;;  %v4820_v19 = vld [vmem:[%s4959_s19 + $0x500] sm:$0xff]  }
  0x88   : > { %4223 = vmatprep.subr.bf16.mxu1 %v4772_v20  ;;  %v930_v20 = vcombine.high %v908_v14, %v908_v14 }
  0x89   : > { %4202 = vmatpush3.bf16.msra.mxu0 %v4771_v21  ;;  %v4823_v21 = vld [vmem:[%s4959_s19 + $0x548] sm:$0xff]  }
  0x8a   : > { %4203 = vmatprep.subr.bf16.mxu0 %v4774_v22  ;;  %v4822_v22 = vld [vmem:[%s4959_s19 + $0x580] sm:$0xff]  }
  0x8b   : > { %4224 = vmatpush3.bf16.msra.mxu1 %v4773_v23  ;;  %v933_v23 = vcombine.high %v929_v17, %v929_v17 }
  0x8c   : > { %4225 = vmatprep.subr.bf16.mxu1 %v4776_v24  ;;  %v4825_v24 = vld [vmem:[%s4959_s19 + $0x5c8] sm:$0xff]  }
  0x8d   : > { %4204 = vmatpush3.bf16.msra.mxu0 %v4775_v25  ;;  %v4824_v25 = vld [vmem:[%s4959_s19 + $0x508] sm:$0xff]  }
  0x8e   : > { %4205 = vmatprep.subr.bf16.mxu0 %v4778_v26  ;;  %v4827_v26 = vld [vmem:[%s4959_s19 + $0x550] sm:$0xff]  }
  0x8f   : > { %4226 = vmatpush3.bf16.msra.mxu1 %v4777_v27  ;;  %v4826_v27 = vld [vmem:[%s4959_s19 + $0x588] sm:$0xff]  }
  0x90   : > { %4227 = vmatprep.subr.bf16.mxu1 %v4780_v28  ;;  %v4829_v28 = vld [vmem:[%s4959_s19 + $0x5d0] sm:$0xff]  }
  0x91   : > { %4206 = vmatpush3.bf16.msra.mxu0 %v4779_v29  ;;  %v4828_v29 = vld [vmem:[%s4959_s19 + $0x510] sm:$0xff]  }
  0x92   : > { %4207 = vmatprep.subr.bf16.mxu0 %v4782_v30  ;;  %v4831_v30 = vld [vmem:[%s4959_s19 + $0x558] sm:$0xff]  }
  0x93   : > { %4228 = vmatpush3.bf16.msra.mxu1 %v4781_v31  ;;  %v4830_v31 = vld [vmem:[%s4959_s19 + $0x590] sm:$0xff]  }
  0x94   : > { %4229 = vmatprep.subr.bf16.mxu1 %v4784_v32  ;;  %v4833_v32 = vld [vmem:[%s4959_s19 + $0x5d8] sm:$0xff]  }
  0x95   : > { %4208 = vmatpush3.bf16.msra.mxu0 %v4783_v33  ;;  %v4832_v33 = vld [vmem:[%s4959_s19 + $0x518] sm:$0xff]  }
  0x96   : > { %4237 = vmatprep.subr.bf16.mxu0 %v4787_v36  ;;  %v4834_v36 = vld [vmem:[%s4959_s19 + $0x598] sm:$0xff]  }
  0x97   : > { %4230 = vmatpush3.bf16.msra.mxu1 %v4786_v37  ;;  %v4837_v37 = vld [vmem:[%s4959_s19 + $0x5e0] sm:$0xff]  }
  0x98   : > { %2553 = vmatmul.mubr.bf16.vlgmr.msra.gmra.mrb[12].mxu0 %v866_v35  ;;  %4259 = vmatprep.subr.bf16.mxu1 %v4789_v38  ;;  %v4835_v35 = vld [vmem:[%s4959_s19 + $0x560] sm:$0xff]  }
  0x99   : > { %4238 = vmatpush3.bf16.msra.mxu0 %v4788_v39  ;;  %2632 = vmatprep.mubr.bf16.mxu0 %v922_v8  ;;  %v4836_v38 = vld [vmem:[%s4959_s19 + $0x520] sm:$0xff]   ;;  %v4839_v39 = vld [vmem:[%s4959_s19 + $0x568] sm:$0xff]  }
  0x9a   : > { %2593 = vmatmul.mubr.bf16.vlgmr.msra.gmra.mrb[12].mxu1 %v882_v40  ;;  %4239 = vmatprep.subr.bf16.mxu0 %v4791_v41  ;;  %v4838_v40 = vld [vmem:[%s4959_s19 + $0x5a0] sm:$0xff]   ;;  %v4841_v41 = vld [vmem:[%s4959_s19 + $0x5e8] sm:$0xff]  }
  0x9b   : > { %4260 = vmatpush3.bf16.msra.mxu1 %v4790_v43  ;;  %2672 = vmatprep.mubr.bf16.mxu1 %v932_v12  ;;  %v4840_v43 = vld [vmem:[%s4959_s19 + $0x528] sm:$0xff]   ;;  %v4870_v12 = vld [vmem:[%s4959_s19 + $0x670] sm:$0xff]  }
  0x9c   : > { %4261 = vmatprep.subr.bf16.mxu1 %v4793_v44  ;;  %v4843_v44 = vld [vmem:[%s4959_s19 + $0x570] sm:$0xff]  }
  0x9d   : > { %4240 = vmatpush3.bf16.msra.mxu0 %v4792_v45  ;;  %v4842_v45 = vld [vmem:[%s4959_s19 + $0x5a8] sm:$0xff]  }
  0x9e   : > { %4241 = vmatprep.subr.bf16.mxu0 %v4795_v46  ;;  %v4845_v46 = vld [vmem:[%s4959_s19 + $0x5f0] sm:$0xff]  }
  0x9f   : > { %4262 = vmatpush3.bf16.msra.mxu1 %v4794_v47  ;;  %v4844_v47 = vld [vmem:[%s4959_s19 + $0x530] sm:$0xff]  }
  0xa0   : > { %4263 = vmatprep.subr.bf16.mxu1 %v4797_v48  ;;  %v4847_v48 = vld [vmem:[%s4959_s19 + $0x578] sm:$0xff]  }
  0xa1   : > { %4242 = vmatpush3.bf16.msra.mxu0 %v4796_v49  ;;  %v4846_v49 = vld [vmem:[%s4959_s19 + $0x5b0] sm:$0xff]  }
  0xa2   : > { %4243 = vmatprep.subr.bf16.mxu0 %v4799_v50  ;;  %v4849_v50 = vld [vmem:[%s4959_s19 + $0x5f8] sm:$0xff]  }
  0xa3   : > { %4264 = vmatpush3.bf16.msra.mxu1 %v4798_v51  ;;  %v4848_v51 = vld [vmem:[%s4959_s19 + $0x538] sm:$0xff]  }
  0xa4   : > { %4265 = vmatprep.subr.bf16.mxu1 %v4801_v52  ;;  %v915_v52 = vrot.slane %v5148_v5, %v5000_v42  ;;  %v4863_v5 = vld [vmem:[%s4959_s19 + $0x698] sm:$0xff]  }
  0xa5   : > { %4244 = vmatpush3.bf16.msra.mxu0 %v4800_v53  ;;  %v4852_v53 = vld [vmem:[%s4959_s19 + $0x640] sm:$0xff]  }
  0xa6   : > { %4245 = vmatprep.subr.bf16.mxu0 %v4803_v54  ;;  %v4851_v54 = vld [vmem:[%s4959_s19 + $0x5b8] sm:$0xff]  }
  0xa7   : > { %4266 = vmatpush3.bf16.msra.mxu1 %v4802_v55  ;;  %v4853_v55 = vld [vmem:[%s4959_s19 + $0x600] sm:$0xff]  }
  0xa8   : > { %4267 = vmatprep.subr.bf16.mxu1 %v4805_v56  ;;  %v931_v56 = vcombine.high %v915_v52, %v915_v52 }
  0xa9   : > { %4246 = vmatpush3.bf16.msra.mxu0 %v4804_v57  ;;  %v4855_v57 = vld [vmem:[%s4959_s19 + $0x648] sm:$0xff]  }
  0xaa   : > { %4247 = vmatprep.subr.bf16.mxu0 %v4807_v58  ;;  %v4854_v58 = vld [vmem:[%s4959_s19 + $0x680] sm:$0xff]  }
  0xab   : > { %4268 = vmatpush3.bf16.msra.mxu1 %v4806_v59  ;;  %v4886_v59 = vmov 0.0  }
  0xac   : > { %4269 = vmatprep.subr.bf16.mxu1 %v4809_v60  ;;  %v4856_v60 = vld [vmem:[%s4959_s19 + $0x608] sm:$0xff]  }
  0xad   : > { %4248 = vmatpush3.bf16.msra.mxu0 %v4808_v61  ;;  %v4858_v61 = vld [vmem:[%s4959_s19 + $0x650] sm:$0xff]  }
  0xae   : > { %4249 = vmatprep.subr.bf16.mxu0 %v4811_v63  ;;  %v4859_v63 = vld [vmem:[%s4959_s19 + $0x610] sm:$0xff]  }
  0xaf   : > { %4270 = vmatpush3.bf16.msra.mxu1 %v4810_v2  ;;  %v4862_v2 = vld [vmem:[%s4959_s19 + $0x618] sm:$0xff]  }
  0xb0   : > { %4271 = vmatprep.subr.bf16.mxu1 %v4813_v3  ;;  %v4864_v3 = vld [vmem:[%s4959_s19 + $0x660] sm:$0xff]  }
  0xb1   : > { %4250 = vmatpush3.bf16.msra.mxu0 %v4812_v6  ;;  %v941_v6 = vcombine.high %v3803_v4, %v3803_v4 }
  0xb2   : > { %4251 = vmatprep.subr.bf16.mxu0 %v4815_v7  ;;  %v4865_v7 = vld [vmem:[%s4959_s19 + $0x620] sm:$0xff]  }
  0xb3   : > { %4272 = vmatpush3.bf16.msra.mxu1 %v4814_v9  ;;  %v955_v8 = vrot.slane %v941_v6, %v5000_v42  ;;  %v4867_v9 = vld [vmem:[%s4959_s19 + $0x668] sm:$0xff]  }
  0xb4   : > { %4273 = vmatprep.subr.bf16.mxu1 %v4817_v11  ;;  %v4868_v11 = vld [vmem:[%s4959_s19 + $0x628] sm:$0xff]  }
  0xb5   : > { %4252 = vmatpush3.bf16.msra.mxu0 %v4816_v13  ;;  %v4869_v13 = vld [vmem:[%s4959_s19 + $0x6a8] sm:$0xff]  }
  0xb6   : > { %4281 = vmatprep.subr.bf16.mxu0 %v4819_v15  ;;  %v4873_v15 = vld [vmem:[%s4959_s19 + $0x678] sm:$0xff]  }
  0xb7   : > { %4274 = vmatpush3.bf16.msra.mxu1 %v4818_v16  ;;  %v4872_v16 = vld [vmem:[%s4959_s19 + $0x6b0] sm:$0xff]  }
  0xb8   : > { %2633 = vmatmul.mubr.bf16.vlgmr.msra.gmra.mrb[16].mxu0 %v908_v14  ;;  %4303 = vmatprep.subr.bf16.mxu1 %v4821_v18  ;;  %v4871_v14 = vld [vmem:[%s4959_s19 + $0x630] sm:$0xff]   ;;  %v948_v18 = vrot.slane %v3803_v4, %v5000_v42 }
  0xb9   : > { %4282 = vmatpush3.bf16.msra.mxu0 %v4820_v19  ;;  %2712 = vmatprep.mubr.bf16.mxu0 %v929_v17  ;;  %v4874_v17 = vld [vmem:[%s4959_s19 + $0x638] sm:$0xff]  }
  0xba   : > { %2673 = vmatmul.mubr.bf16.vlgmr.msra.gmra.mrb[16].mxu1 %v930_v20  ;;  %4283 = vmatprep.subr.bf16.mxu0 %v4823_v21  ;;  %v4875_v19 = vld [vmem:[%s4959_s19 + $0x6b8] sm:$0xff]   ;;  %v956_v20 = vcombine.high %v948_v18, %v948_v18 }
  0xbb   : > { %4304 = vmatpush3.bf16.msra.mxu1 %v4822_v22  ;;  %2752 = vmatprep.mubr.bf16.mxu1 %v933_v23 }
  0xbc   : > { %4305 = vmatprep.subr.bf16.mxu1 %v4825_v24 }
  0xbd   : > { %4284 = vmatpush3.bf16.msra.mxu0 %v4824_v25 }
  0xbe   : > { %4285 = vmatprep.subr.bf16.mxu0 %v4827_v26 }
  0xbf   : > { %4306 = vmatpush3.bf16.msra.mxu1 %v4826_v27 }
  0xc0   : > { %4307 = vmatprep.subr.bf16.mxu1 %v4829_v28 }
  0xc1   : > { %4286 = vmatpush3.bf16.msra.mxu0 %v4828_v29 }
  0xc2   : > { %4287 = vmatprep.subr.bf16.mxu0 %v4831_v30 }
  0xc3   : > { %4308 = vmatpush3.bf16.msra.mxu1 %v4830_v31 }
  0xc4   : > { %4309 = vmatprep.subr.bf16.mxu1 %v4833_v32 }
  0xc5   : > { %4288 = vmatpush3.bf16.msra.mxu0 %v4832_v33 }
  0xc6   : > { %4289 = vmatprep.subr.bf16.mxu0 %v4835_v35 }
  0xc7   : > { %4310 = vmatpush3.bf16.msra.mxu1 %v4834_v36 }
  0xc8   : > { %4311 = vmatprep.subr.bf16.mxu1 %v4837_v37 }
  0xc9   : > { %4290 = vmatpush3.bf16.msra.mxu0 %v4836_v38 }
  0xca   : > { %4291 = vmatprep.subr.bf16.mxu0 %v4839_v39 }
  0xcb   : > { %4312 = vmatpush3.bf16.msra.mxu1 %v4838_v40 }
  0xcc   : > { %4313 = vmatprep.subr.bf16.mxu1 %v4841_v41 }
  0xcd   : > { %4292 = vmatpush3.bf16.msra.mxu0 %v4840_v43 }
  0xce   : > { %4293 = vmatprep.subr.bf16.mxu0 %v4843_v44 }
  0xcf   : > { %4314 = vmatpush3.bf16.msra.mxu1 %v4842_v45 }
  0xd0   : > { %4315 = vmatprep.subr.bf16.mxu1 %v4845_v46 }
  0xd1   : > { %4294 = vmatpush3.bf16.msra.mxu0 %v4844_v47 }
  0xd2   : > { %4295 = vmatprep.subr.bf16.mxu0 %v4847_v48 }
  0xd3   : > { %4316 = vmatpush3.bf16.msra.mxu1 %v4846_v49 }
  0xd4   : > { %4317 = vmatprep.subr.bf16.mxu1 %v4849_v50 }
  0xd5   : > { %4296 = vmatpush3.bf16.msra.mxu0 %v4848_v51 }
  0xd6   : > { %4325 = vmatprep.subr.bf16.mxu0 %v4852_v53 }
  0xd7   : > { %4318 = vmatpush3.bf16.msra.mxu1 %v4851_v54 }
  0xd8   : > { %2713 = vmatmul.mubr.bf16.vlgmr.msra.gmra.mrb[20].mxu0 %v915_v52  ;;  %4496 = vmatprep.subr.bf16.mxu1 %v4886_v59 }
  0xd9   : > { %4326 = vmatpush3.bf16.msra.mxu0 %v4853_v55  ;;  %2792 = vmatprep.mubr.bf16.mxu0 %v955_v8 }
  0xda   : > { %2753 = vmatmul.mubr.bf16.vlgmr.msra.gmra.mrb[20].mxu1 %v931_v56  ;;  %4327 = vmatprep.subr.bf16.mxu0 %v4855_v57 }
  0xdb   : > { %4497 = vmatpush3.bf16.msra.mxu1 %v4854_v58  ;;  %4512 = vmatprep.mubr.msk.bf16.mxu1 %vm4887_vm1, %v4886_v59 }
  0xdc   : > { %4498 = vmatprep.subr.bf16.mxu1 %v4886_v59 }
  0xdd   : > { %4328 = vmatpush3.bf16.msra.mxu0 %v4856_v60 }
  0xde   : > { %4329 = vmatprep.subr.bf16.mxu0 %v4858_v61 }
  0xdf   : > { %4499 = vmatpush3.bf16.msra.mxu1 %v4857_v62 }
  0xe0   : > { %4500 = vmatprep.subr.bf16.mxu1 %v4886_v59 }
  0xe1   : > { %4330 = vmatpush3.bf16.msra.mxu0 %v4859_v63 }
  0xe2   : > { %4331 = vmatprep.subr.bf16.mxu0 %v4861_v0 }
  0xe3   : > { %4501 = vmatpush3.bf16.msra.mxu1 %v4860_v1 }
  0xe4   : > { %4502 = vmatprep.subr.bf16.mxu1 %v4886_v59 }
  0xe5   : > { %4332 = vmatpush3.bf16.msra.mxu0 %v4862_v2 }
  0xe6   : > { %4333 = vmatprep.subr.bf16.mxu0 %v4864_v3 }
  0xe7   : > { %4503 = vmatpush3.bf16.msra.mxu1 %v4863_v5 }
  0xe8   : > { %4504 = vmatprep.subr.bf16.mxu1 %v4886_v59 }
  0xe9   : > { %4334 = vmatpush3.bf16.msra.mxu0 %v4865_v7 }
  0xea   : > { %4335 = vmatprep.subr.bf16.mxu0 %v4867_v9 }
  0xeb   : > { %4505 = vmatpush3.bf16.msra.mxu1 %v4866_v10 }
  0xec   : > { %4506 = vmatprep.subr.bf16.mxu1 %v4886_v59 }
  0xed   : > { %4336 = vmatpush3.bf16.msra.mxu0 %v4868_v11 }
  0xee   : > { %4337 = vmatprep.subr.bf16.mxu0 %v4870_v12 }
  0xef   : > { %4507 = vmatpush3.bf16.msra.mxu1 %v4869_v13 }
  0xf0   : > { %4508 = vmatprep.subr.bf16.mxu1 %v4886_v59 }
  0xf1   : > { %4338 = vmatpush3.bf16.msra.mxu0 %v4871_v14 }
  0xf2   : > { %4339 = vmatprep.subr.bf16.mxu0 %v4873_v15 }
  0xf3   : > { %4509 = vmatpush3.bf16.msra.mxu1 %v4872_v16 }
  0xf4   : > { %4510 = vmatprep.subr.bf16.mxu1 %v4886_v59 }
  0xf5   : > { %4340 = vmatpush3.bf16.msra.mxu0 %v4874_v17 }
  0xf7   : > { %4511 = vmatpush3.bf16.msra.mxu1 %v4875_v19 }
  0xf8   : > { %2793 = vmatmul.mubr.bf16.vlgmr.msra.gmra.mrb[24].mxu0 %v948_v18 }
  0xfa   : > { %4513 = vmatmul.mubr.bf16.vlgmr.msra.gmra.mrb[24].mxu1 %v956_v20 }
 0x10b   : > { %v4077_v21 = vpop.f32.mrb[0].mxu0 }
 0x10c   : > { %v4078_v22 = vpop.f32.mrb[1].mxu0  ;;  %v4099_v23 = vpop.f32.mrb[0].mxu1 }
 0x10d   : > { %v4079_v24 = vadd.f32 %v4078_v22, %v4077_v21  ;;  %v4080_v25 = vpop.f32.mrb[2].mxu0  ;;  %v4100_v26 = vpop.f32.mrb[1].mxu1 }
 0x10e   : > { %v4081_v27 = vpop.f32.mrb[3].mxu0  ;;  %v4101_v28 = vadd.f32 %v4100_v26, %v4099_v23  ;;  %v4102_v29 = vpop.f32.mrb[2].mxu1 }
 0x10f   : > { %v4103_v30 = vpop.f32.mrb[3].mxu1 }
 0x110   : > { %v2355_v31 = vadd.f32 %v4101_v28, %v4079_v24 }
 0x12b   : > { %v4121_v42 = vpop.f32.mrb[4].mxu0 }
 0x12c   : > { %v4122_v32 = vpop.f32.mrb[5].mxu0  ;;  %v4143_v36 = vpop.f32.mrb[4].mxu1 }
 0x12d   : > { %v4123_v33 = vadd.f32 %v4122_v32, %v4121_v42  ;;  %v4124_v35 = vpop.f32.mrb[6].mxu0  ;;  %v4144_v38 = vpop.f32.mrb[5].mxu1 }
 0x12e   : > { %v4125_v37 = vpop.f32.mrb[7].mxu0  ;;  %v4145_v40 = vadd.f32 %v4144_v38, %v4143_v36  ;;  %v4146_v41 = vpop.f32.mrb[6].mxu1  ;;  %v346_v38 = vld [vmem:[#allocation2] sm:$0x3] }
 0x12f   : > { %v2395_v39 = vadd.f32 %v4123_v33, %v2355_v31  ;;  %v4147_v43 = vpop.f32.mrb[7].mxu1 }
 0x130   : > { %v2859_v43 = vld [vmem:[%s5778_s4] sm:$0xff] (!%p4020_p6) }
 0x131   : > { %v2435_v44 = vadd.f32 %v4145_v40, %v2395_v39 }
 0x14b   : > { %v4165_v45 = vpop.f32.mrb[8].mxu0 }
 0x14c   : > { %v4166_v46 = vpop.f32.mrb[9].mxu0 }
 0x14d   : > { %v4167_v47 = vadd.f32 %v4166_v46, %v4165_v45  ;;  %v4168_v48 = vpop.f32.mrb[10].mxu0  ;;  %v4187_v49 = vpop.f32.mrb[8].mxu1  ;;  %v2860_v45 = vld [vmem:[%s5778_s4 + $0x8] sm:$0xff] (!%p4020_p6) }
 0x14e   : > { %v4169_v50 = vpop.f32.mrb[11].mxu0  ;;  %v4188_v51 = vpop.f32.mrb[9].mxu1 }
 0x14f   : > { %v2475_v52 = vadd.f32 %v4167_v47, %v2435_v44  ;;  %v4189_v53 = vadd.f32 %v4188_v51, %v4187_v49  ;;  %v4190_v54 = vpop.f32.mrb[10].mxu1  ;;  %v2863_v44 = vld [vmem:[%s5778_s4 + $0x20] sm:$0xff] (!%p4020_p6)  ;;  %v2864_v47 = vld [vmem:[%s5778_s4 + $0x28] sm:$0xff] (!%p4020_p6)  ;;  %v4888_v51 = vmov (!%p4020_p6), 0  }
 0x150   : > { %v4191_v55 = vpop.f32.mrb[11].mxu1  ;;  %v4023_v46 = vcombine.high (!%p4020_p6), %v2859_v43, %v2863_v44  ;;  %v4022_v48 = vcombine.low (!%p4020_p6), %v2859_v43, %v2863_v44  ;;  %v2867_v49 = vld [vmem:[%s5778_s4 + $0x40] sm:$0xff] (!%p4020_p6)  ;;  %3087 = vmatprep.mubr.bf16.mxu0 (!%p4020_p6), %v4888_v51  ;;  %3128 = vmatprep.mubr.bf16.mxu1 (!%p4020_p6), %v4888_v51  ;;  %v2886_v43 = vld [vmem:[%s5778_s4 + $0xd8] sm:$0xff] (!%p4020_p6) }
 0x151   : > { %v2515_v56 = vadd.f32 %v4189_v53, %v2475_v52  ;;  %v2871_v50 = vld [vmem:[%s5778_s4 + $0x60] sm:$0xff] (!%p4020_p6)  ;;  %v4025_v52 = vcombine.high (!%p4020_p6), %v2860_v45, %v2864_v47  ;;  %v4024_v53 = vcombine.low (!%p4020_p6), %v2860_v45, %v2864_v47  ;;  %v2868_v55 = vld [vmem:[%s5778_s4 + $0x48] sm:$0xff] (!%p4020_p6)  ;;  %v2890_v44 = vld [vmem:[%s5778_s4 + $0xf8] sm:$0xff] (!%p4020_p6) }
 0x152   : > { %v4031_v54 = vcombine.high (!%p4020_p6), %v2867_v49, %v2871_v50  ;;  %3055 = vmatprep.subr.bf16.mxu0 (!%p4020_p6), %v4023_v46 }
 0x153   : > { %3096 = vmatprep.subr.bf16.mxu1 (!%p4020_p6), %v4025_v52  ;;  %3056 = vmatpush1.bf16.msra.mxu0 (!%p4020_p6), %v4022_v48  ;;  %v4053_v48 = vcombine.high (!%p4020_p6), %v2886_v43, %v2890_v44  ;;  %v3392_v52 = vld [vmem:[%s5781_s7 + $0x188] sm:$0xff] (!%p4020_p6) }
 0x154   : > { %3097 = vmatpush1.bf16.msra.mxu1 (!%p4020_p6), %v4024_v53  ;;  %3057 = vmatprep.subr.bf16.mxu0 (!%p4020_p6), %v4031_v54  ;;  %v4052_v54 = vcombine.low (!%p4020_p6), %v2886_v43, %v2890_v44  ;;  %v3383_v43 = vld [vmem:[%s5781_s7 + $0x140] sm:$0xff] (!%p4020_p6) }
 0x16b   : > { %v4209_v57 = vpop.f32.mrb[12].mxu0 }
 0x16c   : > { %v4210_v58 = vpop.f32.mrb[13].mxu0 }
 0x16d   : > { %v4211_v59 = vadd.f32 %v4210_v58, %v4209_v57  ;;  %v4212_v60 = vpop.f32.mrb[14].mxu0  ;;  %v4231_v61 = vpop.f32.mrb[12].mxu1  ;;  %v2875_v57 = vld [vmem:[%s5778_s4 + $0x80] sm:$0xff] (!%p4020_p6) }
 0x16e   : > { %v4213_v62 = vpop.f32.mrb[15].mxu0  ;;  %v4232_v63 = vpop.f32.mrb[13].mxu1  ;;  %v2876_v60 = vld [vmem:[%s5778_s4 + $0x88] sm:$0xff] (!%p4020_p6) }
 0x16f   : > { %v2555_v0 = vadd.f32 %v4211_v59, %v2515_v56  ;;  %v4233_v1 = vadd.f32 %v4232_v63, %v4231_v61  ;;  %v4234_v2 = vpop.f32.mrb[14].mxu1  ;;  %v2872_v56 = vld [vmem:[%s5778_s4 + $0x68] sm:$0xff] (!%p4020_p6)  ;;  %v2879_v59 = vld [vmem:[%s5778_s4 + $0xa0] sm:$0xff] (!%p4020_p6)  ;;  %v4030_v62 = vcombine.low (!%p4020_p6), %v2867_v49, %v2871_v50 }
 0x170   : > { %v4235_v3 = vpop.f32.mrb[15].mxu1  ;;  %v4033_v58 = vcombine.high (!%p4020_p6), %v2868_v55, %v2872_v56  ;;  %v2880_v61 = vld [vmem:[%s5778_s4 + $0xa8] sm:$0xff] (!%p4020_p6)  ;;  %v4032_v63 = vcombine.low (!%p4020_p6), %v2868_v55, %v2872_v56  ;;  %v4021_v2 = vld [vmem:[%s5776_s2] ss:$0 sm:$0xff] (!%p4020_p6) }
 0x171   : > { %v2595_v4 = vadd.f32 %v4233_v1, %v2555_v0  ;;  %v4039_v0 = vcombine.high (!%p4020_p6), %v2875_v57, %v2879_v59  ;;  %v4041_v3 = vcombine.high (!%p4020_p6), %v2876_v60, %v2880_v61  ;;  %3058 = vmatpush1.bf16.msra.mxu0 (!%p4020_p6), %v4030_v62  ;;  %v3359_v49 = vld [vmem:[%s5781_s7 + $0x80] sm:$0xff] (!%p4020_p6)  ;;  %v3360_v50 = vld [vmem:[%s5781_s7 + $0x88] sm:$0xff] (!%p4020_p6)  ;;  %v3362_v62 = vld [vmem:[%s5781_s7 + $0x98] sm:$0xff] (!%p4020_p6) }
 0x172   : > { %3098 = vmatprep.subr.bf16.mxu1 (!%p4020_p6), %v4033_v58  ;;  %v4516_v55 = vpack.c.bf16 (!%p4020_p6), %v3360_v50, %v3359_v49  ;;  %v3343_v56 = vld [vmem:[%s5781_s7] sm:$0xff] (!%p4020_p6)  ;;  %v3402_v49 = vld [vmem:[%s5781_s7 + $0x1d8] sm:$0xff] (!%p4020_p6) }
 0x173   : > { %3099 = vmatpush1.bf16.msra.mxu1 (!%p4020_p6), %v4032_v63  ;;  %3059 = vmatprep.subr.bf16.mxu0 (!%p4020_p6), %v4039_v0  ;;  %v3375_v58 = vld [vmem:[%s5781_s7 + $0x100] sm:$0xff] (!%p4020_p6)  ;;  %v3393_v63 = vld [vmem:[%s5781_s7 + $0x190] sm:$0xff] (!%p4020_p6)  ;;  %v3394_v0 = vld [vmem:[%s5781_s7 + $0x198] sm:$0xff] (!%p4020_p6) }
 0x174   : > { %3100 = vmatprep.subr.bf16.mxu1 (!%p4020_p6), %v4041_v3 }
 0x18b   : > { %v4253_v5 = vpop.f32.mrb[16].mxu0 }
 0x18c   : > { %v4254_v6 = vpop.f32.mrb[17].mxu0 }
 0x18d   : > { %v4255_v7 = vadd.f32 %v4254_v6, %v4253_v5  ;;  %v4256_v8 = vpop.f32.mrb[18].mxu0  ;;  %v4275_v9 = vpop.f32.mrb[16].mxu1  ;;  %v2887_v5 = vld [vmem:[%s5778_s4 + $0xe0] sm:$0xff] (!%p4020_p6)  ;;  %v2884_v6 = vld [vmem:[%s5778_s4 + $0xc8] sm:$0xff] (!%p4020_p6) }
 0x18e   : > { %v4257_v10 = vpop.f32.mrb[19].mxu0  ;;  %v4276_v11 = vpop.f32.mrb[17].mxu1 }
 0x18f   : > { %v2635_v12 = vadd.f32 %v4255_v7, %v2595_v4  ;;  %v4277_v13 = vadd.f32 %v4276_v11, %v4275_v9  ;;  %v4278_v14 = vpop.f32.mrb[18].mxu1  ;;  %v2883_v4 = vld [vmem:[%s5778_s4 + $0xc0] sm:$0xff] (!%p4020_p6)  ;;  %v2888_v7 = vld [vmem:[%s5778_s4 + $0xe8] sm:$0xff] (!%p4020_p6)  ;;  %v4038_v9 = vcombine.low (!%p4020_p6), %v2875_v57, %v2879_v59  ;;  %v4040_v11 = vcombine.low (!%p4020_p6), %v2876_v60, %v2880_v61  ;;  %v3361_v61 = vld [vmem:[%s5781_s7 + $0x90] sm:$0xff] (!%p4020_p6) }
 0x190   : > { %v4279_v15 = vpop.f32.mrb[19].mxu1  ;;  %v2856_v10 = vld [vmem:[%s5777_s3] sm:$0x3] (!%p4020_p6)  ;;  %v2861_v14 = vld [vmem:[%s5778_s4 + $0x10] sm:$0xff] (!%p4020_p6)  ;;  %v3344_v57 = vld [vmem:[%s5781_s7 + $0x8] sm:$0xff] (!%p4020_p6)  ;;  %v4520_v3 = vpack.c.bf16 (!%p4020_p6), %v3362_v62, %v3361_v61 }
 0x191   : > { %v2675_v16 = vadd.f32 %v4277_v13, %v2635_v12  ;;  %v4047_v12 = vcombine.high (!%p4020_p6), %v2883_v4, %v2887_v5  ;;  %v4049_v13 = vcombine.high (!%p4020_p6), %v2884_v6, %v2888_v7  ;;  %v2865_v15 = vld [vmem:[%s5778_s4 + $0x30] sm:$0xff] (!%p4020_p6)  ;;  %3060 = vmatpush1.bf16.msra.mxu0 (!%p4020_p6), %v4038_v9  ;;  %3101 = vmatpush1.bf16.msra.mxu1 (!%p4020_p6), %v4040_v11  ;;  %v3376_v60 = vld [vmem:[%s5781_s7 + $0x108] sm:$0xff] (!%p4020_p6)  ;;  %v3363_v9 = vld [vmem:[%s5781_s7 + $0xa0] sm:$0xff] (!%p4020_p6) }
 0x192   : > { %v3395_v11 = vld [vmem:[%s5781_s7 + $0x1a0] sm:$0xff] (!%p4020_p6)  ;;  %v3372_v61 = vld [vmem:[%s5781_s7 + $0xe8] sm:$0xff] (!%p4020_p6) }
 0x193   : > { %3061 = vmatprep.subr.bf16.mxu0 (!%p4020_p6), %v4047_v12  ;;  %3102 = vmatprep.subr.bf16.mxu1 (!%p4020_p6), %v4049_v13  ;;  %v3396_v12 = vld [vmem:[%s5781_s7 + $0x1a8] sm:$0xff] (!%p4020_p6) }
 0x1ab   : > { %v4297_v17 = vpop.f32.mrb[20].mxu0 }
 0x1ac   : > { %v4298_v18 = vpop.f32.mrb[21].mxu0 }
 0x1ad   : > { %v4299_v19 = vadd.f32 %v4298_v18, %v4297_v17  ;;  %v4300_v20 = vpop.f32.mrb[22].mxu0  ;;  %v4319_v21 = vpop.f32.mrb[20].mxu1  ;;  %v2862_v17 = vld [vmem:[%s5778_s4 + $0x18] sm:$0xff] (!%p4020_p6) }
 0x1ae   : > { %v4301_v22 = vpop.f32.mrb[23].mxu0  ;;  %v4320_v23 = vpop.f32.mrb[21].mxu1  ;;  %v2866_v18 = vld [vmem:[%s5778_s4 + $0x38] sm:$0xff] (!%p4020_p6)  ;;  %v4048_v20 = vcombine.low (!%p4020_p6), %v2884_v6, %v2888_v7  ;;  %v3377_v6 = vld [vmem:[%s5781_s7 + $0x110] sm:$0xff] (!%p4020_p6)  ;;  %v4552_v7 = vpack.c.bf16 (!%p4020_p6), %v3394_v0, %v3393_v63  ;;  %v3403_v63 = vld [vmem:[%s5781_s7 + $0x1e0] sm:$0xff] (!%p4020_p6) }
 0x1af   : > { %v2715_v24 = vadd.f32 %v4299_v19, %v2675_v16  ;;  %v4321_v25 = vadd.f32 %v4320_v23, %v4319_v21  ;;  %v4322_v26 = vpop.f32.mrb[22].mxu1  ;;  %v4046_v19 = vcombine.low (!%p4020_p6), %v2883_v4, %v2887_v5  ;;  %v4027_v21 = vcombine.high (!%p4020_p6), %v2861_v14, %v2865_v15  ;;  %v2869_v23 = vld [vmem:[%s5778_s4 + $0x50] sm:$0xff] (!%p4020_p6)  ;;  %v3346_v5 = vld [vmem:[%s5781_s7 + $0x18] sm:$0xff] (!%p4020_p6)  ;;  %v3404_v0 = vld [vmem:[%s5781_s7 + $0x1e8] sm:$0xff] (!%p4020_p6) }
 0x1b0   : > { %v4323_v27 = vpop.f32.mrb[23].mxu1  ;;  %v4029_v22 = vcombine.high (!%p4020_p6), %v2862_v17, %v2866_v18  ;;  %v2870_v26 = vld [vmem:[%s5778_s4 + $0x58] sm:$0xff] (!%p4020_p6)  ;;  %3103 = vmatpush1.bf16.msra.mxu1 (!%p4020_p6), %v4048_v20  ;;  %v3345_v4 = vld [vmem:[%s5781_s7 + $0x10] sm:$0xff] (!%p4020_p6)  ;;  %v3380_v20 = vld [vmem:[%s5781_s7 + $0x128] sm:$0xff] (!%p4020_p6) }
 0x1b1   : > { %v2755_v28 = vadd.f32 %v4321_v25, %v2715_v24  ;;  %v2873_v24 = vld [vmem:[%s5778_s4 + $0x70] sm:$0xff] (!%p4020_p6)  ;;  %v2874_v27 = vld [vmem:[%s5778_s4 + $0x78] sm:$0xff] (!%p4020_p6)  ;;  %3062 = vmatpush1.bf16.msra.mxu0 (!%p4020_p6), %v4046_v19  ;;  %v4522_v13 = vpack.c.bf16 (!%p4020_p6), %v3346_v5, %v3345_v4  ;;  %v4556_v19 = vpack.c.bf16 (!%p4020_p6), %v3396_v12, %v3395_v11  ;;  %v3387_v4 = vld [vmem:[%s5781_s7 + $0x160] sm:$0xff] (!%p4020_p6) }
 0x1b2   : > { %3137 = vmatprep.subr.bf16.mxu0 (!%p4020_p6), %v4027_v21  ;;  %3178 = vmatprep.subr.bf16.mxu1 (!%p4020_p6), %v4029_v22  ;;  %v3365_v21 = vld [vmem:[%s5781_s7 + $0xb0] sm:$0xff] (!%p4020_p6)  ;;  %v3366_v22 = vld [vmem:[%s5781_s7 + $0xb8] sm:$0xff] (!%p4020_p6) }
 0x1b3   : > { %v3406_v12 = vld [vmem:[%s5781_s7 + $0x1f8] sm:$0xff] (!%p4020_p6) }
 0x1cb   : > { %v4341_v29 = vpop.f32.mrb[24].mxu0 }
 0x1cc   : > { %v4342_v30 = vpop.f32.mrb[25].mxu0 }
 0x1cd   : > { %v4343_v31 = vadd.f32 %v4342_v30, %v4341_v29  ;;  %v4344_v42 = vpop.f32.mrb[26].mxu0  ;;  %v2834_v32 = vpop.f32.mrb[24].mxu1  ;;  %v4028_v29 = vcombine.low (!%p4020_p6), %v2862_v17, %v2866_v18  ;;  %v4035_v30 = vcombine.high (!%p4020_p6), %v2869_v23, %v2873_v24  ;;  %v3348_v17 = vld [vmem:[%s5781_s7 + $0x28] sm:$0xff] (!%p4020_p6)  ;;  %v3379_v18 = vld [vmem:[%s5781_s7 + $0x120] sm:$0xff] (!%p4020_p6) }
 0x1ce   : > { %v4345_v33 = vpop.f32.mrb[27].mxu0  ;;  %v4514_v35 = vpop.f32.mrb[25].mxu1  ;;  %v2877_v42 = vld [vmem:[%s5778_s4 + $0x90] sm:$0xff] (!%p4020_p6) }
 0x1cf   : > { %v2795_v36 = vadd.f32 %v4343_v31, %v2755_v28  ;;  %v2837_v37 = vpop.f32.mrb[26].mxu1  ;;  %2846 = sbr.rel (%p4020_p6) target bundleno = 956 (0x3bc), region = 64  ;;  %v4026_v28 = vcombine.low (!%p4020_p6), %v2861_v14, %v2865_v15  ;;  %v4037_v31 = vcombine.high (!%p4020_p6), %v2870_v26, %v2874_v27  ;;  %v2878_v33 = vld [vmem:[%s5778_s4 + $0x98] sm:$0xff] (!%p4020_p6) }
 0x1d0   : > { %v4515_v39 = vpop.f32.mrb[27].mxu1  ;;  %v2882_v35 = vld [vmem:[%s5778_s4 + $0xb8] sm:$0xff] (!%p4020_p6)  ;;  %v4036_v37 = vcombine.low (!%p4020_p6), %v2870_v26, %v2874_v27  ;;  %v4558_v26 = vpack.c.bf16 (!%p4020_p6), %v3380_v20, %v3379_v18  ;;  %v4528_v27 = vpack.c.bf16 (!%p4020_p6), %v3366_v22, %v3365_v21  ;;  %v3423_v20 = vld [vmem:[%s5781_s7 + $0x280] sm:$0xff] (!%p4020_p6)  ;;  %v3424_v21 = vld [vmem:[%s5781_s7 + $0x288] sm:$0xff] (!%p4020_p6) }
 0x1d1   : > { %v2835_v40 = vadd.f32 %v2834_v32, %v2795_v36  ;;  %v2881_v32 = vld [vmem:[%s5778_s4 + $0xb0] sm:$0xff] (!%p4020_p6)  ;;  %v4034_v36 = vcombine.low (!%p4020_p6), %v2869_v23, %v2873_v24  ;;  %v4045_v39 = vcombine.high (!%p4020_p6), %v2878_v33, %v2882_v35  ;;  %v4044_v46 = vcombine.low (!%p4020_p6), %v2878_v33, %v2882_v35  ;;  %v3398_v24 = vld [vmem:[%s5781_s7 + $0x1b8] sm:$0xff] (!%p4020_p6)  ;;  %v3368_v33 = vld [vmem:[%s5781_s7 + $0xc8] sm:$0xff] (!%p4020_p6) }
 0x1d2   : > { %v4042_v45 = vcombine.low (!%p4020_p6), %v2877_v42, %v2881_v32  ;;  %v3397_v23 = vld [vmem:[%s5781_s7 + $0x1b0] sm:$0xff] (!%p4020_p6)  ;;  %v3399_v35 = vld [vmem:[%s5781_s7 + $0x1c0] sm:$0xff] (!%p4020_p6)  ;;  %v3390_v18 = vld [vmem:[%s5781_s7 + $0x178] sm:$0xff] (!%p4020_p6) }
 0x1d3   : > { %v2840_v41 = vadd.f32 %v2835_v40, %v346_v38  ;;  %v4043_v38 = vcombine.high (!%p4020_p6), %v2877_v42, %v2881_v32  ;;  %v2885_v40 = vld [vmem:[%s5778_s4 + $0xd0] sm:$0xff] (!%p4020_p6)  ;;  %v3382_v42 = vld [vmem:[%s5781_s7 + $0x138] sm:$0xff] (!%p4020_p6)  ;;  %v3367_v32 = vld [vmem:[%s5781_s7 + $0xc0] sm:$0xff] (!%p4020_p6) }
 0x1d4   : > { %v3455_v22 = vld [vmem:[%s5781_s7 + $0x380] sm:$0xff] (!%p4020_p6) }
 0x1d5   : > { %2842 = vst.msk [vmem:[#allocation2] sm:$0x3] %vm2841_vm2, %v2840_v41  ;;  %v2889_v41 = vld [vmem:[%s5778_s4 + $0xf0] sm:$0xff] (!%p4020_p6) }
 0x1d6   : > { %v4051_v47 = vcombine.high %v2885_v40, %v2889_v41  ;;  %v4050_v53 = vcombine.low %v2885_v40, %v2889_v41  ;;  %v3351_v40 = vld [vmem:[%s5781_s7 + $0x40] sm:$0xff]  ;;  %v3352_v41 = vld [vmem:[%s5781_s7 + $0x48] sm:$0xff] }
 0x1d7   : > { %v4534_v50 = vpack.c.bf16 %v3352_v41, %v3351_v40 }
 0x1dc   : > { %v2847_v1 = vld [vmem:[#allocation2] sm:$0x3] }
 0x1dd   : > { %v2855_v8 = vadd.f32 %v4021_v2, %v2847_v1  ;;  %v4518_v1 = vpack.c.bf16 %v3344_v57, %v3343_v56  ;;  %v4550_v2 = vpack.c.bf16 %v3376_v60, %v3375_v58  ;;  %v3385_v56 = vld [vmem:[%s5781_s7 + $0x150] sm:$0xff]  ;;  %v3386_v57 = vld [vmem:[%s5781_s7 + $0x158] sm:$0xff]  ;;  %v3371_v60 = vld [vmem:[%s5781_s7 + $0xe0] sm:$0xff] }
 0x1de   : > { %v4540_v62 = vpack.c.bf16 %v3372_v61, %v3371_v60  ;;  %v3425_v60 = vld [vmem:[%s5781_s7 + $0x290] sm:$0xff] }
 0x1df   : > { %v2857_v16 = vmul.f32 %v2856_v10, %v2855_v8  ;;  %v3378_v8 = vld [vmem:[%s5781_s7 + $0x118] sm:$0xff]  ;;  %v3364_v10 = vld [vmem:[%s5781_s7 + $0xa8] sm:$0xff] }
 0x1e0   : > { %v4554_v14 = vpack.c.bf16 %v3378_v8, %v3377_v6  ;;  %v4524_v15 = vpack.c.bf16 %v3364_v10, %v3363_v9  ;;  %v3388_v6 = vld [vmem:[%s5781_s7 + $0x168] sm:$0xff]  ;;  %v3373_v8 = vld [vmem:[%s5781_s7 + $0xf0] sm:$0xff]  ;;  %v3374_v9 = vld [vmem:[%s5781_s7 + $0xf8] sm:$0xff] }
 0x1e1   : > { %v5297_v25 = vpack.c.bf16 %v2857_v16, %v2857_v16  ;;  %v3347_v16 = vld [vmem:[%s5781_s7 + $0x20] sm:$0xff]  ;;  %v3405_v10 = vld [vmem:[%s5781_s7 + $0x1f0] sm:$0xff]  ;;  %v4544_v11 = vpack.c.bf16 %v3374_v9, %v3373_v8 }
 0x1e2   : > { %v3409_v9 = vld [vmem:[%s5781_s7 + $0x210] sm:$0xff] }
 0x1e3   : > { %4054 = vmatmul.mubr.msk.bf16.vlgmr.msra.gmra.mrb[0].mxu0 %vm3051_vm3, %v5297_v25  ;;  %4055 = vmatmul.mubr.msk.bf16.vlgmr.msra.gmra.mrb[0].mxu1 %vm3051_vm3, %v5297_v25 }
 0x1e4   : > { %3138 = vmatpush1.bf16.msra.mxu0 %v4026_v28  ;;  %3179 = vmatpush1.bf16.msra.mxu1 %v4028_v29  ;;  %v3349_v28 = vld [vmem:[%s5781_s7 + $0x30] sm:$0xff]  ;;  %v3350_v29 = vld [vmem:[%s5781_s7 + $0x38] sm:$0xff] }
 0x1e5   : > { %3139 = vmatprep.subr.bf16.mxu0 %v4035_v30  ;;  %3180 = vmatprep.subr.bf16.mxu1 %v4037_v31  ;;  %v3381_v30 = vld [vmem:[%s5781_s7 + $0x130] sm:$0xff]  ;;  %v4560_v31 = vpack.c.bf16 %v3398_v24, %v3397_v23  ;;  %v4580_v23 = vpack.c.bf16 %v3424_v21, %v3423_v20  ;;  %v3456_v24 = vld [vmem:[%s5781_s7 + $0x388] sm:$0xff]  ;;  %v3243_v21 = vsub.s32 5, %v4994_v34 }
 0x1e6   : > { %3169 = vmatprep.mubr.bf16.mxu0 %v4888_v51  ;;  %3210 = vmatprep.mubr.bf16.mxu1 %v4888_v51  ;;  %v3391_v51 = vld [vmem:[%s5781_s7 + $0x180] sm:$0xff]  ;;  %v3460_v20 = vld [vmem:[%s5781_s7 + $0x3a8] sm:$0xff] }
 0x1e7   : > { %v4548_v59 = vpack.c.bf16 %v3392_v52, %v3391_v51 }
 0x1e8   : > { %3140 = vmatpush1.bf16.msra.mxu0 %v4034_v36  ;;  %3181 = vmatpush1.bf16.msra.mxu1 %v4036_v37  ;;  %v3400_v36 = vld [vmem:[%s5781_s7 + $0x1c8] sm:$0xff]  ;;  %v4530_v37 = vpack.c.bf16 %v3350_v29, %v3349_v28  ;;  %v3231_v28 = vsub.s32 2, %v4994_v34  ;;  %v3227_v29 = vsub.s32 1, %v4994_v34 }
 0x1e9   : > { %3141 = vmatprep.subr.bf16.mxu0 %v4043_v38  ;;  %3182 = vmatprep.subr.bf16.mxu1 %v4045_v39  ;;  %v4562_v38 = vpack.c.bf16 %v3382_v42, %v3381_v30  ;;  %v4532_v39 = vpack.c.bf16 %v3368_v33, %v3367_v32  ;;  %v4564_v44 = vpack.c.bf16 %v3400_v36, %v3399_v35  ;;  %v3235_v30 = vsub.s32 3, %v4994_v34 }
 0x1ec   : > { %3142 = vmatpush1.bf16.msra.mxu0 %v4042_v45  ;;  %3183 = vmatpush1.bf16.msra.mxu1 %v4044_v46  ;;  %v3384_v45 = vld [vmem:[%s5781_s7 + $0x148] sm:$0xff]  ;;  %v3369_v46 = vld [vmem:[%s5781_s7 + $0xd0] sm:$0xff] }
 0x1ed   : > { %3143 = vmatprep.subr.bf16.mxu0 %v4051_v47  ;;  %3184 = vmatprep.subr.bf16.mxu1 %v4053_v48  ;;  %v3370_v47 = vld [vmem:[%s5781_s7 + $0xd8] sm:$0xff]  ;;  %v3401_v48 = vld [vmem:[%s5781_s7 + $0x1d0] sm:$0xff]  ;;  %v4566_v51 = vpack.c.bf16 %v3384_v45, %v3383_v43 }
 0x1ee   : > { %v4536_v52 = vpack.c.bf16 %v3370_v47, %v3369_v46 }
 0x1f0   : > { %3144 = vmatpush1.bf16.msra.mxu0 %v4050_v53  ;;  %3185 = vmatpush1.bf16.msra.mxu1 %v4052_v54  ;;  %v3353_v53 = vld [vmem:[%s5781_s7 + $0x50] sm:$0xff]  ;;  %v3354_v54 = vld [vmem:[%s5781_s7 + $0x58] sm:$0xff] }
 0x1f1   : > { %4517 = vmatprep.subr.bf16.mxu0 %v4516_v55  ;;  %4549 = vmatprep.subr.bf16.mxu1 %v4548_v59  ;;  %v4568_v55 = vpack.c.bf16 %v3402_v49, %v3401_v48  ;;  %v4538_v58 = vpack.c.bf16 %v3354_v54, %v3353_v53  ;;  %v4570_v59 = vpack.c.bf16 %v3386_v57, %v3385_v56  ;;  %v3407_v53 = vld [vmem:[%s5781_s7 + $0x200] sm:$0xff]  ;;  %v3408_v54 = vld [vmem:[%s5781_s7 + $0x208] sm:$0xff] }
 0x1f3   : > { %4056 = vmatmul.mubr.msk.bf16.vlgmr.msra.gmra.mrb[4].mxu0 %vm3051_vm3, %v5297_v25  ;;  %4057 = vmatmul.mubr.msk.bf16.vlgmr.msra.gmra.mrb[4].mxu1 %vm3051_vm3, %v5297_v25  ;;  %v4526_v25 = vpack.c.bf16 %v3348_v17, %v3347_v16  ;;  %v3389_v17 = vld [vmem:[%s5781_s7 + $0x170] sm:$0xff] }
 0x1f4   : > { %4519 = vmatpush3.bf16.msra.mxu0 %v4518_v1  ;;  %4551 = vmatpush3.bf16.msra.mxu1 %v4550_v2  ;;  %v3355_v1 = vld [vmem:[%s5781_s7 + $0x60] sm:$0xff]  ;;  %v4572_v2 = vpack.c.bf16 %v3404_v0, %v3403_v63  ;;  %v3426_v63 = vld [vmem:[%s5781_s7 + $0x298] sm:$0xff]  ;;  %v3457_v0 = vld [vmem:[%s5781_s7 + $0x390] sm:$0xff] }
 0x1f5   : > { %4521 = vmatprep.subr.bf16.mxu0 %v4520_v3  ;;  %4553 = vmatprep.subr.bf16.mxu1 %v4552_v7  ;;  %v3356_v3 = vld [vmem:[%s5781_s7 + $0x68] sm:$0xff]  ;;  %v4574_v7 = vpack.c.bf16 %v3388_v6, %v3387_v4  ;;  %v4584_v8 = vpack.c.bf16 %v3426_v63, %v3425_v60 }
 0x1f6   : > { %v4542_v5 = vpack.c.bf16 %v3356_v3, %v3355_v1  ;;  %v3458_v1 = vld [vmem:[%s5781_s7 + $0x398] sm:$0xff] }
 0x1f8   : > { %4523 = vmatpush3.bf16.msra.mxu0 %v4522_v13  ;;  %4555 = vmatpush3.bf16.msra.mxu1 %v4554_v14  ;;  %v3357_v13 = vld [vmem:[%s5781_s7 + $0x70] sm:$0xff]  ;;  %v3358_v14 = vld [vmem:[%s5781_s7 + $0x78] sm:$0xff] }
 0x1f9   : > { %4525 = vmatprep.subr.bf16.mxu0 %v4524_v15  ;;  %4557 = vmatprep.subr.bf16.mxu1 %v4556_v19  ;;  %v4576_v15 = vpack.c.bf16 %v3406_v12, %v3405_v10  ;;  %v4546_v16 = vpack.c.bf16 %v3358_v14, %v3357_v13  ;;  %v4578_v19 = vpack.c.bf16 %v3390_v18, %v3389_v17  ;;  %v3410_v10 = vld [vmem:[%s5781_s7 + $0x218] sm:$0xff]  ;;  %v3428_v17 = vld [vmem:[%s5781_s7 + $0x2a8] sm:$0xff] }
 0x1fa   : > { %v4616_v14 = vpack.c.bf16 %v3458_v1, %v3457_v0 }
 0x1fc   : > { %4527 = vmatpush3.bf16.msra.mxu0 %v4526_v25  ;;  %4559 = vmatpush3.bf16.msra.mxu1 %v4558_v26  ;;  %v4612_v25 = vpack.c.bf16 %v3456_v24, %v3455_v22  ;;  %v3223_v26 = vsub.s32 0, %v4994_v34  ;;  %v4586_v22 = vpack.c.bf16 %v3410_v10, %v3409_v9  ;;  %v3239_v9 = vsub.s32 4, %v4994_v34  ;;  %v3433_v10 = vld [vmem:[%s5781_s7 + $0x2d0] sm:$0xff] }
 0x1fd   : > { %4529 = vmatprep.subr.bf16.mxu0 %v4528_v27  ;;  %4561 = vmatprep.subr.bf16.mxu1 %v4560_v31  ;;  %v5547_v27 = vld [vmem:[%s5779_s5] sm:$0xff] }
 0x1fe   : > { %v5555_v31 = vld [vmem:[%s5780_s6] sm:$0xff]  ;;  %v3224_v42 = vrot.slane %v5547_v27, %v3223_v26  ;;  %v3232_v32 = vrot.slane %v5547_v27, %v3231_v28  ;;  %v3228_v33 = vrot.slane %v5547_v27, %v3227_v29  ;;  %v3236_v36 = vrot.slane %v5547_v27, %v3235_v30 }
 0x1ff   : > { %v3274_v35 = vrot.slane %v5555_v31, %v3223_v26  ;;  %v3411_v26 = vld [vmem:[%s5781_s7 + $0x220] sm:$0xff] }
 0x200   : > { %4531 = vmatpush3.bf16.msra.mxu0 %v4530_v37  ;;  %4563 = vmatpush3.bf16.msra.mxu1 %v4562_v38  ;;  %v3282_v38 = vrot.slane %v5555_v31, %v3231_v28  ;;  %v3412_v28 = vld [vmem:[%s5781_s7 + $0x228] sm:$0xff] }
 0x201   : > { %4533 = vmatprep.subr.bf16.mxu0 %v4532_v39  ;;  %4565 = vmatprep.subr.bf16.mxu1 %v4564_v44  ;;  %v3278_v39 = vrot.slane %v5555_v31, %v3227_v29  ;;  %v3286_v44 = vrot.slane %v5555_v31, %v3235_v30  ;;  %v3443_v29 = vld [vmem:[%s5781_s7 + $0x320] sm:$0xff] }
 0x204   : > { %4535 = vmatpush3.bf16.msra.mxu0 %v4534_v50  ;;  %4567 = vmatpush3.bf16.msra.mxu1 %v4566_v51 }
 0x205   : > { %4537 = vmatprep.subr.bf16.mxu0 %v4536_v52  ;;  %4569 = vmatprep.subr.bf16.mxu1 %v4568_v55 }
 0x208   : > { %4539 = vmatpush3.bf16.msra.mxu0 %v4538_v58  ;;  %4571 = vmatpush3.bf16.msra.mxu1 %v4570_v59  ;;  %v3439_v58 = vld [vmem:[%s5781_s7 + $0x300] sm:$0xff]  ;;  %v3440_v59 = vld [vmem:[%s5781_s7 + $0x308] sm:$0xff] }
 0x209   : > { %4541 = vmatprep.subr.bf16.mxu0 %v4540_v62  ;;  %4573 = vmatprep.subr.bf16.mxu1 %v4572_v2 }
 0x20c   : > { %4543 = vmatpush3.bf16.msra.mxu0 %v4542_v5  ;;  %4575 = vmatpush3.bf16.msra.mxu1 %v4574_v7  ;;  %v4582_v5 = vpack.c.bf16 %v3408_v54, %v3407_v53  ;;  %v4614_v7 = vpack.c.bf16 %v3440_v59, %v3439_v58 }
 0x20d   : > { %4545 = vmatprep.subr.bf16.mxu0 %v4544_v11  ;;  %4577 = vmatprep.subr.bf16.mxu1 %v4576_v15  ;;  %v3441_v11 = vld [vmem:[%s5781_s7 + $0x310] sm:$0xff]  ;;  %v3442_v15 = vld [vmem:[%s5781_s7 + $0x318] sm:$0xff] }
 0x20e   : > { %v4618_v24 = vpack.c.bf16 %v3442_v15, %v3441_v11  ;;  %v3434_v11 = vld [vmem:[%s5781_s7 + $0x2d8] sm:$0xff]  ;;  %v3247_v15 = vsub.s32 6, %v4994_v34 }
 0x210   : > { %4547 = vmatpush3.bf16.msra.mxu0 %v4546_v16  ;;  %4579 = vmatpush3.bf16.msra.mxu1 %v4578_v19  ;;  %v3427_v16 = vld [vmem:[%s5781_s7 + $0x2a0] sm:$0xff] }
 0x211   : > { %4581 = vmatprep.subr.bf16.mxu0 %v4580_v23  ;;  %4613 = vmatprep.subr.bf16.mxu1 %v4612_v25  ;;  %v3459_v19 = vld [vmem:[%s5781_s7 + $0x3a0] sm:$0xff]  ;;  %v3251_v23 = vsub.s32 7, %v4994_v34  ;;  %v4588_v25 = vpack.c.bf16 %v3428_v17, %v3427_v16  ;;  %v3449_v34 = vld [vmem:[%s5781_s7 + $0x350] sm:$0xff] }
 0x212   : > { %v4620_v30 = vpack.c.bf16 %v3460_v20, %v3459_v19  ;;  %v4600_v20 = vpack.c.bf16 %v3434_v11, %v3433_v10 }
 0x213   : > { %v3302_v54 = vrot.slane %v5555_v31, %v3251_v23 }
 0x2b6   : > { %v3089_v37 = vpop.f32.mrb[0].mxu0  ;;  %v3130_v41 = vpop.f32.mrb[0].mxu1 }
 0x2b7   : > { %v3261_v40 = vmul.f32 %v3224_v42, %v3089_v37  ;;  %v3091_v43 = vpop.f32.mrb[1].mxu0  ;;  %v3263_v45 = vmul.f32 %v3232_v32, %v3130_v41  ;;  %v3132_v47 = vpop.f32.mrb[1].mxu1  ;;  %v3444_v42 = vld [vmem:[%s5781_s7 + $0x328] sm:$0xff]  ;;  %v3429_v32 = vld [vmem:[%s5781_s7 + $0x2b0] sm:$0xff]  ;;  %v3244_v37 = vrot.slane %v5547_v27, %v3243_v21 }
 0x2b8   : > { %v3262_v46 = vmul.f32 %v3228_v33, %v3091_v43  ;;  %v3093_v48 = vpop.f32.mrb[2].mxu0  ;;  %v3264_v50 = vmul.f32 %v3236_v36, %v3132_v47  ;;  %v3134_v51 = vpop.f32.mrb[2].mxu1  ;;  %v3430_v33 = vld [vmem:[%s5781_s7 + $0x2b8] sm:$0xff]  ;;  %v3413_v43 = vld [vmem:[%s5781_s7 + $0x230] sm:$0xff]  ;;  %v3294_v47 = vrot.slane %v5555_v31, %v3243_v21 }
 0x2b9   : > { %v3311_v49 = vadd.f32 %v3274_v35, %v3261_v40  ;;  %v3094_v52 = vpop.f32.mrb[3].mxu0  ;;  %v3313_v55 = vadd.f32 %v3282_v38, %v3263_v45  ;;  %v3135_v57 = vpop.f32.mrb[3].mxu1  ;;  %v3461_v35 = vld [vmem:[%s5781_s7 + $0x3b0] sm:$0xff]  ;;  %v3462_v36 = vld [vmem:[%s5781_s7 + $0x3b8] sm:$0xff]  ;;  %v4590_v38 = vpack.c.bf16 %v3412_v28, %v3411_v26  ;;  %v4622_v40 = vpack.c.bf16 %v3444_v42, %v3443_v29  ;;  %v3432_v51 = vld [vmem:[%s5781_s7 + $0x2c8] sm:$0xff] }
 0x2ba   : > { %v3312_v56 = vadd.f32 %v3278_v39, %v3262_v46  ;;  %v3314_v62 = vadd.f32 %v3286_v44, %v3264_v50  ;;  %v3252_v39 = vrot.slane %v5547_v27, %v3251_v23  ;;  %v4592_v41 = vpack.c.bf16 %v3430_v33, %v3429_v32  ;;  %v3414_v44 = vld [vmem:[%s5781_s7 + $0x238] sm:$0xff]  ;;  %v3445_v45 = vld [vmem:[%s5781_s7 + $0x330] sm:$0xff]  ;;  %v3431_v50 = vld [vmem:[%s5781_s7 + $0x2c0] sm:$0xff] }
 0x2bb   : > { %v3327_v61 = vmul.f32 0.2, %v3311_v49  ;;  %v3329_v2 = vmul.f32 0.2, %v3313_v55  ;;  %vm3319_vm5 = vcmp.ge.f32.partialorder %v3311_v49, 0.0  ;;  %vm3321_vm7 = vcmp.ge.f32.partialorder %v3313_v55, 0.0 }
 0x2bc   : > { %vm3320_vm4 = vcmp.ge.f32.partialorder %v3312_v56, 0.0  ;;  %v3328_v3 = vmul.f32 0.2, %v3312_v56  ;;  %vm3322_vm6 = vcmp.ge.f32.partialorder %v3314_v62, 0.0  ;;  %v3330_v4 = vmul.f32 0.2, %v3314_v62 }
 0x2bd   : > { %v3335_v13 = vsel %vm3319_vm5, %v3311_v49, %v3327_v61  ;;  %v3337_v18 = vsel %vm3321_vm7, %v3313_v55, %v3329_v2  ;;  %v4624_v48 = vpack.c.bf16 %v3462_v36, %v3461_v35  ;;  %v3446_v49 = vld [vmem:[%s5781_s7 + $0x338] sm:$0xff]  ;;  %v3463_v55 = vld [vmem:[%s5781_s7 + $0x3c0] sm:$0xff]  ;;  %v4594_v60 = vpack.c.bf16 %v3414_v44, %v3413_v43  ;;  %v3417_v21 = vld [vmem:[%s5781_s7 + $0x250] sm:$0xff] }
 0x2be   : > { %v3336_v6 = vsel %vm3320_vm4, %v3312_v56, %v3328_v3  ;;  %v3338_v12 = vsel %vm3322_vm6, %v3314_v62, %v3330_v4  ;;  %v3464_v56 = vld [vmem:[%s5781_s7 + $0x3c8] sm:$0xff]  ;;  %v4626_v0 = vpack.c.bf16 %v3446_v49, %v3445_v45  ;;  %v4596_v1 = vpack.c.bf16 %v3432_v51, %v3431_v50  ;;  %v3415_v2 = vld [vmem:[%s5781_s7 + $0x240] sm:$0xff]  ;;  %v3450_v26 = vld [vmem:[%s5781_s7 + $0x358] sm:$0xff] }
 0x2bf   : > { %3542 = vmatprep.mubr.f32.mxu0 %v3336_v6  ;;  %3612 = vmatprep.mubr.f32.mxu1 %v3338_v12  ;;  %v3416_v3 = vld [vmem:[%s5781_s7 + $0x248] sm:$0xff]  ;;  %v3447_v4 = vld [vmem:[%s5781_s7 + $0x340] sm:$0xff]  ;;  %v3248_v42 = vrot.slane %v5547_v27, %v3247_v15  ;;  %v4634_v36 = vpack.c.bf16 %v3450_v26, %v3449_v34  ;;  %v3437_v45 = vld [vmem:[%s5781_s7 + $0x2f0] sm:$0xff] }
 0x2c0   : > { %3543 = vmatmul.mubr.f32.vlgmr.msra.gmra.mrb[8].mxu0 %v3335_v13  ;;  %3613 = vmatmul.mubr.f32.vlgmr.msra.gmra.mrb[8].mxu1 %v3337_v18  ;;  %v3465_v13 = vld [vmem:[%s5781_s7 + $0x3d0] sm:$0xff]  ;;  %v4598_v17 = vpack.c.bf16 %v3416_v3, %v3415_v2  ;;  %v3435_v28 = vld [vmem:[%s5781_s7 + $0x2e0] sm:$0xff]  ;;  %v3436_v29 = vld [vmem:[%s5781_s7 + $0x2e8] sm:$0xff] }
 0x2c1   : > { %4583 = vmatpush3.bf16.msra.mxu0 %v4582_v5  ;;  %4615 = vmatpush3.bf16.msra.mxu1 %v4614_v7  ;;  %v4628_v7 = vpack.c.bf16 %v3464_v56, %v3463_v55  ;;  %v3467_v32 = vld [vmem:[%s5781_s7 + $0x3e0] sm:$0xff]  ;;  %v3468_v33 = vld [vmem:[%s5781_s7 + $0x3e8] sm:$0xff]  ;;  %v3469_v49 = vld [vmem:[%s5781_s7 + $0x3f0] sm:$0xff] }
 0x2c2   : > { %4585 = vmatprep.subr.bf16.mxu0 %v4584_v8  ;;  %4617 = vmatprep.subr.bf16.mxu1 %v4616_v14  ;;  %v3448_v8 = vld [vmem:[%s5781_s7 + $0x348] sm:$0xff]  ;;  %v3466_v14 = vld [vmem:[%s5781_s7 + $0x3d8] sm:$0xff]  ;;  %v4636_v43 = vpack.c.bf16 %v3468_v33, %v3467_v32 }
 0x2c3   : > { %v4630_v19 = vpack.c.bf16 %v3448_v8, %v3447_v4  ;;  %v3452_v44 = vld [vmem:[%s5781_s7 + $0x368] sm:$0xff]  ;;  %v3470_v50 = vld [vmem:[%s5781_s7 + $0x3f8] sm:$0xff]  ;;  %v4058_v4 = vld [vmem:[%s5782_s8] ss:$0 sm:$0xff] }
 0x2c4   : > { %v4640_v56 = vpack.c.bf16 %v3470_v50, %v3469_v49 }
 0x2c5   : > { %4587 = vmatpush3.bf16.msra.mxu0 %v4586_v22  ;;  %4619 = vmatpush3.bf16.msra.mxu1 %v4618_v24  ;;  %v3418_v22 = vld [vmem:[%s5781_s7 + $0x258] sm:$0xff]  ;;  %v3240_v24 = vrot.slane %v5547_v27, %v3239_v9  ;;  %v3420_v27 = vld [vmem:[%s5781_s7 + $0x268] sm:$0xff] }
 0x2c6   : > { %4589 = vmatprep.subr.bf16.mxu0 %v4588_v25  ;;  %v5651_v46 = vpop.f32.mrb[4].mxu0  ;;  %4621 = vmatprep.subr.bf16.mxu1 %v4620_v30  ;;  %v5663_v53 = vpop.f32.mrb[4].mxu1  ;;  %v4632_v25 = vpack.c.bf16 %v3466_v14, %v3465_v13  ;;  %v4602_v35 = vpack.c.bf16 %v3418_v22, %v3417_v21 }
 0x2c7   : > { %v3173_v52 = vpop.f32.mrb[5].mxu0  ;;  %v3214_v59 = vpop.f32.mrb[5].mxu1 }
 0x2c8   : > { %v3266_v57 = vmul.f32 %v3244_v37, %v3173_v52  ;;  %v3175_v58 = vpop.f32.mrb[6].mxu0  ;;  %v3268_v62 = vmul.f32 %v3252_v39, %v3214_v59  ;;  %v3216_v63 = vpop.f32.mrb[6].mxu1  ;;  %v4604_v37 = vpack.c.bf16 %v3436_v29, %v3435_v28  ;;  %v3451_v39 = vld [vmem:[%s5781_s7 + $0x360] sm:$0xff] }
 0x2c9   : > { %4591 = vmatpush3.bf16.msra.mxu0 %v4590_v38  ;;  %v3176_v61 = vpop.f32.mrb[7].mxu0  ;;  %4623 = vmatpush3.bf16.msra.mxu1 %v4622_v40  ;;  %v3217_v6 = vpop.f32.mrb[7].mxu1  ;;  %v3419_v38 = vld [vmem:[%s5781_s7 + $0x260] sm:$0xff]  ;;  %v3265_v40 = vmul.f32 %v3240_v24, %v5651_v46  ;;  %v3298_v46 = vrot.slane %v5555_v31, %v3247_v15  ;;  %v4638_v52 = vpack.c.bf16 %v3452_v44, %v3451_v39  ;;  %v3454_v58 = vld [vmem:[%s5781_s7 + $0x378] sm:$0xff] }
 0x2ca   : > { %4593 = vmatprep.subr.bf16.mxu0 %v4592_v41  ;;  %v3316_v5 = vadd.f32 %v3294_v47, %v3266_v57  ;;  %4625 = vmatprep.subr.bf16.mxu1 %v4624_v48  ;;  %v3318_v12 = vadd.f32 %v3302_v54, %v3268_v62  ;;  %v3290_v41 = vrot.slane %v5555_v31, %v3239_v9  ;;  %v3438_v47 = vld [vmem:[%s5781_s7 + $0x2f8] sm:$0xff]  ;;  %v3453_v57 = vld [vmem:[%s5781_s7 + $0x370] sm:$0xff] }
 0x2cb   : > { %v3267_v48 = vmul.f32 %v3248_v42, %v5663_v53  ;;  %v4606_v51 = vpack.c.bf16 %v3420_v27, %v3419_v38  ;;  %v4608_v54 = vpack.c.bf16 %v3438_v47, %v3437_v45  ;;  %v3421_v53 = vld [vmem:[%s5781_s7 + $0x270] sm:$0xff]  ;;  %v3422_v31 = vld [vmem:[%s5781_s7 + $0x278] sm:$0xff]  ;;  %v4642_v61 = vpack.c.bf16 %v3454_v58, %v3453_v57 }
 0x2cc   : > { %vm3324_vm8 = vcmp.ge.f32.partialorder %v3316_v5, 0.0  ;;  %v3332_v16 = vmul.f32 0.2, %v3316_v5  ;;  %vm3326_vm9 = vcmp.ge.f32.partialorder %v3318_v12, 0.0  ;;  %v3334_v18 = vmul.f32 0.2, %v3318_v12 }
 0x2cd   : > { %4595 = vmatpush3.bf16.msra.mxu0 %v4594_v60  ;;  %4627 = vmatpush3.bf16.msra.mxu1 %v4626_v0  ;;  %v3315_v55 = vadd.f32 %v3290_v41, %v3265_v40  ;;  %v3317_v59 = vadd.f32 %v3298_v46, %v3267_v48  ;;  %v4610_v60 = vpack.c.bf16 %v3422_v31, %v3421_v53 }
 0x2ce   : > { %4597 = vmatprep.subr.bf16.mxu0 %v4596_v1  ;;  %v3340_v23 = vsel %vm3324_vm8, %v3316_v5, %v3332_v16  ;;  %4629 = vmatprep.subr.bf16.mxu1 %v4628_v7  ;;  %v3342_v30 = vsel %vm3326_vm9, %v3318_v12, %v3334_v18 }
 0x2cf   : > { %3682 = vmatprep.mubr.f32.mxu0 %v3340_v23  ;;  %3752 = vmatprep.mubr.f32.mxu1 %v3342_v30  ;;  %v3331_v62 = vmul.f32 0.2, %v3315_v55  ;;  %v3333_v63 = vmul.f32 0.2, %v3317_v59  ;;  %vm3323_vm10 = vcmp.ge.f32.partialorder %v3315_v55, 0.0  ;;  %vm3325_vm11 = vcmp.ge.f32.partialorder %v3317_v59, 0.0 }
 0x2d1   : > { %4599 = vmatpush3.bf16.msra.mxu0 %v4598_v17  ;;  %4631 = vmatpush3.bf16.msra.mxu1 %v4630_v19  ;;  %v3339_v0 = vsel %vm3323_vm10, %v3315_v55, %v3331_v62  ;;  %v3341_v1 = vsel %vm3325_vm11, %v3317_v59, %v3333_v63 }
 0x2d2   : > { %4601 = vmatprep.subr.bf16.mxu0 %v4600_v20  ;;  %4633 = vmatprep.subr.bf16.mxu1 %v4632_v25 }
 0x2d5   : > { %4603 = vmatpush3.bf16.msra.mxu0 %v4602_v35  ;;  %4635 = vmatpush3.bf16.msra.mxu1 %v4634_v36 }
 0x2d6   : > { %4605 = vmatprep.subr.bf16.mxu0 %v4604_v37  ;;  %4637 = vmatprep.subr.bf16.mxu1 %v4636_v43 }
 0x2d9   : > { %4607 = vmatpush3.bf16.msra.mxu0 %v4606_v51  ;;  %4639 = vmatpush3.bf16.msra.mxu1 %v4638_v52 }
 0x2da   : > { %4609 = vmatprep.subr.bf16.mxu0 %v4608_v54  ;;  %4641 = vmatprep.subr.bf16.mxu1 %v4640_v56 }
 0x2dd   : > { %4611 = vmatpush3.bf16.msra.mxu0 %v4610_v60  ;;  %4643 = vmatpush3.bf16.msra.mxu1 %v4642_v61 }
 0x2e0   : > { %3683 = vmatmul.mubr.f32.vlgmr.msra.gmra.mrb[10].mxu0 %v3339_v0  ;;  %3753 = vmatmul.mubr.f32.vlgmr.msra.gmra.mrb[10].mxu1 %v3341_v1 }
 0x393   : > { %v4388_v2 = vpop.f32.mrb[8].mxu0  ;;  %v4423_v3 = vpop.f32.mrb[8].mxu1 }
 0x394   : > { %v4389_v5 = vpop.f32.mrb[9].mxu0  ;;  %v4424_v7 = vpop.f32.mrb[9].mxu1 }
 0x395   : > { %v4390_v6 = vadd.f32 %v4389_v5, %v4388_v2  ;;  %v4425_v8 = vadd.f32 %v4424_v7, %v4423_v3 }
 0x397   : > { %v3545_v9 = vadd.f32 %v4390_v6, %v4058_v4 }
 0x399   : > { %v3615_v10 = vadd.f32 %v4425_v8, %v3545_v9 }
 0x3b3   : > { %v4458_v11 = vpop.f32.mrb[10].mxu0  ;;  %v4493_v12 = vpop.f32.mrb[10].mxu1 }
 0x3b4   : > { %v4459_v13 = vpop.f32.mrb[11].mxu0  ;;  %v4494_v15 = vpop.f32.mrb[11].mxu1 }
 0x3b5   : > { %v4460_v14 = vadd.f32 %v4459_v13, %v4458_v11  ;;  %v4495_v16 = vadd.f32 %v4494_v15, %v4493_v12 }
 0x3b7   : > { %v3685_v17 = vadd.f32 %v4460_v14, %v3615_v10 }
 0x3b9   : > { %v3755_v18 = vadd.f32 %v4495_v16, %v3685_v17 }
 0x3bb   : > { %3759 = vst.msk [vmem:[%s5783_s9] sm:$0x3] %vm3758_vm12, %v3755_v18 }
 0x3bc PF: > { %s19_s30 = sadd.s32 1, %s4882_s30  }
 0x3bd   : > { %p16_p7 = scmp.ge.s32.totalorder %s19_s30, 10  }
 0x3bf   :  { %18 = sbr.rel (!%p16_p7) target bundleno = 1 (0x1), region = 93 }

</bundles_post_ra>
